<compile_context>
chip_gen: v7x
topology: tpu7x:2x2x1
jax: 0.10.0
libtpu: 0.0.40
codegen_flags: <defaults>
</compile_context>

<pallas_src>
import functools

import jax
import jax.numpy as jnp
from jax import lax
from jax.experimental import pallas as pl
from jax.experimental.pallas import tpu as pltpu


# ----------------------------------------------------------------------------
# gamma * g(F), g(F) = F^T F / (||F^T F||_F + eps).  Shared by the kernel and
# the reference so the structural check mirrors the kernel exactly.  F^T F is
# expressed as a dim-0/dim-0 contraction so the MXU consumes the transposed
# operand directly (no explicit transpose).
# ----------------------------------------------------------------------------
def scaled_g_of_f(f, gamma, eps):
    ftf = lax.dot_general(f, f,
                          dimension_numbers=(((0,), (0,)), ((), ())),
                          preferred_element_type=jnp.float32)     # [m, m]
    fro = jnp.sqrt(jnp.sum(ftf * ftf, keepdims=True))             # [1, 1]
    return (gamma / (fro + eps)) * ftf


# ----------------------------------------------------------------------------
# Pallas kernel: all EIGNN_m_iter branches (branch-interleaved, fully unrolled
# fixed-point solves) plus the attention combine, fused into a single
# VMEM-resident invocation.
#
# Layout: node axis = lanes (n = 128, lane-dense), feature axis = sublanes.
#   x_ref  : [m, n]          f32   input features X
#   f_ref  : [num_ks, m, m]  f32   per-branch F parameter
#   sk_ref : [num_ks, n, n]  bf16  per-branch S^k (cast in the wrapper)
#   w1_ref : [H, m], b1_ref : [H, 1], w2_ref : [H, 1]   attention parameters
#   out_ref: [m, n]          f32   attention-combined features (lane-dense;
#                                  the wrapper transposes to the module's [n,m])
# ----------------------------------------------------------------------------
def eignn_att_kernel(x_ref, f_ref, sk_ref, w1_ref, b1_ref, w2_ref, out_ref,
                     *, num_ks, max_iter, gamma, eps):
    n = x_ref.shape[1]
    b1 = b1_ref[...]                                  # [H, 1] f32
    w2 = w2_ref[...]                                  # [H, 1] f32
    w1_bf = w1_ref[...].astype(jnp.bfloat16)          # hoisted bf16 cast

    # Hoisted per-branch loop invariant: gamma*g(F) in bf16 (tiny, 2 vregs
    # each -- cheap to keep live through the unrolled solve).
    g_bf = [scaled_g_of_f(f_ref[i], gamma, eps).astype(jnp.bfloat16)
            for i in range(num_ks)]

    # Branch-interleaved fixed-point solve  Z_i <- G_i Z_i S^k_i + X.
    # For each iteration t, the num_ks independent Z@S matmuls are issued
    # back-to-back, then the num_ks G@(ZS) matmuls -- adjacent independent
    # chains hide MXU fill/drain latency.  S^k (bf16) and X are re-read from
    # VMEM refs inside the body to keep the live-across-iteration vreg set
    # down to the Z accumulators (vlds are free under this latency-bound
    # regime).  bf16 MXU operands, f32 accumulation, f32 elementwise.
    def body(_, z_carry):
        x_in = x_ref[...]                              # [m, n] f32
        zs = [jnp.dot(z_carry[i].astype(jnp.bfloat16), sk_ref[i],
                      preferred_element_type=jnp.float32)
              for i in range(num_ks)]
        return tuple(
            jnp.dot(g_bf[i], zs[i].astype(jnp.bfloat16),
                    preferred_element_type=jnp.float32) + x_in
            for i in range(num_ks))

    z_init = tuple(x_ref[...] for _ in range(num_ks))
    z = lax.fori_loop(0, max_iter, body, z_init, unroll=True)

    # Attention logits, batched across branches:
    #   w_i = W2 . tanh(W1 @ Z_i + b1)  computed as one [H,m]@[m,num_ks*n].
    z_cat_bf = jnp.concatenate(
        [z[i].astype(jnp.bfloat16) for i in range(num_ks)], axis=1)
    h = jnp.tanh(jnp.dot(w1_bf, z_cat_bf,
                         preferred_element_type=jnp.float32) + b1)  # [H, K*n]
    logits_cat = jnp.sum(h * w2, axis=0, keepdims=True)             # [1, K*n]
    logits = [logits_cat[:, i * n:(i + 1) * n] for i in range(num_ks)]

    # Softmax over branches (per node), expressed pairwise so everything stays
    # lane-dense [1, n] / [m, n] elementwise (no sub-tile stacking needed).
    w_max = logits[0]
    for i in range(1, num_ks):
        w_max = jnp.maximum(w_max, logits[i])
    exps = [jnp.exp(w - w_max) for w in logits]
    denom = exps[0]
    for i in range(1, num_ks):
        denom = denom + exps[i]

    out = z[0] * (exps[0] / denom)
    for i in range(1, num_ks):
        out = out + z[i] * (exps[i] / denom)
    out_ref[...] = out.astype(out_ref.dtype)


def eignn_m_att_wo_b_forward(x_mn, f_stack, sk_stack, w1, b1, w2,
                             *, gamma, max_iter, eps=1e-6):
    m, n = x_mn.shape
    num_ks = f_stack.shape[0]
    # S^k is the O(num_ks*n^2) operand: ship it to the kernel already in bf16
    # (halves DMA + VMEM; the MXU consumes bf16 anyway).
    sk_bf = sk_stack.astype(jnp.bfloat16)
    vmem = pl.BlockSpec(memory_space=pltpu.MemorySpace.VMEM)
    out_mn = pl.pallas_call(
        functools.partial(eignn_att_kernel, num_ks=num_ks,
                          max_iter=int(max_iter), gamma=float(gamma),
                          eps=float(eps)),
        out_shape=jax.ShapeDtypeStruct((m, n), jnp.float32),
        in_specs=[vmem] * 6,
        out_specs=vmem,
        # Everything (S^k, F, Z, X) is VMEM-resident at these shapes; keep an
        # explicit scoped-VMEM budget as a guard (safe on v5e/v6e/v7x).
        # TODO(synk): for large graphs (v7x: 64 MiB VMEM) switch to a
        # node-column-tiled grid over S^k / out ("parallel" columns,
        # contraction axis last/"arbitrary") instead of this gridless design.
        compiler_params=pltpu.CompilerParams(vmem_limit_bytes=32 * 1024 * 1024),
    )(x_mn, f_stack, sk_bf, w1, b1, w2)
    return out_mn.T          # module returns node-major [n, m]


# ----------------------------------------------------------------------------
# Glue: symmetric GCN-normalized dense adjacency from edge_index (plain JAX).
# Exactly one self-loop per node (guards against duplicate / pre-existing
# self edges double-counting the diagonal).
# ----------------------------------------------------------------------------
def normalized_adj_dense(edge_index, num_nodes):
    src, dst = edge_index[0], edge_index[1]
    adj = jnp.zeros((num_nodes, num_nodes), jnp.float32).at[src, dst].set(1.0)
    adj = jnp.maximum(adj, adj.T)                              # symmetrize
    adj = jnp.maximum(adj, jnp.eye(num_nodes, dtype=jnp.float32))
    deg = adj.sum(axis=1)
    d_inv_sqrt = jnp.where(deg > 0, 1.0 / jnp.sqrt(deg), 0.0)
    return d_inv_sqrt[:, None] * adj * d_inv_sqrt[None, :]


# ----------------------------------------------------------------------------
# Pure-JAX references.  mxu_bf16=True mirrors the kernel's mixed precision
# (bf16 dot operands, f32 accumulation); False is a full-f32 reference.
# ----------------------------------------------------------------------------
def reference_forward(x, f_stack, sk_stack, w1, b1, w2,
                      *, gamma, max_iter, eps, mxu_bf16):
    def mm(a, b):
        if mxu_bf16:
            a = a.astype(jnp.bfloat16)
            b = b.astype(jnp.bfloat16)
        return jnp.dot(a, b, preferred_element_type=jnp.float32)

    num_ks = f_stack.shape[0]
    z_list, logit_list = [], []
    for i in range(num_ks):
        g = scaled_g_of_f(f_stack[i], gamma, eps)
        s = sk_stack[i]
        z = x
        for _ in range(max_iter):
            z = mm(g, mm(z, s)) + x
        z_list.append(z)
        h = jnp.tanh(mm(w1, z) + b1)
        logit_list.append(jnp.sum(h * w2, axis=0, keepdims=True))

    w_max = logit_list[0]
    for i in range(1, num_ks):
        w_max = jnp.maximum(w_max, logit_list[i])
    exps = [jnp.exp(w - w_max) for w in logit_list]
    denom = exps[0]
    for i in range(1, num_ks):
        denom = denom + exps[i]
    out = z_list[0] * (exps[0] / denom)
    for i in range(1, num_ks):
        out = out + z_list[i] * (exps[i] / denom)
    return out.T


if __name__ == "__main__":
    # Small shapes consistent with the module: n nodes, m input features,
    # one EIGNN branch per k in ks, attention hidden = 16.
    n, m = 128, 64
    ks = (1, 2)
    att_hidden = 16
    gamma, max_iter, threshold = 0.8, 12, 1e-6   # threshold: see TODO at top
    eps_f = 1e-6

    key = jax.random.PRNGKey(0)
    kx, ke, kf, kw1, kb1, kw2 = jax.random.split(key, 6)

    # Node features, EIGNN layout: [m, n] (features x nodes).
    x = jax.random.normal(kx, (m, n), dtype=jnp.float32)

    # Deterministic edge_index: a ring plus random edges (shape [2, E]).
    ring_src = jnp.arange(n, dtype=jnp.int32)
    ring_dst = (ring_src + 1) % n
    rand_edges = jax.random.randint(ke, (2, 256), 0, n, dtype=jnp.int32)
    src = jnp.concatenate([ring_src, ring_dst, rand_edges[0]])
    dst = jnp.concatenate([ring_dst, ring_src, rand_edges[1]])
    edge_index = jnp.stack([src, dst], axis=0)

    s_hat = normalized_adj_dense(edge_index, n)
    sk_stack = jnp.stack([jnp.linalg.matrix_power(s_hat, k) for k in ks])

    # Parameters.  Per-branch F: xavier-uniform [m, m]; attention Linear
    # weights with PyTorch-default uniform bounds.  (The module's B parameter
    # is not used by this forward -- the "wo_B" variant -- so it is omitted.)
    bound_f = (6.0 / (2.0 * m)) ** 0.5
    f_stack = jax.random.uniform(kf, (len(ks), m, m), jnp.float32,
                                 -bound_f, bound_f)
    bound1 = 1.0 / (m ** 0.5)
    w1 = jax.random.uniform(kw1, (att_hidden, m), jnp.float32, -bound1, bound1)
    b1 = jax.random.uniform(kb1, (att_hidden, 1), jnp.float32, -bound1, bound1)
    bound2 = 1.0 / (att_hidden ** 0.5)
    w2 = jax.random.uniform(kw2, (att_hidden, 1), jnp.float32, -bound2, bound2)

    out = eignn_m_att_wo_b_forward(x, f_stack, sk_stack, w1, b1, w2,
                                   gamma=gamma, max_iter=max_iter, eps=eps_f)
    out = jax.block_until_ready(out)
    assert out.shape == (n, m)

    # Structural check: reference mirroring the kernel's mixed precision.
    ref_mixed = reference_forward(x, f_stack, sk_stack, w1, b1, w2,
                                  gamma=gamma, max_iter=max_iter, eps=eps_f,
                                  mxu_bf16=True)
    err_mixed = float(jnp.max(jnp.abs(out - ref_mixed)))
    assert jnp.allclose(out, ref_mixed, atol=2e-3, rtol=2e-3), err_mixed

    # Numerical sanity check against a full-f32 reference (bf16 MXU operands
    # with f32 accumulation stay well inside this envelope).
    ref_f32 = reference_forward(x, f_stack, sk_stack, w1, b1, w2,
                                gamma=gamma, max_iter=max_iter, eps=eps_f,
                                mxu_bf16=False)
    err_f32 = float(jnp.max(jnp.abs(out - ref_f32)))
    assert jnp.allclose(out, ref_f32, atol=5e-2, rtol=5e-2), err_f32

    print("KERNEL_OK")
</pallas_src>

<mosaic_0001>
module attributes {stable_mosaic.version = 11 : i64} {
  func.func @eignn_att_kernel(%arg0: memref<64x128xf32, #tpu.memory_space<vmem>>, %arg1: memref<2x64x64xf32, #tpu.memory_space<vmem>>, %arg2: memref<2x128x128xbf16, #tpu.memory_space<vmem>>, %arg3: memref<16x64xf32, #tpu.memory_space<vmem>>, %arg4: memref<16x1xf32, #tpu.memory_space<vmem>>, %arg5: memref<16x1xf32, #tpu.memory_space<vmem>>, %arg6: memref<64x128xf32, #tpu.memory_space<vmem>>) attributes {dimension_semantics = [], scalar_prefetch = 0 : i64, scratch_operands = 0 : i64, tpu.core_type = #tpu.core_type<tc>} {
    %c0 = arith.constant 0 : index
    %c0_0 = arith.constant 0 : index
    %0 = vector.load %arg4[%c0, %c0_0] : memref<16x1xf32, #tpu.memory_space<vmem>>, vector<16x1xf32>
    %c0_1 = arith.constant 0 : index
    %c0_2 = arith.constant 0 : index
    %1 = vector.load %arg5[%c0_1, %c0_2] : memref<16x1xf32, #tpu.memory_space<vmem>>, vector<16x1xf32>
    %c0_3 = arith.constant 0 : index
    %c0_4 = arith.constant 0 : index
    %2 = vector.load %arg3[%c0_3, %c0_4] : memref<16x64xf32, #tpu.memory_space<vmem>>, vector<16x64xf32>
    %3 = arith.truncf %2 : vector<16x64xf32> to vector<16x64xbf16>
    %c0_5 = arith.constant 0 : index
    %c0_6 = arith.constant 0 : index
    %c0_7 = arith.constant 0 : index
    %4 = vector.load %arg1[%c0_5, %c0_6, %c0_7] : memref<2x64x64xf32, #tpu.memory_space<vmem>>, vector<1x64x64xf32>
    %5 = vector.shape_cast %4 : vector<1x64x64xf32> to vector<64x64xf32>
    %cst = arith.constant dense<0.000000e+00> : vector<64x64xf32>
    %6 = tpu.matmul %5, %5, %cst {dimension_numbers = #tpu.dot_dimension_numbers<[0], [0], [1], [1], [0, 1, 1, 1], [], []>} : vector<64x64xf32>, vector<64x64xf32>, vector<64x64xf32> -> vector<64x64xf32>
    %7 = arith.mulf %6, %6 : vector<64x64xf32>
    %8 = vector.shape_cast %7 : vector<64x64xf32> to vector<1x64x64xf32>
    %cst_8 = arith.constant dense<0.000000e+00> : vector<1xf32>
    %9 = vector.multi_reduction <add>, %8, %cst_8 [1, 2] : vector<1x64x64xf32> to vector<1xf32>
    %10 = vector.shape_cast %9 : vector<1xf32> to vector<1x1x1xf32>
    %11 = vector.extract %10[0, 0, 0] : f32 from vector<1x1x1xf32>
    %12 = vector.broadcast %11 : f32 to vector<1x1xf32>
    %13 = math.sqrt %12 : vector<1x1xf32>
    %cst_9 = arith.constant 9.99999997E-7 : f32
    %14 = vector.broadcast %cst_9 : f32 to vector<1x1xf32>
    %15 = arith.addf %13, %14 : vector<1x1xf32>
    %cst_10 = arith.constant 8.000000e-01 : f32
    %16 = vector.broadcast %cst_10 : f32 to vector<1x1xf32>
    %17 = arith.divf %16, %15 : vector<1x1xf32>
    %18 = vector.broadcast %17 : vector<1x1xf32> to vector<64x64xf32>
    %19 = arith.mulf %18, %6 : vector<64x64xf32>
    %20 = arith.truncf %19 : vector<64x64xf32> to vector<64x64xbf16>
    %c1 = arith.constant 1 : index
    %c0_11 = arith.constant 0 : index
    %c0_12 = arith.constant 0 : index
    %21 = vector.load %arg1[%c1, %c0_11, %c0_12] : memref<2x64x64xf32, #tpu.memory_space<vmem>>, vector<1x64x64xf32>
    %22 = vector.shape_cast %21 : vector<1x64x64xf32> to vector<64x64xf32>
    %cst_13 = arith.constant dense<0.000000e+00> : vector<64x64xf32>
    %23 = tpu.matmul %22, %22, %cst_13 {dimension_numbers = #tpu.dot_dimension_numbers<[0], [0], [1], [1], [0, 1, 1, 1], [], []>} : vector<64x64xf32>, vector<64x64xf32>, vector<64x64xf32> -> vector<64x64xf32>
    %24 = arith.mulf %23, %23 : vector<64x64xf32>
    %25 = vector.shape_cast %24 : vector<64x64xf32> to vector<1x64x64xf32>
    %cst_14 = arith.constant dense<0.000000e+00> : vector<1xf32>
    %26 = vector.multi_reduction <add>, %25, %cst_14 [1, 2] : vector<1x64x64xf32> to vector<1xf32>
    %27 = vector.shape_cast %26 : vector<1xf32> to vector<1x1x1xf32>
    %28 = vector.extract %27[0, 0, 0] : f32 from vector<1x1x1xf32>
    %29 = vector.broadcast %28 : f32 to vector<1x1xf32>
    %30 = math.sqrt %29 : vector<1x1xf32>
    %cst_15 = arith.constant 9.99999997E-7 : f32
    %31 = vector.broadcast %cst_15 : f32 to vector<1x1xf32>
    %32 = arith.addf %30, %31 : vector<1x1xf32>
    %cst_16 = arith.constant 8.000000e-01 : f32
    %33 = vector.broadcast %cst_16 : f32 to vector<1x1xf32>
    %34 = arith.divf %33, %32 : vector<1x1xf32>
    %35 = vector.broadcast %34 : vector<1x1xf32> to vector<64x64xf32>
    %36 = arith.mulf %35, %23 : vector<64x64xf32>
    %37 = arith.truncf %36 : vector<64x64xf32> to vector<64x64xbf16>
    %c0_17 = arith.constant 0 : index
    %c0_18 = arith.constant 0 : index
    %38 = vector.load %arg0[%c0_17, %c0_18] : memref<64x128xf32, #tpu.memory_space<vmem>>, vector<64x128xf32>
    %c0_19 = arith.constant 0 : index
    %c0_20 = arith.constant 0 : index
    %39 = vector.load %arg0[%c0_19, %c0_20] : memref<64x128xf32, #tpu.memory_space<vmem>>, vector<64x128xf32>
    %c0_i32 = arith.constant 0 : i32
    %c0_21 = arith.constant 0 : index
    %c0_22 = arith.constant 0 : index
    %40 = vector.load %arg0[%c0_21, %c0_22] : memref<64x128xf32, #tpu.memory_space<vmem>>, vector<64x128xf32>
    %41 = arith.truncf %38 : vector<64x128xf32> to vector<64x128xbf16>
    %c0_23 = arith.constant 0 : index
    %c0_24 = arith.constant 0 : index
    %c0_25 = arith.constant 0 : index
    %42 = vector.load %arg2[%c0_23, %c0_24, %c0_25] : memref<2x128x128xbf16, #tpu.memory_space<vmem>>, vector<1x128x128xbf16>
    %43 = vector.shape_cast %42 : vector<1x128x128xbf16> to vector<128x128xbf16>
    %cst_26 = arith.constant dense<0.000000e+00> : vector<64x128xf32>
    %44 = tpu.matmul %41, %43, %cst_26 {dimension_numbers = #tpu.dot_dimension_numbers<[1], [0], [0], [1], [0, 0, 1, 1], [], []>} : vector<64x128xbf16>, vector<128x128xbf16>, vector<64x128xf32> -> vector<64x128xf32>
    %45 = arith.truncf %39 : vector<64x128xf32> to vector<64x128xbf16>
    %c1_27 = arith.constant 1 : index
    %c0_28 = arith.constant 0 : index
    %c0_29 = arith.constant 0 : index
    %46 = vector.load %arg2[%c1_27, %c0_28, %c0_29] : memref<2x128x128xbf16, #tpu.memory_space<vmem>>, vector<1x128x128xbf16>
    %47 = vector.shape_cast %46 : vector<1x128x128xbf16> to vector<128x128xbf16>
    %cst_30 = arith.constant dense<0.000000e+00> : vector<64x128xf32>
    %48 = tpu.matmul %45, %47, %cst_30 {dimension_numbers = #tpu.dot_dimension_numbers<[1], [0], [0], [1], [0, 0, 1, 1], [], []>} : vector<64x128xbf16>, vector<128x128xbf16>, vector<64x128xf32> -> vector<64x128xf32>
    %49 = arith.truncf %44 : vector<64x128xf32> to vector<64x128xbf16>
    %cst_31 = arith.constant dense<0.000000e+00> : vector<64x128xf32>
    %50 = tpu.matmul %20, %49, %cst_31 {dimension_numbers = #tpu.dot_dimension_numbers<[1], [0], [0], [1], [0, 0, 1, 1], [], []>} : vector<64x64xbf16>, vector<64x128xbf16>, vector<64x128xf32> -> vector<64x128xf32>
    %51 = arith.addf %50, %40 : vector<64x128xf32>
    %52 = arith.truncf %48 : vector<64x128xf32> to vector<64x128xbf16>
    %cst_32 = arith.constant dense<0.000000e+00> : vector<64x128xf32>
    %53 = tpu.matmul %37, %52, %cst_32 {dimension_numbers = #tpu.dot_dimension_numbers<[1], [0], [0], [1], [0, 0, 1, 1], [], []>} : vector<64x64xbf16>, vector<64x128xbf16>, vector<64x128xf32> -> vector<64x128xf32>
    %54 = arith.addf %53, %40 : vector<64x128xf32>
    %c1_i32 = arith.constant 1 : i32
    %c0_33 = arith.constant 0 : index
    %c0_34 = arith.constant 0 : index
    %55 = vector.load %arg0[%c0_33, %c0_34] : memref<64x128xf32, #tpu.memory_space<vmem>>, vector<64x128xf32>
    %56 = arith.truncf %51 : vector<64x128xf32> to vector<64x128xbf16>
    %c0_35 = arith.constant 0 : index
    %c0_36 = arith.constant 0 : index
    %c0_37 = arith.constant 0 : index
    %57 = vector.load %arg2[%c0_35, %c0_36, %c0_37] : memref<2x128x128xbf16, #tpu.memory_space<vmem>>, vector<1x128x128xbf16>
    %58 = vector.shape_cast %57 : vector<1x128x128xbf16> to vector<128x128xbf16>
    %cst_38 = arith.constant dense<0.000000e+00> : vector<64x128xf32>
    %59 = tpu.matmul %56, %58, %cst_38 {dimension_numbers = #tpu.dot_dimension_numbers<[1], [0], [0], [1], [0, 0, 1, 1], [], []>} : vector<64x128xbf16>, vector<128x128xbf16>, vector<64x128xf32> -> vector<64x128xf32>
    %60 = arith.truncf %54 : vector<64x128xf32> to vector<64x128xbf16>
    %c1_39 = arith.constant 1 : index
    %c0_40 = arith.constant 0 : index
    %c0_41 = arith.constant 0 : index
    %61 = vector.load %arg2[%c1_39, %c0_40, %c0_41] : memref<2x128x128xbf16, #tpu.memory_space<vmem>>, vector<1x128x128xbf16>
    %62 = vector.shape_cast %61 : vector<1x128x128xbf16> to vector<128x128xbf16>
    %cst_42 = arith.constant dense<0.000000e+00> : vector<64x128xf32>
    %63 = tpu.matmul %60, %62, %cst_42 {dimension_numbers = #tpu.dot_dimension_numbers<[1], [0], [0], [1], [0, 0, 1, 1], [], []>} : vector<64x128xbf16>, vector<128x128xbf16>, vector<64x128xf32> -> vector<64x128xf32>
    %64 = arith.truncf %59 : vector<64x128xf32> to vector<64x128xbf16>
    %cst_43 = arith.constant dense<0.000000e+00> : vector<64x128xf32>
    %65 = tpu.matmul %20, %64, %cst_43 {dimension_numbers = #tpu.dot_dimension_numbers<[1], [0], [0], [1], [0, 0, 1, 1], [], []>} : vector<64x64xbf16>, vector<64x128xbf16>, vector<64x128xf32> -> vector<64x128xf32>
    %66 = arith.addf %65, %55 : vector<64x128xf32>
    %67 = arith.truncf %63 : vector<64x128xf32> to vector<64x128xbf16>
    %cst_44 = arith.constant dense<0.000000e+00> : vector<64x128xf32>
    %68 = tpu.matmul %37, %67, %cst_44 {dimension_numbers = #tpu.dot_dimension_numbers<[1], [0], [0], [1], [0, 0, 1, 1], [], []>} : vector<64x64xbf16>, vector<64x128xbf16>, vector<64x128xf32> -> vector<64x128xf32>
    %69 = arith.addf %68, %55 : vector<64x128xf32>
    %c2_i32 = arith.constant 2 : i32
    %c0_45 = arith.constant 0 : index
    %c0_46 = arith.constant 0 : index
    %70 = vector.load %arg0[%c0_45, %c0_46] : memref<64x128xf32, #tpu.memory_space<vmem>>, vector<64x128xf32>
    %71 = arith.truncf %66 : vector<64x128xf32> to vector<64x128xbf16>
    %c0_47 = arith.constant 0 : index
    %c0_48 = arith.constant 0 : index
    %c0_49 = arith.constant 0 : index
    %72 = vector.load %arg2[%c0_47, %c0_48, %c0_49] : memref<2x128x128xbf16, #tpu.memory_space<vmem>>, vector<1x128x128xbf16>
    %73 = vector.shape_cast %72 : vector<1x128x128xbf16> to vector<128x128xbf16>
    %cst_50 = arith.constant dense<0.000000e+00> : vector<64x128xf32>
    %74 = tpu.matmul %71, %73, %cst_50 {dimension_numbers = #tpu.dot_dimension_numbers<[1], [0], [0], [1], [0, 0, 1, 1], [], []>} : vector<64x128xbf16>, vector<128x128xbf16>, vector<64x128xf32> -> vector<64x128xf32>
    %75 = arith.truncf %69 : vector<64x128xf32> to vector<64x128xbf16>
    %c1_51 = arith.constant 1 : index
    %c0_52 = arith.constant 0 : index
    %c0_53 = arith.constant 0 : index
    %76 = vector.load %arg2[%c1_51, %c0_52, %c0_53] : memref<2x128x128xbf16, #tpu.memory_space<vmem>>, vector<1x128x128xbf16>
    %77 = vector.shape_cast %76 : vector<1x128x128xbf16> to vector<128x128xbf16>
    %cst_54 = arith.constant dense<0.000000e+00> : vector<64x128xf32>
    %78 = tpu.matmul %75, %77, %cst_54 {dimension_numbers = #tpu.dot_dimension_numbers<[1], [0], [0], [1], [0, 0, 1, 1], [], []>} : vector<64x128xbf16>, vector<128x128xbf16>, vector<64x128xf32> -> vector<64x128xf32>
    %79 = arith.truncf %74 : vector<64x128xf32> to vector<64x128xbf16>
    %cst_55 = arith.constant dense<0.000000e+00> : vector<64x128xf32>
    %80 = tpu.matmul %20, %79, %cst_55 {dimension_numbers = #tpu.dot_dimension_numbers<[1], [0], [0], [1], [0, 0, 1, 1], [], []>} : vector<64x64xbf16>, vector<64x128xbf16>, vector<64x128xf32> -> vector<64x128xf32>
    %81 = arith.addf %80, %70 : vector<64x128xf32>
    %82 = arith.truncf %78 : vector<64x128xf32> to vector<64x128xbf16>
    %cst_56 = arith.constant dense<0.000000e+00> : vector<64x128xf32>
    %83 = tpu.matmul %37, %82, %cst_56 {dimension_numbers = #tpu.dot_dimension_numbers<[1], [0], [0], [1], [0, 0, 1, 1], [], []>} : vector<64x64xbf16>, vector<64x128xbf16>, vector<64x128xf32> -> vector<64x128xf32>
    %84 = arith.addf %83, %70 : vector<64x128xf32>
    %c3_i32 = arith.constant 3 : i32
    %c0_57 = arith.constant 0 : index
    %c0_58 = arith.constant 0 : index
    %85 = vector.load %arg0[%c0_57, %c0_58] : memref<64x128xf32, #tpu.memory_space<vmem>>, vector<64x128xf32>
    %86 = arith.truncf %81 : vector<64x128xf32> to vector<64x128xbf16>
    %c0_59 = arith.constant 0 : index
    %c0_60 = arith.constant 0 : index
    %c0_61 = arith.constant 0 : index
    %87 = vector.load %arg2[%c0_59, %c0_60, %c0_61] : memref<2x128x128xbf16, #tpu.memory_space<vmem>>, vector<1x128x128xbf16>
    %88 = vector.shape_cast %87 : vector<1x128x128xbf16> to vector<128x128xbf16>
    %cst_62 = arith.constant dense<0.000000e+00> : vector<64x128xf32>
    %89 = tpu.matmul %86, %88, %cst_62 {dimension_numbers = #tpu.dot_dimension_numbers<[1], [0], [0], [1], [0, 0, 1, 1], [], []>} : vector<64x128xbf16>, vector<128x128xbf16>, vector<64x128xf32> -> vector<64x128xf32>
    %90 = arith.truncf %84 : vector<64x128xf32> to vector<64x128xbf16>
    %c1_63 = arith.constant 1 : index
    %c0_64 = arith.constant 0 : index
    %c0_65 = arith.constant 0 : index
    %91 = vector.load %arg2[%c1_63, %c0_64, %c0_65] : memref<2x128x128xbf16, #tpu.memory_space<vmem>>, vector<1x128x128xbf16>
    %92 = vector.shape_cast %91 : vector<1x128x128xbf16> to vector<128x128xbf16>
    %cst_66 = arith.constant dense<0.000000e+00> : vector<64x128xf32>
    %93 = tpu.matmul %90, %92, %cst_66 {dimension_numbers = #tpu.dot_dimension_numbers<[1], [0], [0], [1], [0, 0, 1, 1], [], []>} : vector<64x128xbf16>, vector<128x128xbf16>, vector<64x128xf32> -> vector<64x128xf32>
    %94 = arith.truncf %89 : vector<64x128xf32> to vector<64x128xbf16>
    %cst_67 = arith.constant dense<0.000000e+00> : vector<64x128xf32>
    %95 = tpu.matmul %20, %94, %cst_67 {dimension_numbers = #tpu.dot_dimension_numbers<[1], [0], [0], [1], [0, 0, 1, 1], [], []>} : vector<64x64xbf16>, vector<64x128xbf16>, vector<64x128xf32> -> vector<64x128xf32>
    %96 = arith.addf %95, %85 : vector<64x128xf32>
    %97 = arith.truncf %93 : vector<64x128xf32> to vector<64x128xbf16>
    %cst_68 = arith.constant dense<0.000000e+00> : vector<64x128xf32>
    %98 = tpu.matmul %37, %97, %cst_68 {dimension_numbers = #tpu.dot_dimension_numbers<[1], [0], [0], [1], [0, 0, 1, 1], [], []>} : vector<64x64xbf16>, vector<64x128xbf16>, vector<64x128xf32> -> vector<64x128xf32>
    %99 = arith.addf %98, %85 : vector<64x128xf32>
    %c4_i32 = arith.constant 4 : i32
    %c0_69 = arith.constant 0 : index
    %c0_70 = arith.constant 0 : index
    %100 = vector.load %arg0[%c0_69, %c0_70] : memref<64x128xf32, #tpu.memory_space<vmem>>, vector<64x128xf32>
    %101 = arith.truncf %96 : vector<64x128xf32> to vector<64x128xbf16>
    %c0_71 = arith.constant 0 : index
    %c0_72 = arith.constant 0 : index
    %c0_73 = arith.constant 0 : index
    %102 = vector.load %arg2[%c0_71, %c0_72, %c0_73] : memref<2x128x128xbf16, #tpu.memory_space<vmem>>, vector<1x128x128xbf16>
    %103 = vector.shape_cast %102 : vector<1x128x128xbf16> to vector<128x128xbf16>
    %cst_74 = arith.constant dense<0.000000e+00> : vector<64x128xf32>
    %104 = tpu.matmul %101, %103, %cst_74 {dimension_numbers = #tpu.dot_dimension_numbers<[1], [0], [0], [1], [0, 0, 1, 1], [], []>} : vector<64x128xbf16>, vector<128x128xbf16>, vector<64x128xf32> -> vector<64x128xf32>
    %105 = arith.truncf %99 : vector<64x128xf32> to vector<64x128xbf16>
    %c1_75 = arith.constant 1 : index
    %c0_76 = arith.constant 0 : index
    %c0_77 = arith.constant 0 : index
    %106 = vector.load %arg2[%c1_75, %c0_76, %c0_77] : memref<2x128x128xbf16, #tpu.memory_space<vmem>>, vector<1x128x128xbf16>
    %107 = vector.shape_cast %106 : vector<1x128x128xbf16> to vector<128x128xbf16>
    %cst_78 = arith.constant dense<0.000000e+00> : vector<64x128xf32>
    %108 = tpu.matmul %105, %107, %cst_78 {dimension_numbers = #tpu.dot_dimension_numbers<[1], [0], [0], [1], [0, 0, 1, 1], [], []>} : vector<64x128xbf16>, vector<128x128xbf16>, vector<64x128xf32> -> vector<64x128xf32>
    %109 = arith.truncf %104 : vector<64x128xf32> to vector<64x128xbf16>
    %cst_79 = arith.constant dense<0.000000e+00> : vector<64x128xf32>
    %110 = tpu.matmul %20, %109, %cst_79 {dimension_numbers = #tpu.dot_dimension_numbers<[1], [0], [0], [1], [0, 0, 1, 1], [], []>} : vector<64x64xbf16>, vector<64x128xbf16>, vector<64x128xf32> -> vector<64x128xf32>
    %111 = arith.addf %110, %100 : vector<64x128xf32>
    %112 = arith.truncf %108 : vector<64x128xf32> to vector<64x128xbf16>
    %cst_80 = arith.constant dense<0.000000e+00> : vector<64x128xf32>
    %113 = tpu.matmul %37, %112, %cst_80 {dimension_numbers = #tpu.dot_dimension_numbers<[1], [0], [0], [1], [0, 0, 1, 1], [], []>} : vector<64x64xbf16>, vector<64x128xbf16>, vector<64x128xf32> -> vector<64x128xf32>
    %114 = arith.addf %113, %100 : vector<64x128xf32>
    %c5_i32 = arith.constant 5 : i32
    %c0_81 = arith.constant 0 : index
    %c0_82 = arith.constant 0 : index
    %115 = vector.load %arg0[%c0_81, %c0_82] : memref<64x128xf32, #tpu.memory_space<vmem>>, vector<64x128xf32>
    %116 = arith.truncf %111 : vector<64x128xf32> to vector<64x128xbf16>
    %c0_83 = arith.constant 0 : index
    %c0_84 = arith.constant 0 : index
    %c0_85 = arith.constant 0 : index
    %117 = vector.load %arg2[%c0_83, %c0_84, %c0_85] : memref<2x128x128xbf16, #tpu.memory_space<vmem>>, vector<1x128x128xbf16>
    %118 = vector.shape_cast %117 : vector<1x128x128xbf16> to vector<128x128xbf16>
    %cst_86 = arith.constant dense<0.000000e+00> : vector<64x128xf32>
    %119 = tpu.matmul %116, %118, %cst_86 {dimension_numbers = #tpu.dot_dimension_numbers<[1], [0], [0], [1], [0, 0, 1, 1], [], []>} : vector<64x128xbf16>, vector<128x128xbf16>, vector<64x128xf32> -> vector<64x128xf32>
    %120 = arith.truncf %114 : vector<64x128xf32> to vector<64x128xbf16>
    %c1_87 = arith.constant 1 : index
    %c0_88 = arith.constant 0 : index
    %c0_89 = arith.constant 0 : index
    %121 = vector.load %arg2[%c1_87, %c0_88, %c0_89] : memref<2x128x128xbf16, #tpu.memory_space<vmem>>, vector<1x128x128xbf16>
    %122 = vector.shape_cast %121 : vector<1x128x128xbf16> to vector<128x128xbf16>
    %cst_90 = arith.constant dense<0.000000e+00> : vector<64x128xf32>
    %123 = tpu.matmul %120, %122, %cst_90 {dimension_numbers = #tpu.dot_dimension_numbers<[1], [0], [0], [1], [0, 0, 1, 1], [], []>} : vector<64x128xbf16>, vector<128x128xbf16>, vector<64x128xf32> -> vector<64x128xf32>
    %124 = arith.truncf %119 : vector<64x128xf32> to vector<64x128xbf16>
    %cst_91 = arith.constant dense<0.000000e+00> : vector<64x128xf32>
    %125 = tpu.matmul %20, %124, %cst_91 {dimension_numbers = #tpu.dot_dimension_numbers<[1], [0], [0], [1], [0, 0, 1, 1], [], []>} : vector<64x64xbf16>, vector<64x128xbf16>, vector<64x128xf32> -> vector<64x128xf32>
    %126 = arith.addf %125, %115 : vector<64x128xf32>
    %127 = arith.truncf %123 : vector<64x128xf32> to vector<64x128xbf16>
    %cst_92 = arith.constant dense<0.000000e+00> : vector<64x128xf32>
    %128 = tpu.matmul %37, %127, %cst_92 {dimension_numbers = #tpu.dot_dimension_numbers<[1], [0], [0], [1], [0, 0, 1, 1], [], []>} : vector<64x64xbf16>, vector<64x128xbf16>, vector<64x128xf32> -> vector<64x128xf32>
    %129 = arith.addf %128, %115 : vector<64x128xf32>
    %c6_i32 = arith.constant 6 : i32
    %c0_93 = arith.constant 0 : index
    %c0_94 = arith.constant 0 : index
    %130 = vector.load %arg0[%c0_93, %c0_94] : memref<64x128xf32, #tpu.memory_space<vmem>>, vector<64x128xf32>
    %131 = arith.truncf %126 : vector<64x128xf32> to vector<64x128xbf16>
    %c0_95 = arith.constant 0 : index
    %c0_96 = arith.constant 0 : index
    %c0_97 = arith.constant 0 : index
    %132 = vector.load %arg2[%c0_95, %c0_96, %c0_97] : memref<2x128x128xbf16, #tpu.memory_space<vmem>>, vector<1x128x128xbf16>
    %133 = vector.shape_cast %132 : vector<1x128x128xbf16> to vector<128x128xbf16>
    %cst_98 = arith.constant dense<0.000000e+00> : vector<64x128xf32>
    %134 = tpu.matmul %131, %133, %cst_98 {dimension_numbers = #tpu.dot_dimension_numbers<[1], [0], [0], [1], [0, 0, 1, 1], [], []>} : vector<64x128xbf16>, vector<128x128xbf16>, vector<64x128xf32> -> vector<64x128xf32>
    %135 = arith.truncf %129 : vector<64x128xf32> to vector<64x128xbf16>
    %c1_99 = arith.constant 1 : index
    %c0_100 = arith.constant 0 : index
    %c0_101 = arith.constant 0 : index
    %136 = vector.load %arg2[%c1_99, %c0_100, %c0_101] : memref<2x128x128xbf16, #tpu.memory_space<vmem>>, vector<1x128x128xbf16>
    %137 = vector.shape_cast %136 : vector<1x128x128xbf16> to vector<128x128xbf16>
    %cst_102 = arith.constant dense<0.000000e+00> : vector<64x128xf32>
    %138 = tpu.matmul %135, %137, %cst_102 {dimension_numbers = #tpu.dot_dimension_numbers<[1], [0], [0], [1], [0, 0, 1, 1], [], []>} : vector<64x128xbf16>, vector<128x128xbf16>, vector<64x128xf32> -> vector<64x128xf32>
    %139 = arith.truncf %134 : vector<64x128xf32> to vector<64x128xbf16>
    %cst_103 = arith.constant dense<0.000000e+00> : vector<64x128xf32>
    %140 = tpu.matmul %20, %139, %cst_103 {dimension_numbers = #tpu.dot_dimension_numbers<[1], [0], [0], [1], [0, 0, 1, 1], [], []>} : vector<64x64xbf16>, vector<64x128xbf16>, vector<64x128xf32> -> vector<64x128xf32>
    %141 = arith.addf %140, %130 : vector<64x128xf32>
    %142 = arith.truncf %138 : vector<64x128xf32> to vector<64x128xbf16>
    %cst_104 = arith.constant dense<0.000000e+00> : vector<64x128xf32>
    %143 = tpu.matmul %37, %142, %cst_104 {dimension_numbers = #tpu.dot_dimension_numbers<[1], [0], [0], [1], [0, 0, 1, 1], [], []>} : vector<64x64xbf16>, vector<64x128xbf16>, vector<64x128xf32> -> vector<64x128xf32>
    %144 = arith.addf %143, %130 : vector<64x128xf32>
    %c7_i32 = arith.constant 7 : i32
    %c0_105 = arith.constant 0 : index
    %c0_106 = arith.constant 0 : index
    %145 = vector.load %arg0[%c0_105, %c0_106] : memref<64x128xf32, #tpu.memory_space<vmem>>, vector<64x128xf32>
    %146 = arith.truncf %141 : vector<64x128xf32> to vector<64x128xbf16>
    %c0_107 = arith.constant 0 : index
    %c0_108 = arith.constant 0 : index
    %c0_109 = arith.constant 0 : index
    %147 = vector.load %arg2[%c0_107, %c0_108, %c0_109] : memref<2x128x128xbf16, #tpu.memory_space<vmem>>, vector<1x128x128xbf16>
    %148 = vector.shape_cast %147 : vector<1x128x128xbf16> to vector<128x128xbf16>
    %cst_110 = arith.constant dense<0.000000e+00> : vector<64x128xf32>
    %149 = tpu.matmul %146, %148, %cst_110 {dimension_numbers = #tpu.dot_dimension_numbers<[1], [0], [0], [1], [0, 0, 1, 1], [], []>} : vector<64x128xbf16>, vector<128x128xbf16>, vector<64x128xf32> -> vector<64x128xf32>
    %150 = arith.truncf %144 : vector<64x128xf32> to vector<64x128xbf16>
    %c1_111 = arith.constant 1 : index
    %c0_112 = arith.constant 0 : index
    %c0_113 = arith.constant 0 : index
    %151 = vector.load %arg2[%c1_111, %c0_112, %c0_113] : memref<2x128x128xbf16, #tpu.memory_space<vmem>>, vector<1x128x128xbf16>
    %152 = vector.shape_cast %151 : vector<1x128x128xbf16> to vector<128x128xbf16>
    %cst_114 = arith.constant dense<0.000000e+00> : vector<64x128xf32>
    %153 = tpu.matmul %150, %152, %cst_114 {dimension_numbers = #tpu.dot_dimension_numbers<[1], [0], [0], [1], [0, 0, 1, 1], [], []>} : vector<64x128xbf16>, vector<128x128xbf16>, vector<64x128xf32> -> vector<64x128xf32>
    %154 = arith.truncf %149 : vector<64x128xf32> to vector<64x128xbf16>
    %cst_115 = arith.constant dense<0.000000e+00> : vector<64x128xf32>
    %155 = tpu.matmul %20, %154, %cst_115 {dimension_numbers = #tpu.dot_dimension_numbers<[1], [0], [0], [1], [0, 0, 1, 1], [], []>} : vector<64x64xbf16>, vector<64x128xbf16>, vector<64x128xf32> -> vector<64x128xf32>
    %156 = arith.addf %155, %145 : vector<64x128xf32>
    %157 = arith.truncf %153 : vector<64x128xf32> to vector<64x128xbf16>
    %cst_116 = arith.constant dense<0.000000e+00> : vector<64x128xf32>
    %158 = tpu.matmul %37, %157, %cst_116 {dimension_numbers = #tpu.dot_dimension_numbers<[1], [0], [0], [1], [0, 0, 1, 1], [], []>} : vector<64x64xbf16>, vector<64x128xbf16>, vector<64x128xf32> -> vector<64x128xf32>
    %159 = arith.addf %158, %145 : vector<64x128xf32>
    %c8_i32 = arith.constant 8 : i32
    %c0_117 = arith.constant 0 : index
    %c0_118 = arith.constant 0 : index
    %160 = vector.load %arg0[%c0_117, %c0_118] : memref<64x128xf32, #tpu.memory_space<vmem>>, vector<64x128xf32>
    %161 = arith.truncf %156 : vector<64x128xf32> to vector<64x128xbf16>
    %c0_119 = arith.constant 0 : index
    %c0_120 = arith.constant 0 : index
    %c0_121 = arith.constant 0 : index
    %162 = vector.load %arg2[%c0_119, %c0_120, %c0_121] : memref<2x128x128xbf16, #tpu.memory_space<vmem>>, vector<1x128x128xbf16>
    %163 = vector.shape_cast %162 : vector<1x128x128xbf16> to vector<128x128xbf16>
    %cst_122 = arith.constant dense<0.000000e+00> : vector<64x128xf32>
    %164 = tpu.matmul %161, %163, %cst_122 {dimension_numbers = #tpu.dot_dimension_numbers<[1], [0], [0], [1], [0, 0, 1, 1], [], []>} : vector<64x128xbf16>, vector<128x128xbf16>, vector<64x128xf32> -> vector<64x128xf32>
    %165 = arith.truncf %159 : vector<64x128xf32> to vector<64x128xbf16>
    %c1_123 = arith.constant 1 : index
    %c0_124 = arith.constant 0 : index
    %c0_125 = arith.constant 0 : index
    %166 = vector.load %arg2[%c1_123, %c0_124, %c0_125] : memref<2x128x128xbf16, #tpu.memory_space<vmem>>, vector<1x128x128xbf16>
    %167 = vector.shape_cast %166 : vector<1x128x128xbf16> to vector<128x128xbf16>
    %cst_126 = arith.constant dense<0.000000e+00> : vector<64x128xf32>
    %168 = tpu.matmul %165, %167, %cst_126 {dimension_numbers = #tpu.dot_dimension_numbers<[1], [0], [0], [1], [0, 0, 1, 1], [], []>} : vector<64x128xbf16>, vector<128x128xbf16>, vector<64x128xf32> -> vector<64x128xf32>
    %169 = arith.truncf %164 : vector<64x128xf32> to vector<64x128xbf16>
    %cst_127 = arith.constant dense<0.000000e+00> : vector<64x128xf32>
    %170 = tpu.matmul %20, %169, %cst_127 {dimension_numbers = #tpu.dot_dimension_numbers<[1], [0], [0], [1], [0, 0, 1, 1], [], []>} : vector<64x64xbf16>, vector<64x128xbf16>, vector<64x128xf32> -> vector<64x128xf32>
    %171 = arith.addf %170, %160 : vector<64x128xf32>
    %172 = arith.truncf %168 : vector<64x128xf32> to vector<64x128xbf16>
    %cst_128 = arith.constant dense<0.000000e+00> : vector<64x128xf32>
    %173 = tpu.matmul %37, %172, %cst_128 {dimension_numbers = #tpu.dot_dimension_numbers<[1], [0], [0], [1], [0, 0, 1, 1], [], []>} : vector<64x64xbf16>, vector<64x128xbf16>, vector<64x128xf32> -> vector<64x128xf32>
    %174 = arith.addf %173, %160 : vector<64x128xf32>
    %c9_i32 = arith.constant 9 : i32
    %c0_129 = arith.constant 0 : index
    %c0_130 = arith.constant 0 : index
    %175 = vector.load %arg0[%c0_129, %c0_130] : memref<64x128xf32, #tpu.memory_space<vmem>>, vector<64x128xf32>
    %176 = arith.truncf %171 : vector<64x128xf32> to vector<64x128xbf16>
    %c0_131 = arith.constant 0 : index
    %c0_132 = arith.constant 0 : index
    %c0_133 = arith.constant 0 : index
    %177 = vector.load %arg2[%c0_131, %c0_132, %c0_133] : memref<2x128x128xbf16, #tpu.memory_space<vmem>>, vector<1x128x128xbf16>
    %178 = vector.shape_cast %177 : vector<1x128x128xbf16> to vector<128x128xbf16>
    %cst_134 = arith.constant dense<0.000000e+00> : vector<64x128xf32>
    %179 = tpu.matmul %176, %178, %cst_134 {dimension_numbers = #tpu.dot_dimension_numbers<[1], [0], [0], [1], [0, 0, 1, 1], [], []>} : vector<64x128xbf16>, vector<128x128xbf16>, vector<64x128xf32> -> vector<64x128xf32>
    %180 = arith.truncf %174 : vector<64x128xf32> to vector<64x128xbf16>
    %c1_135 = arith.constant 1 : index
    %c0_136 = arith.constant 0 : index
    %c0_137 = arith.constant 0 : index
    %181 = vector.load %arg2[%c1_135, %c0_136, %c0_137] : memref<2x128x128xbf16, #tpu.memory_space<vmem>>, vector<1x128x128xbf16>
    %182 = vector.shape_cast %181 : vector<1x128x128xbf16> to vector<128x128xbf16>
    %cst_138 = arith.constant dense<0.000000e+00> : vector<64x128xf32>
    %183 = tpu.matmul %180, %182, %cst_138 {dimension_numbers = #tpu.dot_dimension_numbers<[1], [0], [0], [1], [0, 0, 1, 1], [], []>} : vector<64x128xbf16>, vector<128x128xbf16>, vector<64x128xf32> -> vector<64x128xf32>
    %184 = arith.truncf %179 : vector<64x128xf32> to vector<64x128xbf16>
    %cst_139 = arith.constant dense<0.000000e+00> : vector<64x128xf32>
    %185 = tpu.matmul %20, %184, %cst_139 {dimension_numbers = #tpu.dot_dimension_numbers<[1], [0], [0], [1], [0, 0, 1, 1], [], []>} : vector<64x64xbf16>, vector<64x128xbf16>, vector<64x128xf32> -> vector<64x128xf32>
    %186 = arith.addf %185, %175 : vector<64x128xf32>
    %187 = arith.truncf %183 : vector<64x128xf32> to vector<64x128xbf16>
    %cst_140 = arith.constant dense<0.000000e+00> : vector<64x128xf32>
    %188 = tpu.matmul %37, %187, %cst_140 {dimension_numbers = #tpu.dot_dimension_numbers<[1], [0], [0], [1], [0, 0, 1, 1], [], []>} : vector<64x64xbf16>, vector<64x128xbf16>, vector<64x128xf32> -> vector<64x128xf32>
    %189 = arith.addf %188, %175 : vector<64x128xf32>
    %c10_i32 = arith.constant 10 : i32
    %c0_141 = arith.constant 0 : index
    %c0_142 = arith.constant 0 : index
    %190 = vector.load %arg0[%c0_141, %c0_142] : memref<64x128xf32, #tpu.memory_space<vmem>>, vector<64x128xf32>
    %191 = arith.truncf %186 : vector<64x128xf32> to vector<64x128xbf16>
    %c0_143 = arith.constant 0 : index
    %c0_144 = arith.constant 0 : index
    %c0_145 = arith.constant 0 : index
    %192 = vector.load %arg2[%c0_143, %c0_144, %c0_145] : memref<2x128x128xbf16, #tpu.memory_space<vmem>>, vector<1x128x128xbf16>
    %193 = vector.shape_cast %192 : vector<1x128x128xbf16> to vector<128x128xbf16>
    %cst_146 = arith.constant dense<0.000000e+00> : vector<64x128xf32>
    %194 = tpu.matmul %191, %193, %cst_146 {dimension_numbers = #tpu.dot_dimension_numbers<[1], [0], [0], [1], [0, 0, 1, 1], [], []>} : vector<64x128xbf16>, vector<128x128xbf16>, vector<64x128xf32> -> vector<64x128xf32>
    %195 = arith.truncf %189 : vector<64x128xf32> to vector<64x128xbf16>
    %c1_147 = arith.constant 1 : index
    %c0_148 = arith.constant 0 : index
    %c0_149 = arith.constant 0 : index
    %196 = vector.load %arg2[%c1_147, %c0_148, %c0_149] : memref<2x128x128xbf16, #tpu.memory_space<vmem>>, vector<1x128x128xbf16>
    %197 = vector.shape_cast %196 : vector<1x128x128xbf16> to vector<128x128xbf16>
    %cst_150 = arith.constant dense<0.000000e+00> : vector<64x128xf32>
    %198 = tpu.matmul %195, %197, %cst_150 {dimension_numbers = #tpu.dot_dimension_numbers<[1], [0], [0], [1], [0, 0, 1, 1], [], []>} : vector<64x128xbf16>, vector<128x128xbf16>, vector<64x128xf32> -> vector<64x128xf32>
    %199 = arith.truncf %194 : vector<64x128xf32> to vector<64x128xbf16>
    %cst_151 = arith.constant dense<0.000000e+00> : vector<64x128xf32>
    %200 = tpu.matmul %20, %199, %cst_151 {dimension_numbers = #tpu.dot_dimension_numbers<[1], [0], [0], [1], [0, 0, 1, 1], [], []>} : vector<64x64xbf16>, vector<64x128xbf16>, vector<64x128xf32> -> vector<64x128xf32>
    %201 = arith.addf %200, %190 : vector<64x128xf32>
    %202 = arith.truncf %198 : vector<64x128xf32> to vector<64x128xbf16>
    %cst_152 = arith.constant dense<0.000000e+00> : vector<64x128xf32>
    %203 = tpu.matmul %37, %202, %cst_152 {dimension_numbers = #tpu.dot_dimension_numbers<[1], [0], [0], [1], [0, 0, 1, 1], [], []>} : vector<64x64xbf16>, vector<64x128xbf16>, vector<64x128xf32> -> vector<64x128xf32>
    %204 = arith.addf %203, %190 : vector<64x128xf32>
    %c11_i32 = arith.constant 11 : i32
    %c0_153 = arith.constant 0 : index
    %c0_154 = arith.constant 0 : index
    %205 = vector.load %arg0[%c0_153, %c0_154] : memref<64x128xf32, #tpu.memory_space<vmem>>, vector<64x128xf32>
    %206 = arith.truncf %201 : vector<64x128xf32> to vector<64x128xbf16>
    %c0_155 = arith.constant 0 : index
    %c0_156 = arith.constant 0 : index
    %c0_157 = arith.constant 0 : index
    %207 = vector.load %arg2[%c0_155, %c0_156, %c0_157] : memref<2x128x128xbf16, #tpu.memory_space<vmem>>, vector<1x128x128xbf16>
    %208 = vector.shape_cast %207 : vector<1x128x128xbf16> to vector<128x128xbf16>
    %cst_158 = arith.constant dense<0.000000e+00> : vector<64x128xf32>
    %209 = tpu.matmul %206, %208, %cst_158 {dimension_numbers = #tpu.dot_dimension_numbers<[1], [0], [0], [1], [0, 0, 1, 1], [], []>} : vector<64x128xbf16>, vector<128x128xbf16>, vector<64x128xf32> -> vector<64x128xf32>
    %210 = arith.truncf %204 : vector<64x128xf32> to vector<64x128xbf16>
    %c1_159 = arith.constant 1 : index
    %c0_160 = arith.constant 0 : index
    %c0_161 = arith.constant 0 : index
    %211 = vector.load %arg2[%c1_159, %c0_160, %c0_161] : memref<2x128x128xbf16, #tpu.memory_space<vmem>>, vector<1x128x128xbf16>
    %212 = vector.shape_cast %211 : vector<1x128x128xbf16> to vector<128x128xbf16>
    %cst_162 = arith.constant dense<0.000000e+00> : vector<64x128xf32>
    %213 = tpu.matmul %210, %212, %cst_162 {dimension_numbers = #tpu.dot_dimension_numbers<[1], [0], [0], [1], [0, 0, 1, 1], [], []>} : vector<64x128xbf16>, vector<128x128xbf16>, vector<64x128xf32> -> vector<64x128xf32>
    %214 = arith.truncf %209 : vector<64x128xf32> to vector<64x128xbf16>
    %cst_163 = arith.constant dense<0.000000e+00> : vector<64x128xf32>
    %215 = tpu.matmul %20, %214, %cst_163 {dimension_numbers = #tpu.dot_dimension_numbers<[1], [0], [0], [1], [0, 0, 1, 1], [], []>} : vector<64x64xbf16>, vector<64x128xbf16>, vector<64x128xf32> -> vector<64x128xf32>
    %216 = arith.addf %215, %205 : vector<64x128xf32>
    %217 = arith.truncf %213 : vector<64x128xf32> to vector<64x128xbf16>
    %cst_164 = arith.constant dense<0.000000e+00> : vector<64x128xf32>
    %218 = tpu.matmul %37, %217, %cst_164 {dimension_numbers = #tpu.dot_dimension_numbers<[1], [0], [0], [1], [0, 0, 1, 1], [], []>} : vector<64x64xbf16>, vector<64x128xbf16>, vector<64x128xf32> -> vector<64x128xf32>
    %219 = arith.addf %218, %205 : vector<64x128xf32>
    %220 = arith.truncf %216 : vector<64x128xf32> to vector<64x128xbf16>
    %221 = arith.truncf %219 : vector<64x128xf32> to vector<64x128xbf16>
    %222 = tpu.concatenate %220, %221 in 1 : vector<64x128xbf16>, vector<64x128xbf16> -> vector<64x256xbf16>
    %cst_165 = arith.constant dense<0.000000e+00> : vector<16x256xf32>
    %223 = tpu.matmul %3, %222, %cst_165 {dimension_numbers = #tpu.dot_dimension_numbers<[1], [0], [0], [1], [0, 0, 1, 1], [], []>} : vector<16x64xbf16>, vector<64x256xbf16>, vector<16x256xf32> -> vector<16x256xf32>
    %224 = vector.broadcast %0 : vector<16x1xf32> to vector<16x256xf32>
    %225 = arith.addf %223, %224 : vector<16x256xf32>
    %226 = math.tanh %225 : vector<16x256xf32>
    %227 = vector.broadcast %1 : vector<16x1xf32> to vector<16x256xf32>
    %228 = arith.mulf %226, %227 : vector<16x256xf32>
    %cst_166 = arith.constant dense<0.000000e+00> : vector<256xf32>
    %229 = vector.multi_reduction <add>, %228, %cst_166 [0] : vector<16x256xf32> to vector<256xf32>
    %230 = vector.shape_cast %229 : vector<256xf32> to vector<1x256xf32>
    %231 = vector.extract_strided_slice %230 {offsets = [0, 0], sizes = [1, 128], strides = [1, 1]} : vector<1x256xf32> to vector<1x128xf32>
    %232 = vector.extract_strided_slice %230 {offsets = [0, 128], sizes = [1, 128], strides = [1, 1]} : vector<1x256xf32> to vector<1x128xf32>
    %233 = arith.maximumf %231, %232 : vector<1x128xf32>
    %234 = arith.subf %231, %233 : vector<1x128xf32>
    %235 = math.exp %234 : vector<1x128xf32>
    %236 = arith.subf %232, %233 : vector<1x128xf32>
    %237 = math.exp %236 : vector<1x128xf32>
    %238 = arith.addf %235, %237 : vector<1x128xf32>
    %239 = arith.divf %235, %238 : vector<1x128xf32>
    %240 = vector.broadcast %239 : vector<1x128xf32> to vector<64x128xf32>
    %241 = arith.mulf %216, %240 : vector<64x128xf32>
    %242 = arith.divf %237, %238 : vector<1x128xf32>
    %243 = vector.broadcast %242 : vector<1x128xf32> to vector<64x128xf32>
    %244 = arith.mulf %219, %243 : vector<64x128xf32>
    %245 = arith.addf %241, %244 : vector<64x128xf32>
    %c0_167 = arith.constant 0 : index
    %c0_168 = arith.constant 0 : index
    %246 = vector.load %arg6[%c0_167, %c0_168] : memref<64x128xf32, #tpu.memory_space<vmem>>, vector<64x128xf32>
    tpu.vector_store %arg6[%c0_167, %c0_168], %245 {strides = array<i32>} : memref<64x128xf32, #tpu.memory_space<vmem>>, vector<64x128xf32>,
    return
  }
}

</mosaic_0001>

<bundles_post_ra>
// kernel: tpu_custom_call.1
= control target key start
LH: loop header
LB: loop body
LE: loop exit
PB: predicated region body
PF: predicated region fallthrough
CT: control target
= control target key end

     0   :  { %11 = vsyncpa [#allocation3], 0  ;;  %s7279_s0 = inlined_call_operand.hbm [shape: f32[64,128], index: 0, kind: input, shape index: {}]   ;;  %s7280_s1 = inlined_call_operand.hbm [shape: f32[2,64,64], index: 1, kind: input, shape index: {}]   ;;  %s7281_s2 = inlined_call_operand.hbm [shape: bf16[2,128,128], index: 2, kind: input, shape index: {}]   ;;  %s7282_s3 = inlined_call_operand.vmem [shape: f32[16,64], index: 3, kind: input, shape index: {}]   ;;  %s7283_s4 = inlined_call_operand.vmem [shape: f32[16,1], index: 4, kind: input, shape index: {}]   ;;  %s7284_s5 = inlined_call_operand.vmem [shape: f32[16,1], index: 5, kind: input, shape index: {}]   ;;  %s7285_s6 = inlined_call_operand.hbm [shape: f32[64,128], index: 6, kind: output, shape index: {}]  }
   0x1   :  { %12 = vsyncpa [#allocation6], 0 }
   0x2   :  { %13 = vsyncpa [#allocation4], 0  ;;  %s6037_s21 = smov [#allocation5]   ;;  %s6038_s23 = smov [#allocation2]  }
   0x3   :  { %s31_s22 = sshll.u32 %s6037_s21, 4  ;;  %s19_s24 = sshll.u32 %s6038_s23, 4  ;;  %s32_s22 = int_to_ptr.vmem [resolvable:$true] %s31_s22  ;;  %s6081_s24 = int_to_ptr.vmem [resolvable:$true] %s19_s24 }
   0x4   :  { %s5943_s27 = scalar_lea.hbm %s7280_s1, 2048 }
   0x5   :  { %p5944_p0 = scmp.ne.s32.totalorder %s7280_s1, %s5943_s27  ;;  %p5947_p1 = scmp.lt.u32.totalorder %s5943_s27, %s7280_s1 }
   0x7   :  { %p5949_p2 = pnand %p5947_p1, %p5944_p0 }
   0x9   :  { %5952 = shalt.err (!%p5949_p2)
}
   0xa   :  { %s5953_s8 = scalar_lea.vmem %s32_s22, 2048  ;;  %p5958_p4 = scmp.lt.s32.totalorder %s32_s22, %s32_s22 }
   0xb   :  { %p5954_p3 = scmp.ne.s32.totalorder %s32_s22, %s5953_s8  ;;  %p5959_p5 = scmp.lt.s32.totalorder %s5953_s8, %s5953_s8 }
   0xd   :  { %p5960_p6 = por %p5959_p5, %p5958_p4 }
   0xf   :  { %p5961_p7 = pnand %p5960_p6, %p5954_p3 }
  0x11   :  { %5964 = shalt.err (!%p5961_p7)
}
  0x12   :  { %s6039_s9 = smov 128   ;;  %s6040_s10 = smov 8  }
  0x13   :  { %37 = dma.hbm_to_vmem [thread:$0]  %s7280_s1, 2048, %s32_s22, [#allocation6], %s6039_s9, %s6039_s9, %s6040_s10  }
  0x14   :  { %s5965_s15 = scalar_lea.hbm %s7279_s0, 1024 }
  0x15   :  { %p5966_p8 = scmp.ne.s32.totalorder %s7279_s0, %s5965_s15  ;;  %p5969_p9 = scmp.lt.u32.totalorder %s5965_s15, %s7279_s0 }
  0x17   :  { %p5971_p10 = pnand %p5969_p9, %p5966_p8 }
  0x19   :  { %5974 = shalt.err (!%p5971_p10)
}
  0x1a   :  { %s5975_s20 = scalar_lea.vmem %s6081_s24, 1024  ;;  %p5980_p12 = scmp.lt.s32.totalorder %s6081_s24, %s6081_s24 }
  0x1b   :  { %p5976_p11 = scmp.ne.s32.totalorder %s6081_s24, %s5975_s20  ;;  %p5981_p13 = scmp.lt.s32.totalorder %s5975_s20, %s5975_s20 }
  0x1d   :  { %p5982_p0 = por %p5981_p13, %p5980_p12 }
  0x1f   :  { %p5983_p1 = pnand %p5982_p0, %p5976_p11 }
  0x21   :  { %5986 = shalt.err (!%p5983_p1)
}
  0x22   :  { %25 = dma.hbm_to_vmem [thread:$0]  %s7279_s0, 1024, %s6081_s24, [#allocation3], %s6039_s9, %s6039_s9, %s6040_s10  }
  0x23   :  { %s6041_s22 = smov [#allocation7]   ;;  %s5987_s27 = scalar_lea.hbm %s7281_s2, 2048 }
  0x24   :  { %s43_s23 = sshll.u32 %s6041_s22, 4  ;;  %p5988_p2 = scmp.ne.s32.totalorder %s7281_s2, %s5987_s27  ;;  %s44_s23 = int_to_ptr.vmem [resolvable:$true] %s43_s23 }
  0x25   :  { %p5991_p3 = scmp.lt.u32.totalorder %s5987_s27, %s7281_s2 }
  0x27   :  { %p5993_p4 = pnand %p5991_p3, %p5988_p2 }
  0x29   :  { %5996 = shalt.err (!%p5993_p4)
}
  0x2a   :  { %s5997_s8 = scalar_lea.vmem %s44_s23, 2048  ;;  %p6002_p6 = scmp.lt.s32.totalorder %s44_s23, %s44_s23 }
  0x2b   :  { %p5998_p5 = scmp.ne.s32.totalorder %s44_s23, %s5997_s8  ;;  %p6003_p7 = scmp.lt.s32.totalorder %s5997_s8, %s5997_s8 }
  0x2d   :  { %p6004_p8 = por %p6003_p7, %p6002_p6 }
  0x2f   :  { %p6005_p9 = pnand %p6004_p8, %p5998_p5 }
  0x31   :  { %6008 = shalt.err (!%p6005_p9)
}
  0x32   :  { %s6042_s0 = smov 64   ;;  %s6043_s24 = smov 4  }
  0x33   :  { %49 = dma.hbm_to_vmem [thread:$0]  %s7281_s2, 2048, %s44_s23, [#allocation6], %s6042_s0, %s6042_s0, %s6043_s24  }
  0x34   :  { %6031 = dma.done.wait [#allocation3], 1024  }
  0x35   :  { %6032 = vsyncadd [#allocation3], 4294966272 }
  0x36   :  { %6033 = dma.done.wait [#allocation6], 4096  }
  0x37   :  { %6034 = vsyncadd [#allocation6], 4294963200  ;;  %v299_v0 = vld [vmem:[#allocation5 + $0x40] sm:$0xff]  ;;  %v300_v2 = vld [vmem:[#allocation5 + $0x48] sm:$0xff]  ;;  %vm113_vm0 = vcmask 523264  }
  0x38   :  { %v73_v1 = vld [vmem:[#allocation5] sm:$0xff]  ;;  %307 = vxpose.xlu1.b32.start [1/8] (short) (narrow) %v299_v0, 64  ;;  %v74_v3 = vld [vmem:[#allocation5 + $0x8] sm:$0xff]  ;;  %v301_v4 = vld [vmem:[#allocation5 + $0x50] sm:$0xff]  ;;  %v5822_v5 = vpack.c.bf16 %v300_v2, %v299_v0 }
  0x39   :  { %81 = vxpose.xlu0.b32.start [1/8] (short) (narrow) %v73_v1, 64  ;;  %v75_v6 = vld [vmem:[#allocation5 + $0x10] sm:$0xff]  ;;  %v302_v7 = vld [vmem:[#allocation5 + $0x58] sm:$0xff]  ;;  %v5806_v9 = vpack.c.bf16 %v74_v3, %v73_v1  ;;  %v303_v12 = vld [vmem:[#allocation5 + $0x60] sm:$0xff] }
  0x3a   :  { %v76_v8 = vld [vmem:[#allocation5 + $0x18] sm:$0xff]  ;;  %v5826_v10 = vpack.c.bf16 %v302_v7, %v301_v4  ;;  %5823 = vmatprep.subr.bf16.mxu1 %v5822_v5  ;;  %v77_v13 = vld [vmem:[#allocation5 + $0x20] sm:$0xff]  ;;  %v304_v14 = vld [vmem:[#allocation5 + $0x68] sm:$0xff] }
  0x3b   :  { %v5810_v11 = vpack.c.bf16 %v76_v8, %v75_v6  ;;  %5807 = vmatprep.subr.bf16.mxu0 %v5806_v9  ;;  %5825 = vmatpush3.bf16.msra.mxu1 %v5822_v5  ;;  %v78_v15 = vld [vmem:[#allocation5 + $0x28] sm:$0xff]  ;;  %v5830_v16 = vpack.c.bf16 %v304_v14, %v303_v12  ;;  %v305_v18 = vld [vmem:[#allocation5 + $0x70] sm:$0xff]  ;;  %v306_v19 = vld [vmem:[#allocation5 + $0x78] sm:$0xff] }
  0x3c   :  { %308 = vxpose.xlu1.b32.cont [2/8] (short) (narrow) %v300_v2, 64  ;;  %5809 = vmatpush3.bf16.msra.mxu0 %v5806_v9  ;;  %v5814_v17 = vpack.c.bf16 %v78_v15, %v77_v13  ;;  %v79_v20 = vld [vmem:[#allocation5 + $0x30] sm:$0xff]  ;;  %v80_v21 = vld [vmem:[#allocation5 + $0x38] sm:$0xff]  ;;  %v5834_v22 = vpack.c.bf16 %v306_v19, %v305_v18  ;;  %v6146_v40 = vld [vmem:[#allocation7 + $0x40] sm:$0xff]  }
  0x3d   :  { %82 = vxpose.xlu0.b32.cont [2/8] (short) (narrow) %v74_v3, 64  ;;  %5827 = vmatprep.subr.bf16.mxu1 %v5826_v10  ;;  %v5818_v23 = vpack.c.bf16 %v80_v21, %v79_v20  ;;  %v6148_v41 = vld [vmem:[#allocation7] sm:$0xff]   ;;  %v6154_v42 = vld [vmem:[#allocation7 + $0x48] sm:$0xff]   ;;  %v6162_v44 = vld [vmem:[#allocation7 + $0x50] sm:$0xff]  }
  0x3e   :  { %5811 = vmatprep.subr.bf16.mxu0 %v5810_v11  ;;  %v6156_v43 = vld [vmem:[#allocation7 + $0x8] sm:$0xff]   ;;  %v6164_v45 = vld [vmem:[#allocation7 + $0x10] sm:$0xff]   ;;  %v6170_v46 = vld [vmem:[#allocation7 + $0x58] sm:$0xff]  }
  0x3f   :  { %5829 = vmatpush3.bf16.msra.mxu1 %v5826_v10  ;;  %v6172_v47 = vld [vmem:[#allocation7 + $0x18] sm:$0xff]   ;;  %v6178_v48 = vld [vmem:[#allocation7 + $0x60] sm:$0xff]   ;;  %v6186_v50 = vld [vmem:[#allocation7 + $0x68] sm:$0xff]  }
  0x40   :  { %309 = vxpose.xlu1.b32.cont [3/8] (short) (narrow) %v301_v4, 64  ;;  %5813 = vmatpush3.bf16.msra.mxu0 %v5810_v11  ;;  %v6180_v49 = vld [vmem:[#allocation7 + $0x20] sm:$0xff]   ;;  %v6188_v51 = vld [vmem:[#allocation7 + $0x28] sm:$0xff]   ;;  %v6194_v52 = vld [vmem:[#allocation7 + $0x70] sm:$0xff]  }
  0x41   :  { %83 = vxpose.xlu0.b32.cont [3/8] (short) (narrow) %v75_v6, 64  ;;  %5831 = vmatprep.subr.bf16.mxu1 %v5830_v16  ;;  %v6196_v53 = vld [vmem:[#allocation7 + $0x30] sm:$0xff]   ;;  %v6202_v54 = vld [vmem:[#allocation7 + $0x78] sm:$0xff]  }
  0x42   :  { %5815 = vmatprep.subr.bf16.mxu0 %v5814_v17  ;;  %v6204_v55 = vld [vmem:[#allocation7 + $0x38] sm:$0xff]   ;;  %v6207_v56 = vld [vmem:[#allocation2 + $0x10] sm:$0xff] }
  0x43   :  { %5833 = vmatpush3.bf16.msra.mxu1 %v5830_v16  ;;  %v6209_v57 = vld [vmem:[#allocation2 + $0x18] sm:$0xff]  ;;  %v6216_v59 = vld [vmem:[#allocation2 + $0x30] sm:$0xff] }
  0x44   :  { %310 = vxpose.xlu1.b32.cont [4/8] (short) (narrow) %v302_v7, 64  ;;  %5817 = vmatpush3.bf16.msra.mxu0 %v5814_v17  ;;  %v532_v58 = vpack.c.bf16 %v6209_v57, %v6207_v56  ;;  %v6218_v60 = vld [vmem:[#allocation2 + $0x38] sm:$0xff] }
  0x45   :  { %84 = vxpose.xlu0.b32.cont [4/8] (short) (narrow) %v76_v8, 64  ;;  %5835 = vmatprep.subr.bf16.mxu1 %v5834_v22  ;;  %v534_v61 = vpack.c.bf16 %v6218_v60, %v6216_v59 }
  0x46   :  { %5819 = vmatprep.subr.bf16.mxu0 %v5818_v23 }
  0x47   :  { %5837 = vmatpush3.bf16.msra.mxu1 %v5834_v22 }
  0x48   :  { %311 = vxpose.xlu1.b32.cont [5/8] (short) (narrow) %v303_v12, 64  ;;  %5821 = vmatpush3.bf16.msra.mxu0 %v5818_v23 }
  0x49   :  { %85 = vxpose.xlu0.b32.cont [5/8] (short) (narrow) %v77_v13, 64  ;;  %4870 = vmatprep.subr.bf16.mxu1 %v6146_v40 }
  0x4a   :  { %4846 = vmatprep.subr.bf16.mxu0 %v6148_v41 }
  0x4c   :  { %312 = vxpose.xlu1.b32.cont [6/8] (short) (narrow) %v304_v14, 64 }
  0x4d   :  { %86 = vxpose.xlu0.b32.cont [6/8] (short) (narrow) %v78_v15, 64 }
  0x50   :  { %313 = vxpose.xlu1.b32.cont [7/8] (short) (narrow) %v305_v18, 64 }
  0x51   :  { %87 = vxpose.xlu0.b32.cont [7/8] (short) (narrow) %v79_v20, 64 }
  0x54   :  { %314 = vxpose.xlu1.b32.end [8/8] (short) (narrow) %v306_v19, 64 }
  0x55   :  { %88 = vxpose.xlu0.b32.end [8/8] (short) (narrow) %v80_v21, 64 }
  0xb8   :  { %v323_v24 = vpop.trf.xlu1 }
  0xb9   :  { %v97_v25 = vpop.trf.xlu0  ;;  %4834 = vmatprep.mubr.msk.f32.mxu1 %vm113_vm0, %v323_v24 }
  0xba   :  { %4806 = vmatprep.mubr.msk.f32.mxu0 %vm113_vm0, %v97_v25 }
  0xbc   :  { %v324_v26 = vpop.trf.xlu1 }
  0xbd   :  { %v98_v27 = vpop.trf.xlu0  ;;  %4835 = vmatmul.mubr.msk.f32.vlgmr.msra.gmra.mrb[0].mxu1 %vm113_vm0, %v324_v26 }
  0xbe   :  { %4807 = vmatmul.mubr.msk.f32.vlgmr.msra.gmra.mrb[0].mxu0 %vm113_vm0, %v98_v27  ;;  %4871 = vmatpush3.bf16.msra.mxu1 %v6146_v40 }
  0xbf   :  { %4847 = vmatpush3.bf16.msra.mxu0 %v6148_v41  ;;  %4872 = vmatprep.subr.bf16.mxu1 %v6154_v42 }
  0xc0   :  { %v325_v28 = vpop.trf.xlu1  ;;  %4848 = vmatprep.subr.bf16.mxu0 %v6156_v43 }
  0xc1   :  { %v99_v29 = vpop.trf.xlu0  ;;  %4837 = vmatprep.mubr.msk.f32.mxu1 %vm113_vm0, %v325_v28 }
  0xc2   :  { %4809 = vmatprep.mubr.msk.f32.mxu0 %vm113_vm0, %v99_v29  ;;  %4873 = vmatpush3.bf16.msra.mxu1 %v6154_v42 }
  0xc3   :  { %4849 = vmatpush3.bf16.msra.mxu0 %v6156_v43  ;;  %4874 = vmatprep.subr.bf16.mxu1 %v6162_v44 }
  0xc4   :  { %v326_v30 = vpop.trf.xlu1  ;;  %4850 = vmatprep.subr.bf16.mxu0 %v6164_v45 }
  0xc5   :  { %v100_v31 = vpop.trf.xlu0  ;;  %4838 = vmatmul.mubr.msk.f32.gmra.mrb[2].mxu1 %vm113_vm0, %v326_v30 }
  0xc6   :  { %4810 = vmatmul.mubr.msk.f32.gmra.mrb[2].mxu0 %vm113_vm0, %v100_v31  ;;  %4875 = vmatpush3.bf16.msra.mxu1 %v6162_v44 }
  0xc7   :  { %4851 = vmatpush3.bf16.msra.mxu0 %v6164_v45  ;;  %4876 = vmatprep.subr.bf16.mxu1 %v6170_v46 }
  0xc8   :  { %v327_v32 = vpop.trf.xlu1  ;;  %4852 = vmatprep.subr.bf16.mxu0 %v6172_v47 }
  0xc9   :  { %v101_v33 = vpop.trf.xlu0  ;;  %4840 = vmatprep.mubr.msk.f32.mxu1 %vm113_vm0, %v327_v32 }
  0xca   :  { %4812 = vmatprep.mubr.msk.f32.mxu0 %vm113_vm0, %v101_v33  ;;  %4877 = vmatpush3.bf16.msra.mxu1 %v6170_v46 }
  0xcb   :  { %4853 = vmatpush3.bf16.msra.mxu0 %v6172_v47  ;;  %4878 = vmatprep.subr.bf16.mxu1 %v6178_v48 }
  0xcc   :  { %v328_v34 = vpop.trf.xlu1  ;;  %4854 = vmatprep.subr.bf16.mxu0 %v6180_v49 }
  0xcd   :  { %v102_v35 = vpop.trf.xlu0  ;;  %4841 = vmatmul.mubr.msk.f32.gmra.mrb[4].mxu1 %vm113_vm0, %v328_v34 }
  0xce   :  { %4813 = vmatmul.mubr.msk.f32.gmra.mrb[4].mxu0 %vm113_vm0, %v102_v35  ;;  %4879 = vmatpush3.bf16.msra.mxu1 %v6178_v48 }
  0xcf   :  { %4855 = vmatpush3.bf16.msra.mxu0 %v6180_v49  ;;  %4880 = vmatprep.subr.bf16.mxu1 %v6186_v50 }
  0xd0   :  { %v329_v36 = vpop.trf.xlu1  ;;  %4856 = vmatprep.subr.bf16.mxu0 %v6188_v51 }
  0xd1   :  { %v103_v37 = vpop.trf.xlu0  ;;  %4843 = vmatprep.mubr.msk.f32.mxu1 %vm113_vm0, %v329_v36 }
  0xd2   :  { %4815 = vmatprep.mubr.msk.f32.mxu0 %vm113_vm0, %v103_v37  ;;  %4881 = vmatpush3.bf16.msra.mxu1 %v6186_v50 }
  0xd3   :  { %4857 = vmatpush3.bf16.msra.mxu0 %v6188_v51  ;;  %4882 = vmatprep.subr.bf16.mxu1 %v6194_v52 }
  0xd4   :  { %v330_v38 = vpop.trf.xlu1  ;;  %4858 = vmatprep.subr.bf16.mxu0 %v6196_v53 }
  0xd5   :  { %v104_v39 = vpop.trf.xlu0  ;;  %4844 = vmatmul.mubr.msk.f32.gmra.mrb[6].mxu1 %vm113_vm0, %v330_v38 }
  0xd6   :  { %4816 = vmatmul.mubr.msk.f32.gmra.mrb[6].mxu0 %vm113_vm0, %v104_v39  ;;  %4883 = vmatpush3.bf16.msra.mxu1 %v6194_v52 }
  0xd7   :  { %4859 = vmatpush3.bf16.msra.mxu0 %v6196_v53  ;;  %4884 = vmatprep.subr.bf16.mxu1 %v6202_v54 }
  0xd8   :  { %4860 = vmatprep.subr.bf16.mxu0 %v6204_v55 }
  0xda   :  { %4885 = vmatpush3.bf16.msra.mxu1 %v6202_v54 }
  0xdb   :  { %4861 = vmatpush3.bf16.msra.mxu0 %v6204_v55 }
  0xdd   :  { %4887 = vmatmul.mubr.bf16.vlgmr.msra.gmra.mrb[8].mxu1 %v532_v58 }
  0xde   :  { %4863 = vmatmul.mubr.bf16.vlgmr.msra.gmra.mrb[8].mxu0 %v532_v58 }
  0xe5   :  { %4891 = vmatmul.mubr.bf16.gmra.mrb[12].mxu1 %v534_v61 }
  0xe6   :  { %4867 = vmatmul.mubr.bf16.gmra.mrb[12].mxu0 %v534_v61 }
 0x190   :  { %v6224_v63 = vpop.f32.mrb[0].mxu1 }
 0x191   :  { %v6222_v62 = vpop.f32.mrb[0].mxu0  ;;  %v469_v1 = vmul.f32 %v6224_v63, %v6224_v63  ;;  %v6232_v3 = vpop.f32.mrb[1].mxu1 }
 0x192   :  { %v244_v0 = vmul.f32 %v6222_v62, %v6222_v62  ;;  %v6230_v2 = vpop.f32.mrb[1].mxu0  ;;  %v468_v5 = vmul.f32 %v6232_v3, %v6232_v3 }
 0x193   :  { %v243_v4 = vmul.f32 %v6230_v2, %v6230_v2  ;;  %v477_v7 = vsel %vm113_vm0, %v469_v1, 0.0 }
 0x194   :  { %v252_v6 = vsel %vm113_vm0, %v244_v0, 0.0  ;;  %v476_v9 = vsel %vm113_vm0, %v468_v5, 0.0 }
 0x195   :  { %v251_v8 = vsel %vm113_vm0, %v243_v4, 0.0  ;;  %v478_v11 = vadd.f32 %v477_v7, %v476_v9 }
 0x196   :  { %v253_v10 = vadd.f32 %v252_v6, %v251_v8 }
 0x198   :  { %v6244_v13 = vpop.f32.mrb[2].mxu1 }
 0x199   :  { %v6242_v12 = vpop.f32.mrb[2].mxu0  ;;  %v6248_v15 = vpop.f32.mrb[3].mxu1  ;;  %v471_v17 = vmul.f32 %v6244_v13, %v6244_v13 }
 0x19a   :  { %v6246_v14 = vpop.f32.mrb[3].mxu0  ;;  %v246_v16 = vmul.f32 %v6242_v12, %v6242_v12  ;;  %v470_v19 = vmul.f32 %v6248_v15, %v6248_v15 }
 0x19b   :  { %v245_v18 = vmul.f32 %v6246_v14, %v6246_v14  ;;  %v481_v25 = vsel %vm113_vm0, %v471_v17, 0.0 }
 0x19c   :  { %v479_v21 = vsel %vm113_vm0, %v470_v19, 0.0  ;;  %v256_v24 = vsel %vm113_vm0, %v246_v16, 0.0 }
 0x19d   :  { %v254_v20 = vsel %vm113_vm0, %v245_v18, 0.0  ;;  %v480_v23 = vadd.f32 %v479_v21, %v478_v11 }
 0x19e   :  { %v255_v22 = vadd.f32 %v254_v20, %v253_v10 }
 0x19f   :  { %v482_v27 = vadd.f32 %v481_v25, %v480_v23 }
 0x1a0   :  { %v257_v26 = vadd.f32 %v256_v24, %v255_v22  ;;  %v6264_v29 = vpop.f32.mrb[4].mxu1 }
 0x1a1   :  { %v6262_v28 = vpop.f32.mrb[4].mxu0  ;;  %v6268_v31 = vpop.f32.mrb[5].mxu1  ;;  %v473_v33 = vmul.f32 %v6264_v29, %v6264_v29 }
 0x1a2   :  { %v6266_v30 = vpop.f32.mrb[5].mxu0  ;;  %v248_v32 = vmul.f32 %v6262_v28, %v6262_v28  ;;  %v472_v35 = vmul.f32 %v6268_v31, %v6268_v31 }
 0x1a3   :  { %v247_v34 = vmul.f32 %v6266_v30, %v6266_v30  ;;  %v485_v61 = vsel %vm113_vm0, %v473_v33, 0.0 }
 0x1a4   :  { %v483_v37 = vsel %vm113_vm0, %v472_v35, 0.0  ;;  %v260_v58 = vsel %vm113_vm0, %v248_v32, 0.0 }
 0x1a5   :  { %v258_v36 = vsel %vm113_vm0, %v247_v34, 0.0  ;;  %v484_v39 = vadd.f32 %v483_v37, %v482_v27 }
 0x1a6   :  { %v259_v38 = vadd.f32 %v258_v36, %v257_v26 }
 0x1a7   :  { %v486_v0 = vadd.f32 %v485_v61, %v484_v39 }
 0x1a8   :  { %v261_v1 = vadd.f32 %v260_v58, %v259_v38  ;;  %v6284_v5 = vpop.f32.mrb[6].mxu1 }
 0x1a9   :  { %v6282_v4 = vpop.f32.mrb[6].mxu0  ;;  %v6288_v7 = vpop.f32.mrb[7].mxu1  ;;  %v475_v9 = vmul.f32 %v6284_v5, %v6284_v5 }
 0x1aa   :  { %v6286_v6 = vpop.f32.mrb[7].mxu0  ;;  %v250_v8 = vmul.f32 %v6282_v4, %v6282_v4  ;;  %v474_v11 = vmul.f32 %v6288_v7, %v6288_v7 }
 0x1ab   :  { %v249_v10 = vmul.f32 %v6286_v6, %v6286_v6  ;;  %v489_v20 = vsel %vm113_vm0, %v475_v9, 0.0 }
 0x1ac   :  { %v487_v17 = vsel %vm113_vm0, %v474_v11, 0.0  ;;  %v264_v21 = vsel %vm113_vm0, %v250_v8, 0.0 }
 0x1ad   :  { %v262_v16 = vsel %vm113_vm0, %v249_v10, 0.0  ;;  %v488_v18 = vadd.f32 %v487_v17, %v486_v0 }
 0x1ae   :  { %v263_v19 = vadd.f32 %v262_v16, %v261_v1 }
 0x1af   :  { %v490_v22 = vadd.f32 %v489_v20, %v488_v18 }
 0x1b0   :  { %v265_v23 = vadd.f32 %v264_v21, %v263_v19  ;;  %v4888_v24 = vpop.f32.mrb[8].mxu1 }
 0x1b1   :  { %491 = vadd.xlane.f32.xlu1 %v490_v22  ;;  %v4864_v25 = vpop.f32.mrb[8].mxu0  ;;  %v763_v26 = vpop.f32.mrb[9].mxu1 }
 0x1b2   :  { %266 = vadd.xlane.f32.xlu0 %v265_v23  ;;  %v633_v27 = vpop.f32.mrb[9].mxu0  ;;  %v4889_v32 = vpop.f32.mrb[10].mxu1 }
 0x1b3   :  { %v4865_v33 = vpop.f32.mrb[10].mxu0  ;;  %v766_v34 = vpop.f32.mrb[11].mxu1  ;;  %v876_v38 = vpack.c.bf16 %v4889_v32, %v4888_v24 }
 0x1b4   :  { %v875_v35 = vpack.c.bf16 %v766_v34, %v763_v26  ;;  %v636_v36 = vpop.f32.mrb[11].mxu0  ;;  %v795_v58 = vpack.c.bf16 %v4865_v33, %v4864_v25 }
 0x1b5   :  { %v794_v37 = vpack.c.bf16 %v636_v36, %v633_v27 }
 0x1b6   :  { %4910 = vmatprep.subr.bf16.mxu1 %v875_v35 }
 0x1b7   :  { %4894 = vmatprep.subr.bf16.mxu0 %v794_v37  ;;  %4911 = vmatpush3.bf16.msra.mxu1 %v875_v35 }
 0x1b8   :  { %v4892_v39 = vpop.f32.mrb[12].mxu1  ;;  %4895 = vmatpush3.bf16.msra.mxu0 %v794_v37  ;;  %4912 = vmatprep.subr.bf16.mxu1 %v876_v38 }
 0x1b9   :  { %v4868_v61 = vpop.f32.mrb[12].mxu0  ;;  %v779_v0 = vpop.f32.mrb[13].mxu1  ;;  %4896 = vmatprep.subr.bf16.mxu0 %v795_v58 }
 0x1ba   :  { %v649_v1 = vpop.f32.mrb[13].mxu0  ;;  %v4893_v8 = vpop.f32.mrb[14].mxu1 }
 0x1bb   :  { %v4869_v9 = vpop.f32.mrb[14].mxu0  ;;  %v782_v10 = vpop.f32.mrb[15].mxu1  ;;  %4913 = vmatpush3.bf16.msra.mxu1 %v876_v38  ;;  %v878_v18 = vpack.c.bf16 %v4893_v8, %v4892_v39 }
 0x1bc   :  { %v877_v11 = vpack.c.bf16 %v782_v10, %v779_v0  ;;  %v652_v16 = vpop.f32.mrb[15].mxu0  ;;  %4897 = vmatpush3.bf16.msra.mxu0 %v795_v58  ;;  %v797_v19 = vpack.c.bf16 %v4869_v9, %v4868_v61 }
 0x1bd   :  { %v796_v17 = vpack.c.bf16 %v652_v16, %v649_v1 }
 0x1be   :  { %4914 = vmatprep.subr.bf16.mxu1 %v877_v11 }
 0x1bf   :  { %4898 = vmatprep.subr.bf16.mxu0 %v796_v17  ;;  %4915 = vmatpush3.bf16.msra.mxu1 %v877_v11 }
 0x1c0   :  { %4899 = vmatpush3.bf16.msra.mxu0 %v796_v17  ;;  %4916 = vmatprep.subr.bf16.mxu1 %v878_v18 }
 0x1c1   :  { %4900 = vmatprep.subr.bf16.mxu0 %v797_v19 }
 0x1c3   :  { %4917 = vmatpush3.bf16.msra.mxu1 %v878_v18 }
 0x1c4   :  { %4901 = vmatpush3.bf16.msra.mxu0 %v797_v19  ;;  %4950 = vmatprep.subr.bf16.mxu1 %v6146_v40 }
 0x1c5   :  { %4926 = vmatprep.subr.bf16.mxu0 %v6148_v41 }
 0x23e   :  { %v492_v20 = vpop.xlane.xlu1 %491 }
 0x23f   :  { %v267_v21 = vpop.xlane.xlu0 %266  ;;  %v493_v22 = vrot.slane %v492_v20, 4 }
 0x240   :  { %v268_v23 = vrot.slane %v267_v21, 4 }
 0x241   :  { %v494_v24 = vadd.f32 %v493_v22, %v492_v20 }
 0x242   :  { %v269_v25 = vadd.f32 %v268_v23, %v267_v21  ;;  %v6304_v23 = vld [vmem:[#allocation2] sm:$0xff] }
 0x243   :  { %v495_v26 = vrot.slane %v494_v24, 2 }
 0x244   :  { %v270_v27 = vrot.slane %v269_v25, 2 }
 0x245   :  { %v496_v33 = vadd.f32 %v495_v26, %v494_v24  ;;  %v6306_v24 = vld [vmem:[#allocation2 + $0x8] sm:$0xff] }
 0x246   :  { %v271_v32 = vadd.f32 %v270_v27, %v269_v25 }
 0x247   :  { %v497_v35 = vrot.slane %v496_v33, 1 }
 0x248   :  { %v272_v34 = vrot.slane %v271_v32, 1 }
 0x249   :  { %v498_v37 = vadd.f32 %v497_v35, %v496_v33 }
 0x24a   :  { %v273_v36 = vadd.f32 %v272_v34, %v271_v32 }
 0x24c   :  { %5838 = vpush %v273_v36 }
 0x24d   :  { %5840 = vpush %v498_v37 }
 0x27d   :  { %s5839_s2 = spop %5838 }
 0x27e   :  { %v275_v38 = vstv %s5839_s2  ;;  %s5841_s13 = spop %5840 }
 0x27f   :  { %5870 = vrsqrt.f32 %v275_v38  ;;  %v500_v39 = vstv %s5841_s13  ;;  %vm278_vm1 = vcmp.eq.f32.partialorder %v275_v38, inf  ;;  %v281_v1 = vand.u32 2147483648, %v275_v38 }
 0x280   :  { %5872 = vrsqrt.f32 %v500_v39  ;;  %vm280_vm2 = vcmp.eq.f32.partialorder %v275_v38, 0.0  ;;  %vm503_vm3 = vcmp.eq.f32.partialorder %v500_v39, inf  ;;  %v506_v11 = vand.u32 2147483648, %v500_v39 }
 0x281   :  { %vm505_vm4 = vcmp.eq.f32.partialorder %v500_v39, 0.0 }
 0x289   :  { %v5871_v58 = vpop.eup %5870 }
 0x28a   :  { %v277_v61 = vmul.f32 %v5871_v58, %v275_v38  ;;  %v5873_v0 = vpop.eup %5872 }
 0x28b   :  { %v502_v9 = vmul.f32 %v5873_v0, %v500_v39 }
 0x28c   :  { %v279_v8 = vsel %vm278_vm1, %v275_v38, %v277_v61 }
 0x28d   :  { %v282_v10 = vsel %vm280_vm2, %v281_v1, %v279_v8  ;;  %v504_v17 = vsel %vm503_vm3, %v500_v39, %v502_v9 }
 0x28e   :  { %v283_v16 = vadd.f32 1e-06, %v282_v10  ;;  %v507_v18 = vsel %vm505_vm4, %v506_v11, %v504_v17 }
 0x28f   :  { %v508_v19 = vadd.f32 1e-06, %v507_v18 }
 0x290   :  { %5874 = vrcp.f32 %v283_v16 }
 0x291   :  { %5876 = vrcp.f32 %v508_v19 }
 0x29a   :  { %v5875_v20 = vpop.eup %5874 }
 0x29b   :  { %v285_v21 = vmul.f32 0.8, %v5875_v20  ;;  %v5877_v22 = vpop.eup %5876 }
 0x29c   :  { %v510_v39 = vmul.f32 0.8, %v5877_v22 }
 0x29d   :  { %v286_v25 = vmul.f32 %v285_v21, %v6230_v2  ;;  %v287_v26 = vmul.f32 %v6222_v62, %v285_v21  ;;  %v288_v27 = vmul.f32 %v285_v21, %v6246_v14  ;;  %v289_v32 = vmul.f32 %v6242_v12, %v285_v21 }
 0x29e   :  { %v290_v33 = vmul.f32 %v285_v21, %v6266_v30  ;;  %v291_v34 = vmul.f32 %v6262_v28, %v285_v21  ;;  %v292_v35 = vmul.f32 %v285_v21, %v6286_v6  ;;  %v293_v36 = vmul.f32 %v6282_v4, %v285_v21 }
 0x29f   :  { %v6316_v37 = vpack.c.bf16 %v287_v26, %v286_v25  ;;  %v6318_v38 = vpack.c.bf16 %v289_v32, %v288_v27  ;;  %v531_v62 = vpack.c.bf16 %v6306_v24, %v6304_v23  ;;  %v511_v12 = vmul.f32 %v510_v39, %v6232_v3 }
 0x2a0   :  { %v6322_v2 = vpack.c.bf16 %v291_v34, %v290_v33  ;;  %v6324_v14 = vpack.c.bf16 %v293_v36, %v292_v35  ;;  %v512_v28 = vmul.f32 %v6224_v63, %v510_v39  ;;  %v513_v30 = vmul.f32 %v510_v39, %v6248_v15 }
 0x2a1   :  { %v514_v4 = vmul.f32 %v6244_v13, %v510_v39  ;;  %4902 = vmatprep.mubr.msk.bf16.mxu0 %vm113_vm0, %v6316_v37  ;;  %v515_v6 = vmul.f32 %v510_v39, %v6268_v31  ;;  %v516_v58 = vmul.f32 %v6264_v29, %v510_v39  ;;  %v517_v61 = vmul.f32 %v510_v39, %v6288_v7  ;;  %v6388_v29 = vld [vmem:[#allocation2 + $0x20] sm:$0xff]  ;;  %v6390_v31 = vld [vmem:[#allocation2 + $0x28] sm:$0xff] }
 0x2a2   :  { %v518_v0 = vmul.f32 %v6284_v5, %v510_v39  ;;  %4903 = vmatmul.mubr.msk.bf16.vlgmr.msra.gmra.mrb[16].mxu0 %vm113_vm0, %v6318_v38  ;;  %v6338_v3 = vpack.c.bf16 %v512_v28, %v511_v12  ;;  %v533_v5 = vpack.c.bf16 %v6390_v31, %v6388_v29 }
 0x2a3   :  { %v6340_v63 = vpack.c.bf16 %v514_v4, %v513_v30  ;;  %4862 = vmatprep.mubr.bf16.mxu0 %v531_v62  ;;  %4927 = vmatpush3.bf16.msra.mxu0 %v6148_v41  ;;  %v6343_v13 = vpack.c.bf16 %v516_v58, %v515_v6 }
 0x2a4   :  { %v6345_v15 = vpack.c.bf16 %v518_v0, %v517_v61  ;;  %4886 = vmatprep.mubr.bf16.mxu0 %v531_v62  ;;  %4928 = vmatprep.subr.bf16.mxu0 %v6156_v43 }
 0x2a5   :  { %4918 = vmatprep.mubr.msk.bf16.mxu1 %vm113_vm0, %v6338_v3  ;;  %4906 = vmatprep.mubr.msk.bf16.mxu0 %vm113_vm0, %v6322_v2 }
 0x2a6   :  { %4919 = vmatmul.mubr.msk.bf16.vlgmr.msra.gmra.mrb[16].mxu1 %vm113_vm0, %v6340_v63 }
 0x2a7   :  { %4922 = vmatprep.mubr.msk.bf16.mxu1 %vm113_vm0, %v6343_v13  ;;  %4951 = vmatpush3.bf16.msra.mxu1 %v6146_v40 }
 0x2a8   :  { %4952 = vmatprep.subr.bf16.mxu1 %v6154_v42  ;;  %4929 = vmatpush3.bf16.msra.mxu0 %v6156_v43 }
 0x2a9   :  { %4930 = vmatprep.subr.bf16.mxu0 %v6164_v45 }
 0x2aa   :  { %4907 = vmatmul.mubr.msk.bf16.gmra.mrb[20].mxu0 %vm113_vm0, %v6324_v14 }
 0x2ab   :  { %4953 = vmatpush3.bf16.msra.mxu1 %v6154_v42  ;;  %4866 = vmatprep.mubr.bf16.mxu0 %v533_v5 }
 0x2ac   :  { %4954 = vmatprep.subr.bf16.mxu1 %v6162_v44  ;;  %4931 = vmatpush3.bf16.msra.mxu0 %v6164_v45 }
 0x2ad   :  { %4932 = vmatprep.subr.bf16.mxu0 %v6172_v47  ;;  %4890 = vmatprep.mubr.bf16.mxu0 %v533_v5 }
 0x2ae   :  { %4923 = vmatmul.mubr.msk.bf16.gmra.mrb[20].mxu1 %vm113_vm0, %v6345_v15 }
 0x2af   :  { %4955 = vmatpush3.bf16.msra.mxu1 %v6162_v44 }
 0x2b0   :  { %4956 = vmatprep.subr.bf16.mxu1 %v6170_v46  ;;  %4933 = vmatpush3.bf16.msra.mxu0 %v6172_v47 }
 0x2b1   :  { %4934 = vmatprep.subr.bf16.mxu0 %v6180_v49 }
 0x2b3   :  { %4957 = vmatpush3.bf16.msra.mxu1 %v6170_v46 }
 0x2b4   :  { %4958 = vmatprep.subr.bf16.mxu1 %v6178_v48  ;;  %4935 = vmatpush3.bf16.msra.mxu0 %v6180_v49 }
 0x2b5   :  { %4936 = vmatprep.subr.bf16.mxu0 %v6188_v51 }
 0x2b7   :  { %4959 = vmatpush3.bf16.msra.mxu1 %v6178_v48 }
 0x2b8   :  { %4960 = vmatprep.subr.bf16.mxu1 %v6186_v50  ;;  %4937 = vmatpush3.bf16.msra.mxu0 %v6188_v51 }
 0x2b9   :  { %4938 = vmatprep.subr.bf16.mxu0 %v6196_v53 }
 0x2bb   :  { %4961 = vmatpush3.bf16.msra.mxu1 %v6186_v50 }
 0x2bc   :  { %4962 = vmatprep.subr.bf16.mxu1 %v6194_v52  ;;  %4939 = vmatpush3.bf16.msra.mxu0 %v6196_v53 }
 0x2bd   :  { %4940 = vmatprep.subr.bf16.mxu0 %v6204_v55 }
 0x2bf   :  { %4963 = vmatpush3.bf16.msra.mxu1 %v6194_v52 }
 0x2c0   :  { %4964 = vmatprep.subr.bf16.mxu1 %v6202_v54  ;;  %4941 = vmatpush3.bf16.msra.mxu0 %v6204_v55 }
 0x2c3   :  { %4965 = vmatpush3.bf16.msra.mxu1 %v6202_v54 }
 0x375   :  { %v4904_v7 = vpop.f32.mrb[16].mxu0 }
 0x376   :  { %v844_v1 = vpop.f32.mrb[17].mxu0  ;;  %v853_v9 = vadd.f32 %v4904_v7, %v6207_v56 }
 0x377   :  { %v4905_v8 = vpop.f32.mrb[18].mxu0  ;;  %v845_v17 = vadd.f32 %v844_v1, %v6304_v23 }
 0x378   :  { %v856_v10 = vadd.f32 %v4905_v8, %v6209_v57  ;;  %v847_v11 = vpop.f32.mrb[19].mxu0 }
 0x379   :  { %v4920_v16 = vpop.f32.mrb[16].mxu1  ;;  %v848_v18 = vadd.f32 %v847_v11, %v6306_v24 }
 0x37a   :  { %v925_v19 = vpop.f32.mrb[17].mxu1  ;;  %v957_v20 = vpack.c.bf16 %v856_v10, %v853_v9  ;;  %v934_v25 = vadd.f32 %v4920_v16, %v6207_v56 }
 0x37b   :  { %v4921_v21 = vpop.f32.mrb[18].mxu1  ;;  %v956_v22 = vpack.c.bf16 %v848_v18, %v845_v17  ;;  %v926_v32 = vadd.f32 %v925_v19, %v6304_v23 }
 0x37c   :  { %v937_v26 = vadd.f32 %v4921_v21, %v6209_v57  ;;  %v928_v27 = vpop.f32.mrb[19].mxu1 }
 0x37d   :  { %v929_v33 = vadd.f32 %v928_v27, %v6306_v24  ;;  %v4908_v34 = vpop.f32.mrb[20].mxu0  ;;  %4942 = vmatprep.mubr.bf16.mxu0 %v956_v22 }
 0x37e   :  { %v1026_v35 = vpack.c.bf16 %v937_v26, %v934_v25  ;;  %v860_v36 = vpop.f32.mrb[21].mxu0  ;;  %4943 = vmatmul.mubr.bf16.vlgmr.msra.gmra.mrb[24].mxu0 %v957_v20  ;;  %v869_v12 = vadd.f32 %v4908_v34, %v6216_v59 }
 0x37f   :  { %v1025_v39 = vpack.c.bf16 %v929_v33, %v926_v32  ;;  %v4909_v62 = vpop.f32.mrb[22].mxu0  ;;  %v861_v6 = vadd.f32 %v860_v36, %v6388_v29 }
 0x380   :  { %v872_v28 = vadd.f32 %v4909_v62, %v6218_v60  ;;  %v863_v30 = vpop.f32.mrb[23].mxu0 }
 0x381   :  { %v4924_v4 = vpop.f32.mrb[20].mxu1  ;;  %4966 = vmatprep.mubr.bf16.mxu1 %v1025_v39  ;;  %v864_v58 = vadd.f32 %v863_v30, %v6390_v31 }
 0x382   :  { %v941_v61 = vpop.f32.mrb[21].mxu1  ;;  %4967 = vmatmul.mubr.bf16.vlgmr.msra.gmra.mrb[24].mxu1 %v1026_v35  ;;  %v959_v0 = vpack.c.bf16 %v872_v28, %v869_v12  ;;  %v950_v1 = vadd.f32 %v4924_v4, %v6216_v59 }
 0x383   :  { %v4925_v5 = vpop.f32.mrb[22].mxu1  ;;  %v958_v7 = vpack.c.bf16 %v864_v58, %v861_v6  ;;  %v942_v10 = vadd.f32 %v941_v61, %v6388_v29 }
 0x384   :  { %v953_v8 = vadd.f32 %v4925_v5, %v6218_v60  ;;  %v944_v9 = vpop.f32.mrb[23].mxu1 }
 0x385   :  { %v945_v11 = vadd.f32 %v944_v9, %v6390_v31  ;;  %4946 = vmatprep.mubr.bf16.mxu0 %v958_v7 }
 0x386   :  { %v1028_v16 = vpack.c.bf16 %v953_v8, %v950_v1  ;;  %4947 = vmatmul.mubr.bf16.gmra.mrb[28].mxu0 %v959_v0 }
 0x387   :  { %v1027_v17 = vpack.c.bf16 %v945_v11, %v942_v10  ;;  %4982 = vmatprep.mubr.msk.bf16.mxu0 %vm113_vm0, %v6316_v37 }
 0x389   :  { %4970 = vmatprep.mubr.bf16.mxu1 %v1027_v17 }
 0x38a   :  { %4971 = vmatmul.mubr.bf16.gmra.mrb[28].mxu1 %v1028_v16 }
 0x38b   :  { %4998 = vmatprep.mubr.msk.bf16.mxu1 %vm113_vm0, %v6338_v3 }
 0x451   :  { %v4944_v18 = vpop.f32.mrb[24].mxu0 }
 0x452   :  { %v994_v19 = vpop.f32.mrb[25].mxu0 }
 0x453   :  { %v4945_v20 = vpop.f32.mrb[26].mxu0 }
 0x454   :  { %v1095_v21 = vpack.c.bf16 %v4945_v20, %v4944_v18  ;;  %v997_v22 = vpop.f32.mrb[27].mxu0 }
 0x455   :  { %v4968_v25 = vpop.f32.mrb[24].mxu1  ;;  %v1094_v26 = vpack.c.bf16 %v997_v22, %v994_v19 }
 0x456   :  { %v1063_v27 = vpop.f32.mrb[25].mxu1 }
 0x457   :  { %v4969_v32 = vpop.f32.mrb[26].mxu1  ;;  %4974 = vmatprep.subr.bf16.mxu0 %v1094_v26 }
 0x458   :  { %v1164_v33 = vpack.c.bf16 %v4969_v32, %v4968_v25  ;;  %v1066_v34 = vpop.f32.mrb[27].mxu1  ;;  %4975 = vmatpush3.bf16.msra.mxu0 %v1094_v26 }
 0x459   :  { %v1163_v35 = vpack.c.bf16 %v1066_v34, %v1063_v27  ;;  %v4948_v36 = vpop.f32.mrb[28].mxu0  ;;  %4976 = vmatprep.subr.bf16.mxu0 %v1095_v21 }
 0x45a   :  { %v1010_v39 = vpop.f32.mrb[29].mxu0 }
 0x45b   :  { %4990 = vmatprep.subr.bf16.mxu1 %v1163_v35  ;;  %v4949_v62 = vpop.f32.mrb[30].mxu0 }
 0x45c   :  { %4991 = vmatpush3.bf16.msra.mxu1 %v1163_v35  ;;  %v1097_v12 = vpack.c.bf16 %v4949_v62, %v4948_v36  ;;  %v1013_v28 = vpop.f32.mrb[31].mxu0  ;;  %4977 = vmatpush3.bf16.msra.mxu0 %v1095_v21 }
 0x45d   :  { %v4972_v30 = vpop.f32.mrb[28].mxu1  ;;  %4992 = vmatprep.subr.bf16.mxu1 %v1164_v33  ;;  %v1096_v4 = vpack.c.bf16 %v1013_v28, %v1010_v39 }
 0x45e   :  { %v1079_v6 = vpop.f32.mrb[29].mxu1 }
 0x45f   :  { %v4973_v58 = vpop.f32.mrb[30].mxu1  ;;  %4978 = vmatprep.subr.bf16.mxu0 %v1096_v4 }
 0x460   :  { %v1166_v61 = vpack.c.bf16 %v4973_v58, %v4972_v30  ;;  %v1082_v0 = vpop.f32.mrb[31].mxu1  ;;  %4993 = vmatpush3.bf16.msra.mxu1 %v1164_v33  ;;  %4979 = vmatpush3.bf16.msra.mxu0 %v1096_v4 }
 0x461   :  { %v1165_v5 = vpack.c.bf16 %v1082_v0, %v1079_v6  ;;  %4980 = vmatprep.subr.bf16.mxu0 %v1097_v12 }
 0x463   :  { %4994 = vmatprep.subr.bf16.mxu1 %v1165_v5 }
 0x464   :  { %4995 = vmatpush3.bf16.msra.mxu1 %v1165_v5  ;;  %4981 = vmatpush3.bf16.msra.mxu0 %v1097_v12 }
 0x465   :  { %4996 = vmatprep.subr.bf16.mxu1 %v1166_v61  ;;  %5006 = vmatprep.subr.bf16.mxu0 %v6148_v41 }
 0x467   :  { %4983 = vmatmul.mubr.msk.bf16.vlgmr.msra.gmra.mrb[32].mxu0 %vm113_vm0, %v6318_v38 }
 0x468   :  { %4997 = vmatpush3.bf16.msra.mxu1 %v1166_v61  ;;  %4986 = vmatprep.mubr.msk.bf16.mxu0 %vm113_vm0, %v6322_v2 }
 0x469   :  { %5030 = vmatprep.subr.bf16.mxu1 %v6146_v40  ;;  %5007 = vmatpush3.bf16.msra.mxu0 %v6148_v41 }
 0x46a   :  { %5008 = vmatprep.subr.bf16.mxu0 %v6156_v43 }
 0x46b   :  { %4999 = vmatmul.mubr.msk.bf16.vlgmr.msra.gmra.mrb[32].mxu1 %vm113_vm0, %v6340_v63 }
 0x46c   :  { %5002 = vmatprep.mubr.msk.bf16.mxu1 %vm113_vm0, %v6343_v13  ;;  %5031 = vmatpush3.bf16.msra.mxu1 %v6146_v40 }
 0x46d   :  { %5032 = vmatprep.subr.bf16.mxu1 %v6154_v42  ;;  %5009 = vmatpush3.bf16.msra.mxu0 %v6156_v43 }
 0x46e   :  { %5010 = vmatprep.subr.bf16.mxu0 %v6164_v45 }
 0x46f   :  { %4987 = vmatmul.mubr.msk.bf16.gmra.mrb[36].mxu0 %vm113_vm0, %v6324_v14 }
 0x470   :  { %5033 = vmatpush3.bf16.msra.mxu1 %v6154_v42 }
 0x471   :  { %5034 = vmatprep.subr.bf16.mxu1 %v6162_v44  ;;  %5011 = vmatpush3.bf16.msra.mxu0 %v6164_v45 }
 0x472   :  { %5012 = vmatprep.subr.bf16.mxu0 %v6172_v47 }
 0x473   :  { %5003 = vmatmul.mubr.msk.bf16.gmra.mrb[36].mxu1 %vm113_vm0, %v6345_v15 }
 0x474   :  { %5035 = vmatpush3.bf16.msra.mxu1 %v6162_v44 }
 0x475   :  { %5036 = vmatprep.subr.bf16.mxu1 %v6170_v46  ;;  %5013 = vmatpush3.bf16.msra.mxu0 %v6172_v47 }
 0x476   :  { %5014 = vmatprep.subr.bf16.mxu0 %v6180_v49 }
 0x478   :  { %5037 = vmatpush3.bf16.msra.mxu1 %v6170_v46 }
 0x479   :  { %5038 = vmatprep.subr.bf16.mxu1 %v6178_v48  ;;  %5015 = vmatpush3.bf16.msra.mxu0 %v6180_v49 }
 0x47a   :  { %5016 = vmatprep.subr.bf16.mxu0 %v6188_v51 }
 0x47c   :  { %5039 = vmatpush3.bf16.msra.mxu1 %v6178_v48 }
 0x47d   :  { %5040 = vmatprep.subr.bf16.mxu1 %v6186_v50  ;;  %5017 = vmatpush3.bf16.msra.mxu0 %v6188_v51 }
 0x47e   :  { %5018 = vmatprep.subr.bf16.mxu0 %v6196_v53 }
 0x480   :  { %5041 = vmatpush3.bf16.msra.mxu1 %v6186_v50 }
 0x481   :  { %5042 = vmatprep.subr.bf16.mxu1 %v6194_v52  ;;  %5019 = vmatpush3.bf16.msra.mxu0 %v6196_v53 }
 0x482   :  { %5020 = vmatprep.subr.bf16.mxu0 %v6204_v55 }
 0x484   :  { %5043 = vmatpush3.bf16.msra.mxu1 %v6194_v52 }
 0x485   :  { %5044 = vmatprep.subr.bf16.mxu1 %v6202_v54  ;;  %5021 = vmatpush3.bf16.msra.mxu0 %v6204_v55 }
 0x488   :  { %5045 = vmatpush3.bf16.msra.mxu1 %v6202_v54 }
 0x53a   :  { %v4984_v7 = vpop.f32.mrb[32].mxu0 }
 0x53b   :  { %v1132_v1 = vpop.f32.mrb[33].mxu0  ;;  %v1141_v9 = vadd.f32 %v4984_v7, %v6207_v56 }
 0x53c   :  { %v4985_v8 = vpop.f32.mrb[34].mxu0  ;;  %v1133_v17 = vadd.f32 %v1132_v1, %v6304_v23 }
 0x53d   :  { %v1144_v10 = vadd.f32 %v4985_v8, %v6209_v57  ;;  %v1135_v11 = vpop.f32.mrb[35].mxu0 }
 0x53e   :  { %v5000_v16 = vpop.f32.mrb[32].mxu1  ;;  %v1136_v18 = vadd.f32 %v1135_v11, %v6306_v24 }
 0x53f   :  { %v1201_v19 = vpop.f32.mrb[33].mxu1  ;;  %v1233_v20 = vpack.c.bf16 %v1144_v10, %v1141_v9  ;;  %v1210_v25 = vadd.f32 %v5000_v16, %v6207_v56 }
 0x540   :  { %v5001_v21 = vpop.f32.mrb[34].mxu1  ;;  %v1232_v22 = vpack.c.bf16 %v1136_v18, %v1133_v17  ;;  %v1202_v32 = vadd.f32 %v1201_v19, %v6304_v23 }
 0x541   :  { %v1213_v26 = vadd.f32 %v5001_v21, %v6209_v57  ;;  %v1204_v27 = vpop.f32.mrb[35].mxu1 }
 0x542   :  { %v1205_v33 = vadd.f32 %v1204_v27, %v6306_v24  ;;  %v4988_v34 = vpop.f32.mrb[36].mxu0  ;;  %5022 = vmatprep.mubr.bf16.mxu0 %v1232_v22 }
 0x543   :  { %v1302_v35 = vpack.c.bf16 %v1213_v26, %v1210_v25  ;;  %v1148_v36 = vpop.f32.mrb[37].mxu0  ;;  %5023 = vmatmul.mubr.bf16.vlgmr.msra.gmra.mrb[40].mxu0 %v1233_v20  ;;  %v1157_v12 = vadd.f32 %v4988_v34, %v6216_v59 }
 0x544   :  { %v1301_v39 = vpack.c.bf16 %v1205_v33, %v1202_v32  ;;  %v4989_v62 = vpop.f32.mrb[38].mxu0  ;;  %v1149_v6 = vadd.f32 %v1148_v36, %v6388_v29 }
 0x545   :  { %v1160_v28 = vadd.f32 %v4989_v62, %v6218_v60  ;;  %v1151_v30 = vpop.f32.mrb[39].mxu0 }
 0x546   :  { %v5004_v4 = vpop.f32.mrb[36].mxu1  ;;  %5046 = vmatprep.mubr.bf16.mxu1 %v1301_v39  ;;  %v1152_v58 = vadd.f32 %v1151_v30, %v6390_v31 }
 0x547   :  { %v1217_v61 = vpop.f32.mrb[37].mxu1  ;;  %5047 = vmatmul.mubr.bf16.vlgmr.msra.gmra.mrb[40].mxu1 %v1302_v35  ;;  %v1235_v0 = vpack.c.bf16 %v1160_v28, %v1157_v12  ;;  %v1226_v1 = vadd.f32 %v5004_v4, %v6216_v59 }
 0x548   :  { %v5005_v5 = vpop.f32.mrb[38].mxu1  ;;  %v1234_v7 = vpack.c.bf16 %v1152_v58, %v1149_v6  ;;  %v1218_v10 = vadd.f32 %v1217_v61, %v6388_v29 }
 0x549   :  { %v1229_v8 = vadd.f32 %v5005_v5, %v6218_v60  ;;  %v1220_v9 = vpop.f32.mrb[39].mxu1 }
 0x54a   :  { %v1221_v11 = vadd.f32 %v1220_v9, %v6390_v31  ;;  %5026 = vmatprep.mubr.bf16.mxu0 %v1234_v7 }
 0x54b   :  { %v1304_v16 = vpack.c.bf16 %v1229_v8, %v1226_v1  ;;  %5027 = vmatmul.mubr.bf16.gmra.mrb[44].mxu0 %v1235_v0 }
 0x54c   :  { %v1303_v17 = vpack.c.bf16 %v1221_v11, %v1218_v10  ;;  %5062 = vmatprep.mubr.msk.bf16.mxu0 %vm113_vm0, %v6316_v37 }
 0x54e   :  { %5050 = vmatprep.mubr.bf16.mxu1 %v1303_v17 }
 0x54f   :  { %5051 = vmatmul.mubr.bf16.gmra.mrb[44].mxu1 %v1304_v16 }
 0x550   :  { %5078 = vmatprep.mubr.msk.bf16.mxu1 %vm113_vm0, %v6338_v3 }
 0x616   :  { %v5024_v18 = vpop.f32.mrb[40].mxu0 }
 0x617   :  { %v1270_v19 = vpop.f32.mrb[41].mxu0 }
 0x618   :  { %v5025_v20 = vpop.f32.mrb[42].mxu0 }
 0x619   :  { %v1371_v21 = vpack.c.bf16 %v5025_v20, %v5024_v18  ;;  %v1273_v22 = vpop.f32.mrb[43].mxu0 }
 0x61a   :  { %v5048_v25 = vpop.f32.mrb[40].mxu1  ;;  %v1370_v26 = vpack.c.bf16 %v1273_v22, %v1270_v19 }
 0x61b   :  { %v1339_v27 = vpop.f32.mrb[41].mxu1 }
 0x61c   :  { %v5049_v32 = vpop.f32.mrb[42].mxu1  ;;  %5054 = vmatprep.subr.bf16.mxu0 %v1370_v26 }
 0x61d   :  { %v1440_v33 = vpack.c.bf16 %v5049_v32, %v5048_v25  ;;  %v1342_v34 = vpop.f32.mrb[43].mxu1  ;;  %5055 = vmatpush3.bf16.msra.mxu0 %v1370_v26 }
 0x61e   :  { %v1439_v35 = vpack.c.bf16 %v1342_v34, %v1339_v27  ;;  %v5028_v36 = vpop.f32.mrb[44].mxu0  ;;  %5056 = vmatprep.subr.bf16.mxu0 %v1371_v21  ;;  %v6534_v27 = vld [vmem:[#allocation2 + $0x30] sm:$0xff] }
 0x61f   :  { %v1286_v39 = vpop.f32.mrb[45].mxu0 }
 0x620   :  { %5070 = vmatprep.subr.bf16.mxu1 %v1439_v35  ;;  %v5029_v62 = vpop.f32.mrb[46].mxu0 }
 0x621   :  { %5071 = vmatpush3.bf16.msra.mxu1 %v1439_v35  ;;  %v1373_v12 = vpack.c.bf16 %v5029_v62, %v5028_v36  ;;  %v1289_v28 = vpop.f32.mrb[47].mxu0  ;;  %5057 = vmatpush3.bf16.msra.mxu0 %v1371_v21 }
 0x622   :  { %v5052_v30 = vpop.f32.mrb[44].mxu1  ;;  %5072 = vmatprep.subr.bf16.mxu1 %v1440_v33  ;;  %v1372_v4 = vpack.c.bf16 %v1289_v28, %v1286_v39 }
 0x623   :  { %v1355_v6 = vpop.f32.mrb[45].mxu1 }
 0x624   :  { %v5053_v58 = vpop.f32.mrb[46].mxu1  ;;  %5058 = vmatprep.subr.bf16.mxu0 %v1372_v4 }
 0x625   :  { %v1442_v61 = vpack.c.bf16 %v5053_v58, %v5052_v30  ;;  %v1358_v0 = vpop.f32.mrb[47].mxu1  ;;  %5073 = vmatpush3.bf16.msra.mxu1 %v1440_v33  ;;  %5059 = vmatpush3.bf16.msra.mxu0 %v1372_v4  ;;  %v6537_v33 = vld [vmem:[#allocation2 + $0x38] sm:$0xff] }
 0x626   :  { %v1441_v5 = vpack.c.bf16 %v1358_v0, %v1355_v6  ;;  %5060 = vmatprep.subr.bf16.mxu0 %v1373_v12 }
 0x628   :  { %5074 = vmatprep.subr.bf16.mxu1 %v1441_v5 }
 0x629   :  { %5075 = vmatpush3.bf16.msra.mxu1 %v1441_v5  ;;  %5061 = vmatpush3.bf16.msra.mxu0 %v1373_v12 }
 0x62a   :  { %5076 = vmatprep.subr.bf16.mxu1 %v1442_v61  ;;  %5086 = vmatprep.subr.bf16.mxu0 %v6148_v41 }
 0x62c   :  { %5063 = vmatmul.mubr.msk.bf16.vlgmr.msra.gmra.mrb[48].mxu0 %vm113_vm0, %v6318_v38 }
 0x62d   :  { %5077 = vmatpush3.bf16.msra.mxu1 %v1442_v61  ;;  %5066 = vmatprep.mubr.msk.bf16.mxu0 %vm113_vm0, %v6322_v2 }
 0x62e   :  { %5110 = vmatprep.subr.bf16.mxu1 %v6146_v40  ;;  %5087 = vmatpush3.bf16.msra.mxu0 %v6148_v41 }
 0x62f   :  { %5088 = vmatprep.subr.bf16.mxu0 %v6156_v43 }
 0x630   :  { %5079 = vmatmul.mubr.msk.bf16.vlgmr.msra.gmra.mrb[48].mxu1 %vm113_vm0, %v6340_v63 }
 0x631   :  { %5082 = vmatprep.mubr.msk.bf16.mxu1 %vm113_vm0, %v6343_v13  ;;  %5111 = vmatpush3.bf16.msra.mxu1 %v6146_v40 }
 0x632   :  { %5112 = vmatprep.subr.bf16.mxu1 %v6154_v42  ;;  %5089 = vmatpush3.bf16.msra.mxu0 %v6156_v43 }
 0x633   :  { %5090 = vmatprep.subr.bf16.mxu0 %v6164_v45 }
 0x634   :  { %5067 = vmatmul.mubr.msk.bf16.gmra.mrb[52].mxu0 %vm113_vm0, %v6324_v14 }
 0x635   :  { %5113 = vmatpush3.bf16.msra.mxu1 %v6154_v42 }
 0x636   :  { %5114 = vmatprep.subr.bf16.mxu1 %v6162_v44  ;;  %5091 = vmatpush3.bf16.msra.mxu0 %v6164_v45 }
 0x637   :  { %5092 = vmatprep.subr.bf16.mxu0 %v6172_v47 }
 0x638   :  { %5083 = vmatmul.mubr.msk.bf16.gmra.mrb[52].mxu1 %vm113_vm0, %v6345_v15 }
 0x639   :  { %5115 = vmatpush3.bf16.msra.mxu1 %v6162_v44 }
 0x63a   :  { %5116 = vmatprep.subr.bf16.mxu1 %v6170_v46  ;;  %5093 = vmatpush3.bf16.msra.mxu0 %v6172_v47 }
 0x63b   :  { %5094 = vmatprep.subr.bf16.mxu0 %v6180_v49 }
 0x63d   :  { %5117 = vmatpush3.bf16.msra.mxu1 %v6170_v46 }
 0x63e   :  { %5118 = vmatprep.subr.bf16.mxu1 %v6178_v48  ;;  %5095 = vmatpush3.bf16.msra.mxu0 %v6180_v49 }
 0x63f   :  { %5096 = vmatprep.subr.bf16.mxu0 %v6188_v51 }
 0x641   :  { %5119 = vmatpush3.bf16.msra.mxu1 %v6178_v48 }
 0x642   :  { %5120 = vmatprep.subr.bf16.mxu1 %v6186_v50  ;;  %5097 = vmatpush3.bf16.msra.mxu0 %v6188_v51 }
 0x643   :  { %5098 = vmatprep.subr.bf16.mxu0 %v6196_v53 }
 0x645   :  { %5121 = vmatpush3.bf16.msra.mxu1 %v6186_v50 }
 0x646   :  { %5122 = vmatprep.subr.bf16.mxu1 %v6194_v52  ;;  %5099 = vmatpush3.bf16.msra.mxu0 %v6196_v53 }
 0x647   :  { %5100 = vmatprep.subr.bf16.mxu0 %v6204_v55 }
 0x649   :  { %5123 = vmatpush3.bf16.msra.mxu1 %v6194_v52 }
 0x64a   :  { %5124 = vmatprep.subr.bf16.mxu1 %v6202_v54  ;;  %5101 = vmatpush3.bf16.msra.mxu0 %v6204_v55 }
 0x64d   :  { %5125 = vmatpush3.bf16.msra.mxu1 %v6202_v54 }
 0x6ff   :  { %v5064_v40 = vpop.f32.mrb[48].mxu0 }
 0x700   :  { %v1408_v41 = vpop.f32.mrb[49].mxu0  ;;  %v1417_v43 = vadd.f32 %v5064_v40, %v6207_v56 }
 0x701   :  { %v5065_v42 = vpop.f32.mrb[50].mxu0  ;;  %v1409_v47 = vadd.f32 %v1408_v41, %v6304_v23 }
 0x702   :  { %v1420_v44 = vadd.f32 %v5065_v42, %v6209_v57  ;;  %v1411_v45 = vpop.f32.mrb[51].mxu0 }
 0x703   :  { %v5080_v46 = vpop.f32.mrb[48].mxu1  ;;  %v1412_v48 = vadd.f32 %v1411_v45, %v6306_v24 }
 0x704   :  { %v1477_v49 = vpop.f32.mrb[49].mxu1  ;;  %v1509_v50 = vpack.c.bf16 %v1420_v44, %v1417_v43  ;;  %v1486_v53 = vadd.f32 %v5080_v46, %v6207_v56 }
 0x705   :  { %v5081_v51 = vpop.f32.mrb[50].mxu1  ;;  %v1508_v52 = vpack.c.bf16 %v1412_v48, %v1409_v47  ;;  %v1478_v7 = vadd.f32 %v1477_v49, %v6304_v23 }
 0x706   :  { %v1489_v54 = vadd.f32 %v5081_v51, %v6209_v57  ;;  %v1480_v55 = vpop.f32.mrb[51].mxu1 }
 0x707   :  { %v1481_v1 = vadd.f32 %v1480_v55, %v6306_v24  ;;  %v5068_v8 = vpop.f32.mrb[52].mxu0  ;;  %5102 = vmatprep.mubr.bf16.mxu0 %v1508_v52  ;;  %v6553_v55 = vld [vmem:[#allocation7 + $0x40] sm:$0xff]  }
 0x708   :  { %v1578_v9 = vpack.c.bf16 %v1489_v54, %v1486_v53  ;;  %v1424_v10 = vpop.f32.mrb[53].mxu0  ;;  %5103 = vmatmul.mubr.bf16.vlgmr.msra.gmra.mrb[56].mxu0 %v1509_v50  ;;  %v1433_v17 = vadd.f32 %v5068_v8, %v6216_v59  ;;  %v6546_v54 = vld [vmem:[#allocation7] sm:$0xff]   ;;  %v6569_v8 = vld [vmem:[#allocation7 + $0x10] sm:$0xff]  }
 0x709   :  { %v1577_v11 = vpack.c.bf16 %v1481_v1, %v1478_v7  ;;  %v5069_v16 = vpop.f32.mrb[54].mxu0  ;;  %v1425_v57 = vadd.f32 %v1424_v10, %v6388_v29  ;;  %v6557_v7 = vld [vmem:[#allocation7 + $0x8] sm:$0xff]   ;;  %v6579_v10 = vld [vmem:[#allocation7 + $0x18] sm:$0xff]  }
 0x70a   :  { %v1436_v18 = vadd.f32 %v5069_v16, %v6218_v60  ;;  %v1427_v19 = vpop.f32.mrb[55].mxu0  ;;  %v6565_v1 = vld [vmem:[#allocation7 + $0x48] sm:$0xff]   ;;  %v6589_v16 = vld [vmem:[#allocation7 + $0x20] sm:$0xff]  }
 0x70b   :  { %v5084_v56 = vpop.f32.mrb[52].mxu1  ;;  %5126 = vmatprep.mubr.bf16.mxu1 %v1577_v11  ;;  %v1428_v20 = vadd.f32 %v1427_v19, %v6390_v31  ;;  %v6585_v11 = vld [vmem:[#allocation7 + $0x58] sm:$0xff]   ;;  %v6601_v19 = vld [vmem:[#allocation7 + $0x68] sm:$0xff]  }
 0x70c   :  { %v1493_v21 = vpop.f32.mrb[53].mxu1  ;;  %5127 = vmatmul.mubr.bf16.vlgmr.msra.gmra.mrb[56].mxu1 %v1578_v9  ;;  %v1511_v22 = vpack.c.bf16 %v1436_v18, %v1433_v17  ;;  %v1502_v32 = vadd.f32 %v6534_v27, %v5084_v56  ;;  %v6575_v9 = vld [vmem:[#allocation7 + $0x50] sm:$0xff]   ;;  %v6593_v17 = vld [vmem:[#allocation7 + $0x60] sm:$0xff]   ;;  %v6597_v18 = vld [vmem:[#allocation7 + $0x28] sm:$0xff]  }
 0x70d   :  { %v5085_v25 = vpop.f32.mrb[54].mxu1  ;;  %v1510_v26 = vpack.c.bf16 %v1428_v20, %v1425_v57  ;;  %v1494_v34 = vadd.f32 %v1493_v21, %v6388_v29  ;;  %v6605_v56 = vld [vmem:[#allocation7 + $0x30] sm:$0xff]   ;;  %v6613_v20 = vld [vmem:[#allocation7 + $0x38] sm:$0xff]  }
 0x70e   :  { %v1505_v59 = vadd.f32 %v6537_v33, %v5085_v25  ;;  %v1496_v60 = vpop.f32.mrb[55].mxu1  ;;  %v6609_v57 = vld [vmem:[#allocation7 + $0x70] sm:$0xff]   ;;  %v6617_v21 = vld [vmem:[#allocation7 + $0x78] sm:$0xff]  }
 0x70f   :  { %v1497_v35 = vadd.f32 %v1496_v60, %v6390_v31  ;;  %5106 = vmatprep.mubr.bf16.mxu0 %v1510_v26  ;;  %v6625_v60 = vld [vmem:[#allocation2 + $0x18] sm:$0xff] }
 0x710   :  { %v1580_v36 = vpack.c.bf16 %v1505_v59, %v1502_v32  ;;  %5107 = vmatmul.mubr.bf16.gmra.mrb[60].mxu0 %v1511_v22  ;;  %v6622_v32 = vld [vmem:[#allocation2 + $0x10] sm:$0xff] }
 0x711   :  { %v1579_v39 = vpack.c.bf16 %v1497_v35, %v1494_v34  ;;  %5142 = vmatprep.mubr.msk.bf16.mxu0 %vm113_vm0, %v6316_v37 }
 0x713   :  { %5130 = vmatprep.mubr.bf16.mxu1 %v1579_v39 }
 0x714   :  { %5131 = vmatmul.mubr.bf16.gmra.mrb[60].mxu1 %v1580_v36 }
 0x715   :  { %5158 = vmatprep.mubr.msk.bf16.mxu1 %vm113_vm0, %v6338_v3 }
 0x7db   :  { %v5104_v62 = vpop.f32.mrb[56].mxu0 }
 0x7dc   :  { %v1546_v12 = vpop.f32.mrb[57].mxu0 }
 0x7dd   :  { %v5105_v28 = vpop.f32.mrb[58].mxu0 }
 0x7de   :  { %v1647_v30 = vpack.c.bf16 %v5105_v28, %v5104_v62  ;;  %v1549_v4 = vpop.f32.mrb[59].mxu0 }
 0x7df   :  { %v5128_v6 = vpop.f32.mrb[56].mxu1  ;;  %v1646_v58 = vpack.c.bf16 %v1549_v4, %v1546_v12 }
 0x7e0   :  { %v1615_v61 = vpop.f32.mrb[57].mxu1 }
 0x7e1   :  { %v5129_v0 = vpop.f32.mrb[58].mxu1  ;;  %5134 = vmatprep.subr.bf16.mxu0 %v1646_v58 }
 0x7e2   :  { %v1716_v5 = vpack.c.bf16 %v5129_v0, %v5128_v6  ;;  %v1618_v40 = vpop.f32.mrb[59].mxu1  ;;  %5135 = vmatpush3.bf16.msra.mxu0 %v1646_v58 }
 0x7e3   :  { %v1715_v41 = vpack.c.bf16 %v1618_v40, %v1615_v61  ;;  %v5108_v42 = vpop.f32.mrb[60].mxu0  ;;  %5136 = vmatprep.subr.bf16.mxu0 %v1647_v30 }
 0x7e4   :  { %v1562_v43 = vpop.f32.mrb[61].mxu0 }
 0x7e5   :  { %5150 = vmatprep.subr.bf16.mxu1 %v1715_v41  ;;  %v5109_v44 = vpop.f32.mrb[62].mxu0 }
 0x7e6   :  { %5151 = vmatpush3.bf16.msra.mxu1 %v1715_v41  ;;  %v1649_v45 = vpack.c.bf16 %v5109_v44, %v5108_v42  ;;  %v1565_v46 = vpop.f32.mrb[63].mxu0  ;;  %5137 = vmatpush3.bf16.msra.mxu0 %v1647_v30 }
 0x7e7   :  { %v5132_v47 = vpop.f32.mrb[60].mxu1  ;;  %5152 = vmatprep.subr.bf16.mxu1 %v1716_v5  ;;  %v1648_v48 = vpack.c.bf16 %v1565_v46, %v1562_v43 }
 0x7e8   :  { %v1631_v49 = vpop.f32.mrb[61].mxu1 }
 0x7e9   :  { %v5133_v50 = vpop.f32.mrb[62].mxu1  ;;  %5138 = vmatprep.subr.bf16.mxu0 %v1648_v48 }
 0x7ea   :  { %v1718_v51 = vpack.c.bf16 %v5133_v50, %v5132_v47  ;;  %v1634_v52 = vpop.f32.mrb[63].mxu1  ;;  %5153 = vmatpush3.bf16.msra.mxu1 %v1716_v5  ;;  %5139 = vmatpush3.bf16.msra.mxu0 %v1648_v48 }
 0x7eb   :  { %v1717_v53 = vpack.c.bf16 %v1634_v52, %v1631_v49  ;;  %5140 = vmatprep.subr.bf16.mxu0 %v1649_v45 }
 0x7ed   :  { %5154 = vmatprep.subr.bf16.mxu1 %v1717_v53 }
 0x7ee   :  { %5155 = vmatpush3.bf16.msra.mxu1 %v1717_v53  ;;  %5141 = vmatpush3.bf16.msra.mxu0 %v1649_v45 }
 0x7ef   :  { %5156 = vmatprep.subr.bf16.mxu1 %v1718_v51  ;;  %5166 = vmatprep.subr.bf16.mxu0 %v6546_v54 }
 0x7f1   :  { %5143 = vmatmul.mubr.msk.bf16.vlgmr.msra.gmra.mrb[64].mxu0 %vm113_vm0, %v6318_v38 }
 0x7f2   :  { %5157 = vmatpush3.bf16.msra.mxu1 %v1718_v51  ;;  %5146 = vmatprep.mubr.msk.bf16.mxu0 %vm113_vm0, %v6322_v2 }
 0x7f3   :  { %5190 = vmatprep.subr.bf16.mxu1 %v6553_v55  ;;  %5167 = vmatpush3.bf16.msra.mxu0 %v6546_v54 }
 0x7f4   :  { %5168 = vmatprep.subr.bf16.mxu0 %v6557_v7 }
 0x7f5   :  { %5159 = vmatmul.mubr.msk.bf16.vlgmr.msra.gmra.mrb[64].mxu1 %vm113_vm0, %v6340_v63 }
 0x7f6   :  { %5162 = vmatprep.mubr.msk.bf16.mxu1 %vm113_vm0, %v6343_v13  ;;  %5191 = vmatpush3.bf16.msra.mxu1 %v6553_v55 }
 0x7f7   :  { %5192 = vmatprep.subr.bf16.mxu1 %v6565_v1  ;;  %5169 = vmatpush3.bf16.msra.mxu0 %v6557_v7 }
 0x7f8   :  { %5170 = vmatprep.subr.bf16.mxu0 %v6569_v8 }
 0x7f9   :  { %5147 = vmatmul.mubr.msk.bf16.gmra.mrb[68].mxu0 %vm113_vm0, %v6324_v14 }
 0x7fa   :  { %5193 = vmatpush3.bf16.msra.mxu1 %v6565_v1 }
 0x7fb   :  { %5194 = vmatprep.subr.bf16.mxu1 %v6575_v9  ;;  %5171 = vmatpush3.bf16.msra.mxu0 %v6569_v8 }
 0x7fc   :  { %5172 = vmatprep.subr.bf16.mxu0 %v6579_v10 }
 0x7fd   :  { %5163 = vmatmul.mubr.msk.bf16.gmra.mrb[68].mxu1 %vm113_vm0, %v6345_v15 }
 0x7fe   :  { %5195 = vmatpush3.bf16.msra.mxu1 %v6575_v9 }
 0x7ff   :  { %5196 = vmatprep.subr.bf16.mxu1 %v6585_v11  ;;  %5173 = vmatpush3.bf16.msra.mxu0 %v6579_v10 }
 0x800   :  { %5174 = vmatprep.subr.bf16.mxu0 %v6589_v16 }
 0x802   :  { %5197 = vmatpush3.bf16.msra.mxu1 %v6585_v11 }
 0x803   :  { %5198 = vmatprep.subr.bf16.mxu1 %v6593_v17  ;;  %5175 = vmatpush3.bf16.msra.mxu0 %v6589_v16 }
 0x804   :  { %5176 = vmatprep.subr.bf16.mxu0 %v6597_v18 }
 0x806   :  { %5199 = vmatpush3.bf16.msra.mxu1 %v6593_v17 }
 0x807   :  { %5200 = vmatprep.subr.bf16.mxu1 %v6601_v19  ;;  %5177 = vmatpush3.bf16.msra.mxu0 %v6597_v18 }
 0x808   :  { %5178 = vmatprep.subr.bf16.mxu0 %v6605_v56 }
 0x80a   :  { %5201 = vmatpush3.bf16.msra.mxu1 %v6601_v19 }
 0x80b   :  { %5202 = vmatprep.subr.bf16.mxu1 %v6609_v57  ;;  %5179 = vmatpush3.bf16.msra.mxu0 %v6605_v56 }
 0x80c   :  { %5180 = vmatprep.subr.bf16.mxu0 %v6613_v20 }
 0x80e   :  { %5203 = vmatpush3.bf16.msra.mxu1 %v6609_v57 }
 0x80f   :  { %5204 = vmatprep.subr.bf16.mxu1 %v6617_v21  ;;  %5181 = vmatpush3.bf16.msra.mxu0 %v6613_v20 }
 0x812   :  { %5205 = vmatpush3.bf16.msra.mxu1 %v6617_v21 }
 0x8c4   :  { %v5144_v22 = vpop.f32.mrb[64].mxu0 }
 0x8c5   :  { %v1684_v25 = vpop.f32.mrb[65].mxu0  ;;  %v1693_v59 = vadd.f32 %v6622_v32, %v5144_v22 }
 0x8c6   :  { %v5145_v26 = vpop.f32.mrb[66].mxu0  ;;  %v1685_v39 = vadd.f32 %v1684_v25, %v6304_v23 }
 0x8c7   :  { %v1696_v34 = vadd.f32 %v6625_v60, %v5145_v26  ;;  %v1687_v35 = vpop.f32.mrb[67].mxu0 }
 0x8c8   :  { %v5160_v36 = vpop.f32.mrb[64].mxu1  ;;  %v1688_v62 = vadd.f32 %v1687_v35, %v6306_v24 }
 0x8c9   :  { %v1753_v12 = vpop.f32.mrb[65].mxu1  ;;  %v1785_v28 = vpack.c.bf16 %v1696_v34, %v1693_v59  ;;  %v1762_v6 = vadd.f32 %v6622_v32, %v5160_v36 }
 0x8ca   :  { %v5161_v30 = vpop.f32.mrb[66].mxu1  ;;  %v1784_v4 = vpack.c.bf16 %v1688_v62, %v1685_v39  ;;  %v1754_v0 = vadd.f32 %v1753_v12, %v6304_v23 }
 0x8cb   :  { %v1765_v58 = vadd.f32 %v6625_v60, %v5161_v30  ;;  %v1756_v61 = vpop.f32.mrb[67].mxu1 }
 0x8cc   :  { %v1757_v5 = vadd.f32 %v1756_v61, %v6306_v24  ;;  %v5148_v40 = vpop.f32.mrb[68].mxu0  ;;  %5182 = vmatprep.mubr.bf16.mxu0 %v1784_v4 }
 0x8cd   :  { %v1854_v41 = vpack.c.bf16 %v1765_v58, %v1762_v6  ;;  %v1700_v42 = vpop.f32.mrb[69].mxu0  ;;  %5183 = vmatmul.mubr.bf16.vlgmr.msra.gmra.mrb[72].mxu0 %v1785_v28  ;;  %v1709_v45 = vadd.f32 %v6534_v27, %v5148_v40 }
 0x8ce   :  { %v1853_v43 = vpack.c.bf16 %v1757_v5, %v1754_v0  ;;  %v5149_v44 = vpop.f32.mrb[70].mxu0  ;;  %v1701_v49 = vadd.f32 %v1700_v42, %v6388_v29 }
 0x8cf   :  { %v1712_v46 = vadd.f32 %v6537_v33, %v5149_v44  ;;  %v1703_v47 = vpop.f32.mrb[71].mxu0 }
 0x8d0   :  { %v5164_v48 = vpop.f32.mrb[68].mxu1  ;;  %5206 = vmatprep.mubr.bf16.mxu1 %v1853_v43  ;;  %v1704_v23 = vadd.f32 %v1703_v47, %v6390_v31 }
 0x8d1   :  { %v1769_v50 = vpop.f32.mrb[69].mxu1  ;;  %5207 = vmatmul.mubr.bf16.vlgmr.msra.gmra.mrb[72].mxu1 %v1854_v41  ;;  %v1787_v24 = vpack.c.bf16 %v1712_v46, %v1709_v45  ;;  %v1778_v53 = vadd.f32 %v6534_v27, %v5164_v48 }
 0x8d2   :  { %v5165_v51 = vpop.f32.mrb[70].mxu1  ;;  %v1786_v52 = vpack.c.bf16 %v1704_v23, %v1701_v49  ;;  %v1770_v26 = vadd.f32 %v1769_v50, %v6388_v29 }
 0x8d3   :  { %v1781_v22 = vadd.f32 %v6537_v33, %v5165_v51  ;;  %v1772_v25 = vpop.f32.mrb[71].mxu1 }
 0x8d4   :  { %v1773_v59 = vadd.f32 %v1772_v25, %v6390_v31  ;;  %5186 = vmatprep.mubr.bf16.mxu0 %v1786_v52  ;;  %v6692_v25 = vld [vmem:[#allocation2] sm:$0xff] }
 0x8d5   :  { %v1856_v34 = vpack.c.bf16 %v1781_v22, %v1778_v53  ;;  %5187 = vmatmul.mubr.bf16.gmra.mrb[76].mxu0 %v1787_v24 }
 0x8d6   :  { %v1855_v35 = vpack.c.bf16 %v1773_v59, %v1770_v26  ;;  %5222 = vmatprep.mubr.msk.bf16.mxu0 %vm113_vm0, %v6316_v37  ;;  %v6695_v59 = vld [vmem:[#allocation2 + $0x8] sm:$0xff] }
 0x8d8   :  { %5210 = vmatprep.mubr.bf16.mxu1 %v1855_v35 }
 0x8d9   :  { %5211 = vmatmul.mubr.bf16.gmra.mrb[76].mxu1 %v1856_v34 }
 0x8da   :  { %5238 = vmatprep.mubr.msk.bf16.mxu1 %vm113_vm0, %v6338_v3 }
 0x9a0   :  { %v5184_v36 = vpop.f32.mrb[72].mxu0 }
 0x9a1   :  { %v1822_v39 = vpop.f32.mrb[73].mxu0 }
 0x9a2   :  { %v5185_v62 = vpop.f32.mrb[74].mxu0 }
 0x9a3   :  { %v1923_v12 = vpack.c.bf16 %v5185_v62, %v5184_v36  ;;  %v1825_v28 = vpop.f32.mrb[75].mxu0 }
 0x9a4   :  { %v5208_v29 = vpop.f32.mrb[72].mxu1  ;;  %v1922_v30 = vpack.c.bf16 %v1825_v28, %v1822_v39 }
 0x9a5   :  { %v1891_v31 = vpop.f32.mrb[73].mxu1 }
 0x9a6   :  { %v5209_v4 = vpop.f32.mrb[74].mxu1  ;;  %5214 = vmatprep.subr.bf16.mxu0 %v1922_v30 }
 0x9a7   :  { %v1992_v6 = vpack.c.bf16 %v5209_v4, %v5208_v29  ;;  %v1894_v58 = vpop.f32.mrb[75].mxu1  ;;  %5215 = vmatpush3.bf16.msra.mxu0 %v1922_v30 }
 0x9a8   :  { %v1991_v61 = vpack.c.bf16 %v1894_v58, %v1891_v31  ;;  %v5188_v0 = vpop.f32.mrb[76].mxu0  ;;  %5216 = vmatprep.subr.bf16.mxu0 %v1923_v12 }
 0x9a9   :  { %v1838_v5 = vpop.f32.mrb[77].mxu0 }
 0x9aa   :  { %5230 = vmatprep.subr.bf16.mxu1 %v1991_v61  ;;  %v5189_v40 = vpop.f32.mrb[78].mxu0 }
 0x9ab   :  { %5231 = vmatpush3.bf16.msra.mxu1 %v1991_v61  ;;  %v1925_v41 = vpack.c.bf16 %v5189_v40, %v5188_v0  ;;  %v1841_v42 = vpop.f32.mrb[79].mxu0  ;;  %5217 = vmatpush3.bf16.msra.mxu0 %v1923_v12 }
 0x9ac   :  { %v5212_v43 = vpop.f32.mrb[76].mxu1  ;;  %5232 = vmatprep.subr.bf16.mxu1 %v1992_v6  ;;  %v1924_v44 = vpack.c.bf16 %v1841_v42, %v1838_v5 }
 0x9ad   :  { %v1907_v45 = vpop.f32.mrb[77].mxu1 }
 0x9ae   :  { %v5213_v46 = vpop.f32.mrb[78].mxu1  ;;  %5218 = vmatprep.subr.bf16.mxu0 %v1924_v44 }
 0x9af   :  { %v1994_v47 = vpack.c.bf16 %v5213_v46, %v5212_v43  ;;  %v1910_v48 = vpop.f32.mrb[79].mxu1  ;;  %5233 = vmatpush3.bf16.msra.mxu1 %v1992_v6  ;;  %5219 = vmatpush3.bf16.msra.mxu0 %v1924_v44  ;;  %v6704_v43 = vld [vmem:[#allocation2 + $0x20] sm:$0xff] }
 0x9b0   :  { %v1993_v49 = vpack.c.bf16 %v1910_v48, %v1907_v45  ;;  %5220 = vmatprep.subr.bf16.mxu0 %v1925_v41  ;;  %v6707_v45 = vld [vmem:[#allocation2 + $0x28] sm:$0xff] }
 0x9b2   :  { %5234 = vmatprep.subr.bf16.mxu1 %v1993_v49 }
 0x9b3   :  { %5235 = vmatpush3.bf16.msra.mxu1 %v1993_v49  ;;  %5221 = vmatpush3.bf16.msra.mxu0 %v1925_v41 }
 0x9b4   :  { %5236 = vmatprep.subr.bf16.mxu1 %v1994_v47  ;;  %5246 = vmatprep.subr.bf16.mxu0 %v6546_v54 }
 0x9b6   :  { %5223 = vmatmul.mubr.msk.bf16.vlgmr.msra.gmra.mrb[80].mxu0 %vm113_vm0, %v6318_v38 }
 0x9b7   :  { %5237 = vmatpush3.bf16.msra.mxu1 %v1994_v47  ;;  %5226 = vmatprep.mubr.msk.bf16.mxu0 %vm113_vm0, %v6322_v2 }
 0x9b8   :  { %5270 = vmatprep.subr.bf16.mxu1 %v6553_v55  ;;  %5247 = vmatpush3.bf16.msra.mxu0 %v6546_v54 }
 0x9b9   :  { %5248 = vmatprep.subr.bf16.mxu0 %v6557_v7 }
 0x9ba   :  { %5239 = vmatmul.mubr.msk.bf16.vlgmr.msra.gmra.mrb[80].mxu1 %vm113_vm0, %v6340_v63 }
 0x9bb   :  { %5242 = vmatprep.mubr.msk.bf16.mxu1 %vm113_vm0, %v6343_v13  ;;  %5271 = vmatpush3.bf16.msra.mxu1 %v6553_v55 }
 0x9bc   :  { %5272 = vmatprep.subr.bf16.mxu1 %v6565_v1  ;;  %5249 = vmatpush3.bf16.msra.mxu0 %v6557_v7 }
 0x9bd   :  { %5250 = vmatprep.subr.bf16.mxu0 %v6569_v8 }
 0x9be   :  { %5227 = vmatmul.mubr.msk.bf16.gmra.mrb[84].mxu0 %vm113_vm0, %v6324_v14 }
 0x9bf   :  { %5273 = vmatpush3.bf16.msra.mxu1 %v6565_v1 }
 0x9c0   :  { %5274 = vmatprep.subr.bf16.mxu1 %v6575_v9  ;;  %5251 = vmatpush3.bf16.msra.mxu0 %v6569_v8 }
 0x9c1   :  { %5252 = vmatprep.subr.bf16.mxu0 %v6579_v10 }
 0x9c2   :  { %5243 = vmatmul.mubr.msk.bf16.gmra.mrb[84].mxu1 %vm113_vm0, %v6345_v15 }
 0x9c3   :  { %5275 = vmatpush3.bf16.msra.mxu1 %v6575_v9 }
 0x9c4   :  { %5276 = vmatprep.subr.bf16.mxu1 %v6585_v11  ;;  %5253 = vmatpush3.bf16.msra.mxu0 %v6579_v10 }
 0x9c5   :  { %5254 = vmatprep.subr.bf16.mxu0 %v6589_v16 }
 0x9c7   :  { %5277 = vmatpush3.bf16.msra.mxu1 %v6585_v11 }
 0x9c8   :  { %5278 = vmatprep.subr.bf16.mxu1 %v6593_v17  ;;  %5255 = vmatpush3.bf16.msra.mxu0 %v6589_v16 }
 0x9c9   :  { %5256 = vmatprep.subr.bf16.mxu0 %v6597_v18 }
 0x9cb   :  { %5279 = vmatpush3.bf16.msra.mxu1 %v6593_v17 }
 0x9cc   :  { %5280 = vmatprep.subr.bf16.mxu1 %v6601_v19  ;;  %5257 = vmatpush3.bf16.msra.mxu0 %v6597_v18 }
 0x9cd   :  { %5258 = vmatprep.subr.bf16.mxu0 %v6605_v56 }
 0x9cf   :  { %5281 = vmatpush3.bf16.msra.mxu1 %v6601_v19 }
 0x9d0   :  { %5282 = vmatprep.subr.bf16.mxu1 %v6609_v57  ;;  %5259 = vmatpush3.bf16.msra.mxu0 %v6605_v56 }
 0x9d1   :  { %5260 = vmatprep.subr.bf16.mxu0 %v6613_v20 }
 0x9d3   :  { %5283 = vmatpush3.bf16.msra.mxu1 %v6609_v57 }
 0x9d4   :  { %5284 = vmatprep.subr.bf16.mxu1 %v6617_v21  ;;  %5261 = vmatpush3.bf16.msra.mxu0 %v6613_v20 }
 0x9d7   :  { %5285 = vmatpush3.bf16.msra.mxu1 %v6617_v21 }
 0xa89   :  { %v5224_v23 = vpop.f32.mrb[80].mxu0 }
 0xa8a   :  { %v1960_v50 = vpop.f32.mrb[81].mxu0  ;;  %v1969_v51 = vadd.f32 %v6622_v32, %v5224_v23 }
 0xa8b   :  { %v5225_v24 = vpop.f32.mrb[82].mxu0  ;;  %v1961_v26 = vadd.f32 %v6692_v25, %v1960_v50 }
 0xa8c   :  { %v1972_v52 = vadd.f32 %v6625_v60, %v5225_v24  ;;  %v1963_v53 = vpop.f32.mrb[83].mxu0 }
 0xa8d   :  { %v5240_v22 = vpop.f32.mrb[80].mxu1  ;;  %v1964_v34 = vadd.f32 %v6695_v59, %v1963_v53 }
 0xa8e   :  { %v2029_v35 = vpop.f32.mrb[81].mxu1  ;;  %v2061_v36 = vpack.c.bf16 %v1972_v52, %v1969_v51  ;;  %v2038_v12 = vadd.f32 %v6622_v32, %v5240_v22 }
 0xa8f   :  { %v5241_v39 = vpop.f32.mrb[82].mxu1  ;;  %v2060_v62 = vpack.c.bf16 %v1964_v34, %v1961_v26  ;;  %v2030_v30 = vadd.f32 %v6692_v25, %v2029_v35 }
 0xa90   :  { %v2041_v28 = vadd.f32 %v6625_v60, %v5241_v39  ;;  %v2032_v29 = vpop.f32.mrb[83].mxu1 }
 0xa91   :  { %v2033_v31 = vadd.f32 %v6695_v59, %v2032_v29  ;;  %v5228_v4 = vpop.f32.mrb[84].mxu0  ;;  %5262 = vmatprep.mubr.bf16.mxu0 %v2060_v62 }
 0xa92   :  { %v2130_v6 = vpack.c.bf16 %v2041_v28, %v2038_v12  ;;  %v1976_v58 = vpop.f32.mrb[85].mxu0  ;;  %5263 = vmatmul.mubr.bf16.vlgmr.msra.gmra.mrb[88].mxu0 %v2061_v36  ;;  %v1985_v5 = vadd.f32 %v6534_v27, %v5228_v4 }
 0xa93   :  { %v2129_v61 = vpack.c.bf16 %v2033_v31, %v2030_v30  ;;  %v5229_v0 = vpop.f32.mrb[86].mxu0  ;;  %v1977_v44 = vadd.f32 %v6704_v43, %v1976_v58 }
 0xa94   :  { %v1988_v40 = vadd.f32 %v6537_v33, %v5229_v0  ;;  %v1979_v41 = vpop.f32.mrb[87].mxu0 }
 0xa95   :  { %v5244_v42 = vpop.f32.mrb[84].mxu1  ;;  %5286 = vmatprep.mubr.bf16.mxu1 %v2129_v61  ;;  %v1980_v46 = vadd.f32 %v6707_v45, %v1979_v41 }
 0xa96   :  { %v2045_v47 = vpop.f32.mrb[85].mxu1  ;;  %5287 = vmatmul.mubr.bf16.vlgmr.msra.gmra.mrb[88].mxu1 %v2130_v6  ;;  %v2063_v48 = vpack.c.bf16 %v1988_v40, %v1985_v5  ;;  %v2054_v50 = vadd.f32 %v6534_v27, %v5244_v42 }
 0xa97   :  { %v5245_v49 = vpop.f32.mrb[86].mxu1  ;;  %v2062_v23 = vpack.c.bf16 %v1980_v46, %v1977_v44  ;;  %v2046_v52 = vadd.f32 %v6704_v43, %v2045_v47 }
 0xa98   :  { %v2057_v24 = vadd.f32 %v6537_v33, %v5245_v49  ;;  %v2048_v51 = vpop.f32.mrb[87].mxu1 }
 0xa99   :  { %v2049_v53 = vadd.f32 %v6707_v45, %v2048_v51  ;;  %5266 = vmatprep.mubr.bf16.mxu0 %v2062_v23 }
 0xa9a   :  { %v2132_v22 = vpack.c.bf16 %v2057_v24, %v2054_v50  ;;  %5267 = vmatmul.mubr.bf16.gmra.mrb[92].mxu0 %v2063_v48 }
 0xa9b   :  { %v2131_v26 = vpack.c.bf16 %v2049_v53, %v2046_v52  ;;  %5302 = vmatprep.mubr.msk.bf16.mxu0 %vm113_vm0, %v6316_v37 }
 0xa9d   :  { %5290 = vmatprep.mubr.bf16.mxu1 %v2131_v26 }
 0xa9e   :  { %5291 = vmatmul.mubr.bf16.gmra.mrb[92].mxu1 %v2132_v22 }
 0xa9f   :  { %5318 = vmatprep.mubr.msk.bf16.mxu1 %vm113_vm0, %v6338_v3 }
 0xb65   :  { %v5264_v34 = vpop.f32.mrb[88].mxu0 }
 0xb66   :  { %v2098_v35 = vpop.f32.mrb[89].mxu0 }
 0xb67   :  { %v5265_v36 = vpop.f32.mrb[90].mxu0 }
 0xb68   :  { %v2199_v39 = vpack.c.bf16 %v5265_v36, %v5264_v34  ;;  %v2101_v62 = vpop.f32.mrb[91].mxu0 }
 0xb69   :  { %v5288_v12 = vpop.f32.mrb[88].mxu1  ;;  %v2198_v28 = vpack.c.bf16 %v2101_v62, %v2098_v35 }
 0xb6a   :  { %v2167_v29 = vpop.f32.mrb[89].mxu1 }
 0xb6b   :  { %v5289_v30 = vpop.f32.mrb[90].mxu1  ;;  %5294 = vmatprep.subr.bf16.mxu0 %v2198_v28 }
 0xb6c   :  { %v2268_v31 = vpack.c.bf16 %v5289_v30, %v5288_v12  ;;  %v2170_v4 = vpop.f32.mrb[91].mxu1  ;;  %5295 = vmatpush3.bf16.msra.mxu0 %v2198_v28 }
 0xb6d   :  { %v2267_v6 = vpack.c.bf16 %v2170_v4, %v2167_v29  ;;  %v5268_v58 = vpop.f32.mrb[92].mxu0  ;;  %5296 = vmatprep.subr.bf16.mxu0 %v2199_v39 }
 0xb6e   :  { %v2114_v61 = vpop.f32.mrb[93].mxu0 }
 0xb6f   :  { %5310 = vmatprep.subr.bf16.mxu1 %v2267_v6  ;;  %v5269_v0 = vpop.f32.mrb[94].mxu0 }
 0xb70   :  { %5311 = vmatpush3.bf16.msra.mxu1 %v2267_v6  ;;  %v2201_v5 = vpack.c.bf16 %v5269_v0, %v5268_v58  ;;  %v2117_v40 = vpop.f32.mrb[95].mxu0  ;;  %5297 = vmatpush3.bf16.msra.mxu0 %v2199_v39 }
 0xb71   :  { %v5292_v41 = vpop.f32.mrb[92].mxu1  ;;  %5312 = vmatprep.subr.bf16.mxu1 %v2268_v31  ;;  %v2200_v42 = vpack.c.bf16 %v2117_v40, %v2114_v61 }
 0xb72   :  { %v2183_v44 = vpop.f32.mrb[93].mxu1 }
 0xb73   :  { %v5293_v46 = vpop.f32.mrb[94].mxu1  ;;  %5298 = vmatprep.subr.bf16.mxu0 %v2200_v42 }
 0xb74   :  { %v2270_v47 = vpack.c.bf16 %v5293_v46, %v5292_v41  ;;  %v2186_v48 = vpop.f32.mrb[95].mxu1  ;;  %5313 = vmatpush3.bf16.msra.mxu1 %v2268_v31  ;;  %5299 = vmatpush3.bf16.msra.mxu0 %v2200_v42 }
 0xb75   :  { %v2269_v49 = vpack.c.bf16 %v2186_v48, %v2183_v44  ;;  %5300 = vmatprep.subr.bf16.mxu0 %v2201_v5 }
 0xb77   :  { %5314 = vmatprep.subr.bf16.mxu1 %v2269_v49 }
 0xb78   :  { %5315 = vmatpush3.bf16.msra.mxu1 %v2269_v49  ;;  %5301 = vmatpush3.bf16.msra.mxu0 %v2201_v5 }
 0xb79   :  { %5316 = vmatprep.subr.bf16.mxu1 %v2270_v47  ;;  %5326 = vmatprep.subr.bf16.mxu0 %v6546_v54 }
 0xb7b   :  { %5303 = vmatmul.mubr.msk.bf16.vlgmr.msra.gmra.mrb[96].mxu0 %vm113_vm0, %v6318_v38 }
 0xb7c   :  { %5317 = vmatpush3.bf16.msra.mxu1 %v2270_v47  ;;  %5306 = vmatprep.mubr.msk.bf16.mxu0 %vm113_vm0, %v6322_v2 }
 0xb7d   :  { %5350 = vmatprep.subr.bf16.mxu1 %v6553_v55  ;;  %5327 = vmatpush3.bf16.msra.mxu0 %v6546_v54 }
 0xb7e   :  { %5328 = vmatprep.subr.bf16.mxu0 %v6557_v7 }
 0xb7f   :  { %5319 = vmatmul.mubr.msk.bf16.vlgmr.msra.gmra.mrb[96].mxu1 %vm113_vm0, %v6340_v63 }
 0xb80   :  { %5322 = vmatprep.mubr.msk.bf16.mxu1 %vm113_vm0, %v6343_v13  ;;  %5351 = vmatpush3.bf16.msra.mxu1 %v6553_v55 }
 0xb81   :  { %5352 = vmatprep.subr.bf16.mxu1 %v6565_v1  ;;  %5329 = vmatpush3.bf16.msra.mxu0 %v6557_v7 }
 0xb82   :  { %5330 = vmatprep.subr.bf16.mxu0 %v6569_v8 }
 0xb83   :  { %5307 = vmatmul.mubr.msk.bf16.gmra.mrb[100].mxu0 %vm113_vm0, %v6324_v14 }
 0xb84   :  { %5353 = vmatpush3.bf16.msra.mxu1 %v6565_v1 }
 0xb85   :  { %5354 = vmatprep.subr.bf16.mxu1 %v6575_v9  ;;  %5331 = vmatpush3.bf16.msra.mxu0 %v6569_v8 }
 0xb86   :  { %5332 = vmatprep.subr.bf16.mxu0 %v6579_v10 }
 0xb87   :  { %5323 = vmatmul.mubr.msk.bf16.gmra.mrb[100].mxu1 %vm113_vm0, %v6345_v15 }
 0xb88   :  { %5355 = vmatpush3.bf16.msra.mxu1 %v6575_v9 }
 0xb89   :  { %5356 = vmatprep.subr.bf16.mxu1 %v6585_v11  ;;  %5333 = vmatpush3.bf16.msra.mxu0 %v6579_v10 }
 0xb8a   :  { %5334 = vmatprep.subr.bf16.mxu0 %v6589_v16 }
 0xb8c   :  { %5357 = vmatpush3.bf16.msra.mxu1 %v6585_v11 }
 0xb8d   :  { %5358 = vmatprep.subr.bf16.mxu1 %v6593_v17  ;;  %5335 = vmatpush3.bf16.msra.mxu0 %v6589_v16 }
 0xb8e   :  { %5336 = vmatprep.subr.bf16.mxu0 %v6597_v18 }
 0xb90   :  { %5359 = vmatpush3.bf16.msra.mxu1 %v6593_v17 }
 0xb91   :  { %5360 = vmatprep.subr.bf16.mxu1 %v6601_v19  ;;  %5337 = vmatpush3.bf16.msra.mxu0 %v6597_v18 }
 0xb92   :  { %5338 = vmatprep.subr.bf16.mxu0 %v6605_v56 }
 0xb94   :  { %5361 = vmatpush3.bf16.msra.mxu1 %v6601_v19 }
 0xb95   :  { %5362 = vmatprep.subr.bf16.mxu1 %v6609_v57  ;;  %5339 = vmatpush3.bf16.msra.mxu0 %v6605_v56 }
 0xb96   :  { %5340 = vmatprep.subr.bf16.mxu0 %v6613_v20 }
 0xb98   :  { %5363 = vmatpush3.bf16.msra.mxu1 %v6609_v57 }
 0xb99   :  { %5364 = vmatprep.subr.bf16.mxu1 %v6617_v21  ;;  %5341 = vmatpush3.bf16.msra.mxu0 %v6613_v20 }
 0xb9c   :  { %5365 = vmatpush3.bf16.msra.mxu1 %v6617_v21 }
 0xc4e   :  { %v5304_v23 = vpop.f32.mrb[96].mxu0 }
 0xc4f   :  { %v2236_v50 = vpop.f32.mrb[97].mxu0  ;;  %v2245_v51 = vadd.f32 %v6622_v32, %v5304_v23 }
 0xc50   :  { %v5305_v24 = vpop.f32.mrb[98].mxu0  ;;  %v2237_v26 = vadd.f32 %v6692_v25, %v2236_v50 }
 0xc51   :  { %v2248_v52 = vadd.f32 %v6625_v60, %v5305_v24  ;;  %v2239_v53 = vpop.f32.mrb[99].mxu0 }
 0xc52   :  { %v5320_v22 = vpop.f32.mrb[96].mxu1  ;;  %v2240_v34 = vadd.f32 %v6695_v59, %v2239_v53 }
 0xc53   :  { %v2305_v35 = vpop.f32.mrb[97].mxu1  ;;  %v2337_v36 = vpack.c.bf16 %v2248_v52, %v2245_v51  ;;  %v2314_v12 = vadd.f32 %v6622_v32, %v5320_v22 }
 0xc54   :  { %v5321_v39 = vpop.f32.mrb[98].mxu1  ;;  %v2336_v62 = vpack.c.bf16 %v2240_v34, %v2237_v26  ;;  %v2306_v30 = vadd.f32 %v6692_v25, %v2305_v35 }
 0xc55   :  { %v2317_v28 = vadd.f32 %v6625_v60, %v5321_v39  ;;  %v2308_v29 = vpop.f32.mrb[99].mxu1 }
 0xc56   :  { %v2309_v31 = vadd.f32 %v6695_v59, %v2308_v29  ;;  %v5308_v4 = vpop.f32.mrb[100].mxu0  ;;  %5342 = vmatprep.mubr.bf16.mxu0 %v2336_v62 }
 0xc57   :  { %v2406_v6 = vpack.c.bf16 %v2317_v28, %v2314_v12  ;;  %v2252_v58 = vpop.f32.mrb[101].mxu0  ;;  %5343 = vmatmul.mubr.bf16.vlgmr.msra.gmra.mrb[104].mxu0 %v2337_v36  ;;  %v2261_v5 = vadd.f32 %v6534_v27, %v5308_v4 }
 0xc58   :  { %v2405_v61 = vpack.c.bf16 %v2309_v31, %v2306_v30  ;;  %v5309_v0 = vpop.f32.mrb[102].mxu0  ;;  %v2253_v44 = vadd.f32 %v6704_v43, %v2252_v58 }
 0xc59   :  { %v2264_v40 = vadd.f32 %v6537_v33, %v5309_v0  ;;  %v2255_v41 = vpop.f32.mrb[103].mxu0 }
 0xc5a   :  { %v5324_v42 = vpop.f32.mrb[100].mxu1  ;;  %5366 = vmatprep.mubr.bf16.mxu1 %v2405_v61  ;;  %v2256_v46 = vadd.f32 %v6707_v45, %v2255_v41 }
 0xc5b   :  { %v2321_v47 = vpop.f32.mrb[101].mxu1  ;;  %5367 = vmatmul.mubr.bf16.vlgmr.msra.gmra.mrb[104].mxu1 %v2406_v6  ;;  %v2339_v48 = vpack.c.bf16 %v2264_v40, %v2261_v5  ;;  %v2330_v50 = vadd.f32 %v6534_v27, %v5324_v42 }
 0xc5c   :  { %v5325_v49 = vpop.f32.mrb[102].mxu1  ;;  %v2338_v23 = vpack.c.bf16 %v2256_v46, %v2253_v44  ;;  %v2322_v52 = vadd.f32 %v6704_v43, %v2321_v47 }
 0xc5d   :  { %v2333_v24 = vadd.f32 %v6537_v33, %v5325_v49  ;;  %v2324_v51 = vpop.f32.mrb[103].mxu1 }
 0xc5e   :  { %v2325_v53 = vadd.f32 %v6707_v45, %v2324_v51  ;;  %5346 = vmatprep.mubr.bf16.mxu0 %v2338_v23 }
 0xc5f   :  { %v2408_v22 = vpack.c.bf16 %v2333_v24, %v2330_v50  ;;  %5347 = vmatmul.mubr.bf16.gmra.mrb[108].mxu0 %v2339_v48 }
 0xc60   :  { %v2407_v26 = vpack.c.bf16 %v2325_v53, %v2322_v52  ;;  %5382 = vmatprep.mubr.msk.bf16.mxu0 %vm113_vm0, %v6316_v37 }
 0xc62   :  { %5370 = vmatprep.mubr.bf16.mxu1 %v2407_v26 }
 0xc63   :  { %5371 = vmatmul.mubr.bf16.gmra.mrb[108].mxu1 %v2408_v22 }
 0xc64   :  { %5398 = vmatprep.mubr.msk.bf16.mxu1 %vm113_vm0, %v6338_v3 }
 0xd2a   :  { %v5344_v34 = vpop.f32.mrb[104].mxu0 }
 0xd2b   :  { %v2374_v35 = vpop.f32.mrb[105].mxu0 }
 0xd2c   :  { %v5345_v36 = vpop.f32.mrb[106].mxu0 }
 0xd2d   :  { %v2475_v39 = vpack.c.bf16 %v5345_v36, %v5344_v34  ;;  %v2377_v62 = vpop.f32.mrb[107].mxu0 }
 0xd2e   :  { %v5368_v12 = vpop.f32.mrb[104].mxu1  ;;  %v2474_v28 = vpack.c.bf16 %v2377_v62, %v2374_v35 }
 0xd2f   :  { %v2443_v29 = vpop.f32.mrb[105].mxu1 }
 0xd30   :  { %v5369_v30 = vpop.f32.mrb[106].mxu1  ;;  %5374 = vmatprep.subr.bf16.mxu0 %v2474_v28 }
 0xd31   :  { %v2544_v31 = vpack.c.bf16 %v5369_v30, %v5368_v12  ;;  %v2446_v4 = vpop.f32.mrb[107].mxu1  ;;  %5375 = vmatpush3.bf16.msra.mxu0 %v2474_v28 }
 0xd32   :  { %v2543_v6 = vpack.c.bf16 %v2446_v4, %v2443_v29  ;;  %v5348_v58 = vpop.f32.mrb[108].mxu0  ;;  %5376 = vmatprep.subr.bf16.mxu0 %v2475_v39  ;;  %v6838_v29 = vld [vmem:[#allocation2 + $0x30] sm:$0xff] }
 0xd33   :  { %v2390_v61 = vpop.f32.mrb[109].mxu0 }
 0xd34   :  { %5390 = vmatprep.subr.bf16.mxu1 %v2543_v6  ;;  %v5349_v0 = vpop.f32.mrb[110].mxu0 }
 0xd35   :  { %5391 = vmatpush3.bf16.msra.mxu1 %v2543_v6  ;;  %v2477_v5 = vpack.c.bf16 %v5349_v0, %v5348_v58  ;;  %v2393_v40 = vpop.f32.mrb[111].mxu0  ;;  %5377 = vmatpush3.bf16.msra.mxu0 %v2475_v39 }
 0xd36   :  { %v5372_v41 = vpop.f32.mrb[108].mxu1  ;;  %5392 = vmatprep.subr.bf16.mxu1 %v2544_v31  ;;  %v2476_v42 = vpack.c.bf16 %v2393_v40, %v2390_v61 }
 0xd37   :  { %v2459_v44 = vpop.f32.mrb[109].mxu1 }
 0xd38   :  { %v5373_v46 = vpop.f32.mrb[110].mxu1  ;;  %5378 = vmatprep.subr.bf16.mxu0 %v2476_v42 }
 0xd39   :  { %v2546_v47 = vpack.c.bf16 %v5373_v46, %v5372_v41  ;;  %v2462_v48 = vpop.f32.mrb[111].mxu1  ;;  %5393 = vmatpush3.bf16.msra.mxu1 %v2544_v31  ;;  %5379 = vmatpush3.bf16.msra.mxu0 %v2476_v42  ;;  %v6841_v31 = vld [vmem:[#allocation2 + $0x38] sm:$0xff] }
 0xd3a   :  { %v2545_v49 = vpack.c.bf16 %v2462_v48, %v2459_v44  ;;  %5380 = vmatprep.subr.bf16.mxu0 %v2477_v5 }
 0xd3c   :  { %5394 = vmatprep.subr.bf16.mxu1 %v2545_v49 }
 0xd3d   :  { %5395 = vmatpush3.bf16.msra.mxu1 %v2545_v49  ;;  %5381 = vmatpush3.bf16.msra.mxu0 %v2477_v5 }
 0xd3e   :  { %5396 = vmatprep.subr.bf16.mxu1 %v2546_v47  ;;  %5406 = vmatprep.subr.bf16.mxu0 %v6546_v54 }
 0xd40   :  { %5383 = vmatmul.mubr.msk.bf16.vlgmr.msra.gmra.mrb[112].mxu0 %vm113_vm0, %v6318_v38 }
 0xd41   :  { %5397 = vmatpush3.bf16.msra.mxu1 %v2546_v47  ;;  %5386 = vmatprep.mubr.msk.bf16.mxu0 %vm113_vm0, %v6322_v2 }
 0xd42   :  { %5430 = vmatprep.subr.bf16.mxu1 %v6553_v55  ;;  %5407 = vmatpush3.bf16.msra.mxu0 %v6546_v54 }
 0xd43   :  { %5408 = vmatprep.subr.bf16.mxu0 %v6557_v7 }
 0xd44   :  { %5399 = vmatmul.mubr.msk.bf16.vlgmr.msra.gmra.mrb[112].mxu1 %vm113_vm0, %v6340_v63 }
 0xd45   :  { %5402 = vmatprep.mubr.msk.bf16.mxu1 %vm113_vm0, %v6343_v13  ;;  %5431 = vmatpush3.bf16.msra.mxu1 %v6553_v55 }
 0xd46   :  { %5432 = vmatprep.subr.bf16.mxu1 %v6565_v1  ;;  %5409 = vmatpush3.bf16.msra.mxu0 %v6557_v7 }
 0xd47   :  { %5410 = vmatprep.subr.bf16.mxu0 %v6569_v8 }
 0xd48   :  { %5387 = vmatmul.mubr.msk.bf16.gmra.mrb[116].mxu0 %vm113_vm0, %v6324_v14 }
 0xd49   :  { %5433 = vmatpush3.bf16.msra.mxu1 %v6565_v1 }
 0xd4a   :  { %5434 = vmatprep.subr.bf16.mxu1 %v6575_v9  ;;  %5411 = vmatpush3.bf16.msra.mxu0 %v6569_v8 }
 0xd4b   :  { %5412 = vmatprep.subr.bf16.mxu0 %v6579_v10 }
 0xd4c   :  { %5403 = vmatmul.mubr.msk.bf16.gmra.mrb[116].mxu1 %vm113_vm0, %v6345_v15 }
 0xd4d   :  { %5435 = vmatpush3.bf16.msra.mxu1 %v6575_v9 }
 0xd4e   :  { %5436 = vmatprep.subr.bf16.mxu1 %v6585_v11  ;;  %5413 = vmatpush3.bf16.msra.mxu0 %v6579_v10 }
 0xd4f   :  { %5414 = vmatprep.subr.bf16.mxu0 %v6589_v16 }
 0xd51   :  { %5437 = vmatpush3.bf16.msra.mxu1 %v6585_v11 }
 0xd52   :  { %5438 = vmatprep.subr.bf16.mxu1 %v6593_v17  ;;  %5415 = vmatpush3.bf16.msra.mxu0 %v6589_v16 }
 0xd53   :  { %5416 = vmatprep.subr.bf16.mxu0 %v6597_v18 }
 0xd55   :  { %5439 = vmatpush3.bf16.msra.mxu1 %v6593_v17 }
 0xd56   :  { %5440 = vmatprep.subr.bf16.mxu1 %v6601_v19  ;;  %5417 = vmatpush3.bf16.msra.mxu0 %v6597_v18 }
 0xd57   :  { %5418 = vmatprep.subr.bf16.mxu0 %v6605_v56 }
 0xd59   :  { %5441 = vmatpush3.bf16.msra.mxu1 %v6601_v19 }
 0xd5a   :  { %5442 = vmatprep.subr.bf16.mxu1 %v6609_v57  ;;  %5419 = vmatpush3.bf16.msra.mxu0 %v6605_v56 }
 0xd5b   :  { %5420 = vmatprep.subr.bf16.mxu0 %v6613_v20 }
 0xd5d   :  { %5443 = vmatpush3.bf16.msra.mxu1 %v6609_v57 }
 0xd5e   :  { %5444 = vmatprep.subr.bf16.mxu1 %v6617_v21  ;;  %5421 = vmatpush3.bf16.msra.mxu0 %v6613_v20 }
 0xd61   :  { %5445 = vmatpush3.bf16.msra.mxu1 %v6617_v21 }
 0xe13   :  { %v5384_v54 = vpop.f32.mrb[112].mxu0 }
 0xe14   :  { %v2512_v55 = vpop.f32.mrb[113].mxu0  ;;  %v2521_v1 = vadd.f32 %v6622_v32, %v5384_v54 }
 0xe15   :  { %v5385_v7 = vpop.f32.mrb[114].mxu0  ;;  %v2513_v11 = vadd.f32 %v6692_v25, %v2512_v55 }
 0xe16   :  { %v2524_v8 = vadd.f32 %v6625_v60, %v5385_v7  ;;  %v2515_v9 = vpop.f32.mrb[115].mxu0 }
 0xe17   :  { %v5400_v10 = vpop.f32.mrb[112].mxu1  ;;  %v2516_v16 = vadd.f32 %v6695_v59, %v2515_v9 }
 0xe18   :  { %v2581_v17 = vpop.f32.mrb[113].mxu1  ;;  %v2613_v18 = vpack.c.bf16 %v2524_v8, %v2521_v1  ;;  %v2590_v57 = vadd.f32 %v6622_v32, %v5400_v10 }
 0xe19   :  { %v5401_v19 = vpop.f32.mrb[114].mxu1  ;;  %v2612_v56 = vpack.c.bf16 %v2516_v16, %v2513_v11  ;;  %v2582_v23 = vadd.f32 %v6692_v25, %v2581_v17 }
 0xe1a   :  { %v2593_v20 = vadd.f32 %v6625_v60, %v5401_v19  ;;  %v2584_v21 = vpop.f32.mrb[115].mxu1 }
 0xe1b   :  { %v2585_v50 = vadd.f32 %v6695_v59, %v2584_v21  ;;  %v5388_v24 = vpop.f32.mrb[116].mxu0  ;;  %5422 = vmatprep.mubr.bf16.mxu0 %v2612_v56  ;;  %v6857_v21 = vld [vmem:[#allocation7 + $0x40] sm:$0xff]  }
 0xe1c   :  { %v2682_v51 = vpack.c.bf16 %v2593_v20, %v2590_v57  ;;  %v2528_v52 = vpop.f32.mrb[117].mxu0  ;;  %5423 = vmatmul.mubr.bf16.vlgmr.msra.gmra.mrb[120].mxu0 %v2613_v18  ;;  %v2537_v26 = vadd.f32 %v6534_v27, %v5388_v24  ;;  %v6850_v20 = vld [vmem:[#allocation7] sm:$0xff]   ;;  %v6873_v24 = vld [vmem:[#allocation7 + $0x10] sm:$0xff]  }
 0xe1d   :  { %v2681_v53 = vpack.c.bf16 %v2585_v50, %v2582_v23  ;;  %v5389_v22 = vpop.f32.mrb[118].mxu0  ;;  %v2529_v60 = vadd.f32 %v6704_v43, %v2528_v52  ;;  %v6861_v23 = vld [vmem:[#allocation7 + $0x8] sm:$0xff]   ;;  %v6883_v52 = vld [vmem:[#allocation7 + $0x18] sm:$0xff]  }
 0xe1e   :  { %v2540_v34 = vadd.f32 %v6537_v33, %v5389_v22  ;;  %v2531_v35 = vpop.f32.mrb[119].mxu0  ;;  %v6869_v50 = vld [vmem:[#allocation7 + $0x48] sm:$0xff]   ;;  %v6893_v22 = vld [vmem:[#allocation7 + $0x20] sm:$0xff]  }
 0xe1f   :  { %v5404_v32 = vpop.f32.mrb[116].mxu1  ;;  %5446 = vmatprep.mubr.bf16.mxu1 %v2681_v53  ;;  %v2532_v36 = vadd.f32 %v6707_v45, %v2531_v35  ;;  %v6889_v53 = vld [vmem:[#allocation7 + $0x58] sm:$0xff]   ;;  %v6905_v35 = vld [vmem:[#allocation7 + $0x68] sm:$0xff]  }
 0xe20   :  { %v2597_v39 = vpop.f32.mrb[117].mxu1  ;;  %5447 = vmatmul.mubr.bf16.vlgmr.msra.gmra.mrb[120].mxu1 %v2682_v51  ;;  %v2615_v62 = vpack.c.bf16 %v2540_v34, %v2537_v26  ;;  %v2606_v30 = vadd.f32 %v6838_v29, %v5404_v32  ;;  %v6879_v51 = vld [vmem:[#allocation7 + $0x50] sm:$0xff]   ;;  %v6897_v26 = vld [vmem:[#allocation7 + $0x60] sm:$0xff]   ;;  %v6901_v34 = vld [vmem:[#allocation7 + $0x28] sm:$0xff]  }
 0xe21   :  { %v5405_v12 = vpop.f32.mrb[118].mxu1  ;;  %v2614_v28 = vpack.c.bf16 %v2532_v36, %v2529_v60  ;;  %v2598_v4 = vadd.f32 %v6704_v43, %v2597_v39  ;;  %v6909_v32 = vld [vmem:[#allocation7 + $0x30] sm:$0xff]   ;;  %v6917_v36 = vld [vmem:[#allocation7 + $0x38] sm:$0xff]  }
 0xe22   :  { %v2609_v27 = vadd.f32 %v6841_v31, %v5405_v12  ;;  %v2600_v33 = vpop.f32.mrb[119].mxu1  ;;  %v6913_v60 = vld [vmem:[#allocation7 + $0x70] sm:$0xff]   ;;  %v6921_v39 = vld [vmem:[#allocation7 + $0x78] sm:$0xff]  }
 0xe23   :  { %v2601_v6 = vadd.f32 %v6707_v45, %v2600_v33  ;;  %5426 = vmatprep.mubr.bf16.mxu0 %v2614_v28  ;;  %v6929_v33 = vld [vmem:[#allocation2 + $0x18] sm:$0xff] }
 0xe24   :  { %v2684_v58 = vpack.c.bf16 %v2609_v27, %v2606_v30  ;;  %5427 = vmatmul.mubr.bf16.gmra.mrb[124].mxu0 %v2615_v62  ;;  %v6926_v30 = vld [vmem:[#allocation2 + $0x10] sm:$0xff] }
 0xe25   :  { %v2683_v61 = vpack.c.bf16 %v2601_v6, %v2598_v4  ;;  %5462 = vmatprep.mubr.msk.bf16.mxu0 %vm113_vm0, %v6316_v37 }
 0xe27   :  { %5450 = vmatprep.mubr.bf16.mxu1 %v2683_v61 }
 0xe28   :  { %5451 = vmatmul.mubr.bf16.gmra.mrb[124].mxu1 %v2684_v58 }
 0xe29   :  { %5478 = vmatprep.mubr.msk.bf16.mxu1 %vm113_vm0, %v6338_v3 }
 0xeef   :  { %v5424_v0 = vpop.f32.mrb[120].mxu0 }
 0xef0   :  { %v2650_v5 = vpop.f32.mrb[121].mxu0 }
 0xef1   :  { %v5425_v40 = vpop.f32.mrb[122].mxu0 }
 0xef2   :  { %v2751_v41 = vpack.c.bf16 %v5425_v40, %v5424_v0  ;;  %v2653_v42 = vpop.f32.mrb[123].mxu0 }
 0xef3   :  { %v5448_v44 = vpop.f32.mrb[120].mxu1  ;;  %v2750_v46 = vpack.c.bf16 %v2653_v42, %v2650_v5 }
 0xef4   :  { %v2719_v47 = vpop.f32.mrb[121].mxu1 }
 0xef5   :  { %v5449_v48 = vpop.f32.mrb[122].mxu1  ;;  %5454 = vmatprep.subr.bf16.mxu0 %v2750_v46 }
 0xef6   :  { %v2820_v49 = vpack.c.bf16 %v5449_v48, %v5448_v44  ;;  %v2722_v54 = vpop.f32.mrb[123].mxu1  ;;  %5455 = vmatpush3.bf16.msra.mxu0 %v2750_v46 }
 0xef7   :  { %v2819_v55 = vpack.c.bf16 %v2722_v54, %v2719_v47  ;;  %v5428_v7 = vpop.f32.mrb[124].mxu0  ;;  %5456 = vmatprep.subr.bf16.mxu0 %v2751_v41 }
 0xef8   :  { %v2666_v1 = vpop.f32.mrb[125].mxu0 }
 0xef9   :  { %5470 = vmatprep.subr.bf16.mxu1 %v2819_v55  ;;  %v5429_v8 = vpop.f32.mrb[126].mxu0 }
 0xefa   :  { %5471 = vmatpush3.bf16.msra.mxu1 %v2819_v55  ;;  %v2753_v9 = vpack.c.bf16 %v5429_v8, %v5428_v7  ;;  %v2669_v10 = vpop.f32.mrb[127].mxu0  ;;  %5457 = vmatpush3.bf16.msra.mxu0 %v2751_v41 }
 0xefb   :  { %v5452_v11 = vpop.f32.mrb[124].mxu1  ;;  %5472 = vmatprep.subr.bf16.mxu1 %v2820_v49  ;;  %v2752_v16 = vpack.c.bf16 %v2669_v10, %v2666_v1 }
 0xefc   :  { %v2735_v17 = vpop.f32.mrb[125].mxu1 }
 0xefd   :  { %v5453_v18 = vpop.f32.mrb[126].mxu1  ;;  %5458 = vmatprep.subr.bf16.mxu0 %v2752_v16 }
 0xefe   :  { %v2822_v19 = vpack.c.bf16 %v5453_v18, %v5452_v11  ;;  %v2738_v56 = vpop.f32.mrb[127].mxu1  ;;  %5473 = vmatpush3.bf16.msra.mxu1 %v2820_v49  ;;  %5459 = vmatpush3.bf16.msra.mxu0 %v2752_v16 }
 0xeff   :  { %v2821_v57 = vpack.c.bf16 %v2738_v56, %v2735_v17  ;;  %5460 = vmatprep.subr.bf16.mxu0 %v2753_v9 }
 0xf01   :  { %5474 = vmatprep.subr.bf16.mxu1 %v2821_v57 }
 0xf02   :  { %5475 = vmatpush3.bf16.msra.mxu1 %v2821_v57  ;;  %5461 = vmatpush3.bf16.msra.mxu0 %v2753_v9 }
 0xf03   :  { %5476 = vmatprep.subr.bf16.mxu1 %v2822_v19  ;;  %5486 = vmatprep.subr.bf16.mxu0 %v6850_v20 }
 0xf05   :  { %5463 = vmatmul.mubr.msk.bf16.vlgmr.msra.gmra.mrb[128].mxu0 %vm113_vm0, %v6318_v38 }
 0xf06   :  { %5477 = vmatpush3.bf16.msra.mxu1 %v2822_v19  ;;  %5466 = vmatprep.mubr.msk.bf16.mxu0 %vm113_vm0, %v6322_v2 }
 0xf07   :  { %5510 = vmatprep.subr.bf16.mxu1 %v6857_v21  ;;  %5487 = vmatpush3.bf16.msra.mxu0 %v6850_v20 }
 0xf08   :  { %5488 = vmatprep.subr.bf16.mxu0 %v6861_v23 }
 0xf09   :  { %5479 = vmatmul.mubr.msk.bf16.vlgmr.msra.gmra.mrb[128].mxu1 %vm113_vm0, %v6340_v63 }
 0xf0a   :  { %5482 = vmatprep.mubr.msk.bf16.mxu1 %vm113_vm0, %v6343_v13  ;;  %5511 = vmatpush3.bf16.msra.mxu1 %v6857_v21 }
 0xf0b   :  { %5512 = vmatprep.subr.bf16.mxu1 %v6869_v50  ;;  %5489 = vmatpush3.bf16.msra.mxu0 %v6861_v23 }
 0xf0c   :  { %5490 = vmatprep.subr.bf16.mxu0 %v6873_v24 }
 0xf0d   :  { %5467 = vmatmul.mubr.msk.bf16.gmra.mrb[132].mxu0 %vm113_vm0, %v6324_v14 }
 0xf0e   :  { %5513 = vmatpush3.bf16.msra.mxu1 %v6869_v50 }
 0xf0f   :  { %5514 = vmatprep.subr.bf16.mxu1 %v6879_v51  ;;  %5491 = vmatpush3.bf16.msra.mxu0 %v6873_v24 }
 0xf10   :  { %5492 = vmatprep.subr.bf16.mxu0 %v6883_v52 }
 0xf11   :  { %5483 = vmatmul.mubr.msk.bf16.gmra.mrb[132].mxu1 %vm113_vm0, %v6345_v15 }
 0xf12   :  { %5515 = vmatpush3.bf16.msra.mxu1 %v6879_v51 }
 0xf13   :  { %5516 = vmatprep.subr.bf16.mxu1 %v6889_v53  ;;  %5493 = vmatpush3.bf16.msra.mxu0 %v6883_v52 }
 0xf14   :  { %5494 = vmatprep.subr.bf16.mxu0 %v6893_v22 }
 0xf16   :  { %5517 = vmatpush3.bf16.msra.mxu1 %v6889_v53 }
 0xf17   :  { %5518 = vmatprep.subr.bf16.mxu1 %v6897_v26  ;;  %5495 = vmatpush3.bf16.msra.mxu0 %v6893_v22 }
 0xf18   :  { %5496 = vmatprep.subr.bf16.mxu0 %v6901_v34 }
 0xf1a   :  { %5519 = vmatpush3.bf16.msra.mxu1 %v6897_v26 }
 0xf1b   :  { %5520 = vmatprep.subr.bf16.mxu1 %v6905_v35  ;;  %5497 = vmatpush3.bf16.msra.mxu0 %v6901_v34 }
 0xf1c   :  { %5498 = vmatprep.subr.bf16.mxu0 %v6909_v32 }
 0xf1e   :  { %5521 = vmatpush3.bf16.msra.mxu1 %v6905_v35 }
 0xf1f   :  { %5522 = vmatprep.subr.bf16.mxu1 %v6913_v60  ;;  %5499 = vmatpush3.bf16.msra.mxu0 %v6909_v32 }
 0xf20   :  { %5500 = vmatprep.subr.bf16.mxu0 %v6917_v36 }
 0xf22   :  { %5523 = vmatpush3.bf16.msra.mxu1 %v6913_v60 }
 0xf23   :  { %5524 = vmatprep.subr.bf16.mxu1 %v6921_v39  ;;  %5501 = vmatpush3.bf16.msra.mxu0 %v6917_v36 }
 0xf26   :  { %5525 = vmatpush3.bf16.msra.mxu1 %v6921_v39 }
 0xfd8   :  { %v5464_v62 = vpop.f32.mrb[128].mxu0 }
 0xfd9   :  { %v2788_v12 = vpop.f32.mrb[129].mxu0  ;;  %v2797_v27 = vadd.f32 %v6926_v30, %v5464_v62 }
 0xfda   :  { %v5465_v28 = vpop.f32.mrb[130].mxu0  ;;  %v2789_v61 = vadd.f32 %v6692_v25, %v2788_v12 }
 0xfdb   :  { %v2800_v4 = vadd.f32 %v6929_v33, %v5465_v28  ;;  %v2791_v6 = vpop.f32.mrb[131].mxu0 }
 0xfdc   :  { %v5480_v58 = vpop.f32.mrb[128].mxu1  ;;  %v2792_v0 = vadd.f32 %v6695_v59, %v2791_v6 }
 0xfdd   :  { %v2857_v5 = vpop.f32.mrb[129].mxu1  ;;  %v2889_v40 = vpack.c.bf16 %v2800_v4, %v2797_v27  ;;  %v2866_v44 = vadd.f32 %v6926_v30, %v5480_v58 }
 0xfde   :  { %v5481_v41 = vpop.f32.mrb[130].mxu1  ;;  %v2888_v42 = vpack.c.bf16 %v2792_v0, %v2789_v61  ;;  %v2858_v48 = vadd.f32 %v6692_v25, %v2857_v5 }
 0xfdf   :  { %v2869_v46 = vadd.f32 %v6929_v33, %v5481_v41  ;;  %v2860_v47 = vpop.f32.mrb[131].mxu1 }
 0xfe0   :  { %v2861_v49 = vadd.f32 %v6695_v59, %v2860_v47  ;;  %v5468_v54 = vpop.f32.mrb[132].mxu0  ;;  %5502 = vmatprep.mubr.bf16.mxu0 %v2888_v42 }
 0xfe1   :  { %v2958_v55 = vpack.c.bf16 %v2869_v46, %v2866_v44  ;;  %v2804_v7 = vpop.f32.mrb[133].mxu0  ;;  %5503 = vmatmul.mubr.bf16.vlgmr.msra.gmra.mrb[136].mxu0 %v2889_v40  ;;  %v2813_v9 = vadd.f32 %v6838_v29, %v5468_v54 }
 0xfe2   :  { %v2957_v1 = vpack.c.bf16 %v2861_v49, %v2858_v48  ;;  %v5469_v8 = vpop.f32.mrb[134].mxu0  ;;  %v2805_v17 = vadd.f32 %v6704_v43, %v2804_v7 }
 0xfe3   :  { %v2816_v10 = vadd.f32 %v6841_v31, %v5469_v8  ;;  %v2807_v11 = vpop.f32.mrb[135].mxu0 }
 0xfe4   :  { %v5484_v16 = vpop.f32.mrb[132].mxu1  ;;  %5526 = vmatprep.mubr.bf16.mxu1 %v2957_v1  ;;  %v2808_v25 = vadd.f32 %v6707_v45, %v2807_v11 }
 0xfe5   :  { %v2873_v18 = vpop.f32.mrb[133].mxu1  ;;  %5527 = vmatmul.mubr.bf16.vlgmr.msra.gmra.mrb[136].mxu1 %v2958_v55  ;;  %v2891_v59 = vpack.c.bf16 %v2816_v10, %v2813_v9  ;;  %v2882_v57 = vadd.f32 %v6838_v29, %v5484_v16 }
 0xfe6   :  { %v5485_v19 = vpop.f32.mrb[134].mxu1  ;;  %v2890_v56 = vpack.c.bf16 %v2808_v25, %v2805_v17  ;;  %v2874_v28 = vadd.f32 %v6704_v43, %v2873_v18 }
 0xfe7   :  { %v2885_v62 = vadd.f32 %v6841_v31, %v5485_v19  ;;  %v2876_v12 = vpop.f32.mrb[135].mxu1 }
 0xfe8   :  { %v2877_v27 = vadd.f32 %v6707_v45, %v2876_v12  ;;  %5506 = vmatprep.mubr.bf16.mxu0 %v2890_v56  ;;  %v6996_v12 = vld [vmem:[#allocation2] sm:$0xff] }
 0xfe9   :  { %v2960_v4 = vpack.c.bf16 %v2885_v62, %v2882_v57  ;;  %5507 = vmatmul.mubr.bf16.gmra.mrb[140].mxu0 %v2891_v59 }
 0xfea   :  { %v2959_v6 = vpack.c.bf16 %v2877_v27, %v2874_v28  ;;  %5542 = vmatprep.mubr.msk.bf16.mxu0 %vm113_vm0, %v6316_v37  ;;  %v6999_v27 = vld [vmem:[#allocation2 + $0x8] sm:$0xff] }
 0xfec   :  { %5530 = vmatprep.mubr.bf16.mxu1 %v2959_v6 }
 0xfed   :  { %5531 = vmatmul.mubr.bf16.gmra.mrb[140].mxu1 %v2960_v4 }
 0xfee   :  { %5558 = vmatprep.mubr.msk.bf16.mxu1 %vm113_vm0, %v6338_v3 }
0x10b4   :  { %v5504_v58 = vpop.f32.mrb[136].mxu0 }
0x10b5   :  { %v2926_v61 = vpop.f32.mrb[137].mxu0 }
0x10b6   :  { %v5505_v0 = vpop.f32.mrb[138].mxu0 }
0x10b7   :  { %v3027_v5 = vpack.c.bf16 %v5505_v0, %v5504_v58  ;;  %v2929_v40 = vpop.f32.mrb[139].mxu0 }
0x10b8   :  { %v5528_v43 = vpop.f32.mrb[136].mxu1  ;;  %v3026_v41 = vpack.c.bf16 %v2929_v40, %v2926_v61 }
0x10b9   :  { %v2995_v45 = vpop.f32.mrb[137].mxu1 }
0x10ba   :  { %v5529_v42 = vpop.f32.mrb[138].mxu1  ;;  %5534 = vmatprep.subr.bf16.mxu0 %v3026_v41 }
0x10bb   :  { %v3096_v44 = vpack.c.bf16 %v5529_v42, %v5528_v43  ;;  %v2998_v46 = vpop.f32.mrb[139].mxu1  ;;  %5535 = vmatpush3.bf16.msra.mxu0 %v3026_v41 }
0x10bc   :  { %v3095_v47 = vpack.c.bf16 %v2998_v46, %v2995_v45  ;;  %v5508_v48 = vpop.f32.mrb[140].mxu0  ;;  %5536 = vmatprep.subr.bf16.mxu0 %v3027_v5 }
0x10bd   :  { %v2942_v49 = vpop.f32.mrb[141].mxu0 }
0x10be   :  { %5550 = vmatprep.subr.bf16.mxu1 %v3095_v47  ;;  %v5509_v54 = vpop.f32.mrb[142].mxu0 }
0x10bf   :  { %5551 = vmatpush3.bf16.msra.mxu1 %v3095_v47  ;;  %v3029_v55 = vpack.c.bf16 %v5509_v54, %v5508_v48  ;;  %v2945_v7 = vpop.f32.mrb[143].mxu0  ;;  %5537 = vmatpush3.bf16.msra.mxu0 %v3027_v5 }
0x10c0   :  { %v5532_v1 = vpop.f32.mrb[140].mxu1  ;;  %5552 = vmatprep.subr.bf16.mxu1 %v3096_v44  ;;  %v3028_v8 = vpack.c.bf16 %v2945_v7, %v2942_v49 }
0x10c1   :  { %v3011_v9 = vpop.f32.mrb[141].mxu1 }
0x10c2   :  { %v5533_v10 = vpop.f32.mrb[142].mxu1  ;;  %5538 = vmatprep.subr.bf16.mxu0 %v3028_v8 }
0x10c3   :  { %v3098_v11 = vpack.c.bf16 %v5533_v10, %v5532_v1  ;;  %v3014_v16 = vpop.f32.mrb[143].mxu1  ;;  %5553 = vmatpush3.bf16.msra.mxu1 %v3096_v44  ;;  %5539 = vmatpush3.bf16.msra.mxu0 %v3028_v8  ;;  %v7008_v1 = vld [vmem:[#allocation2 + $0x20] sm:$0xff] }
0x10c4   :  { %v3097_v17 = vpack.c.bf16 %v3014_v16, %v3011_v9  ;;  %5540 = vmatprep.subr.bf16.mxu0 %v3029_v55  ;;  %v7011_v9 = vld [vmem:[#allocation2 + $0x28] sm:$0xff] }
0x10c6   :  { %5554 = vmatprep.subr.bf16.mxu1 %v3097_v17 }
0x10c7   :  { %5555 = vmatpush3.bf16.msra.mxu1 %v3097_v17  ;;  %5541 = vmatpush3.bf16.msra.mxu0 %v3029_v55 }
0x10c8   :  { %5556 = vmatprep.subr.bf16.mxu1 %v3098_v11  ;;  %5566 = vmatprep.subr.bf16.mxu0 %v6850_v20 }
0x10ca   :  { %5543 = vmatmul.mubr.msk.bf16.vlgmr.msra.gmra.mrb[144].mxu0 %vm113_vm0, %v6318_v38 }
0x10cb   :  { %5557 = vmatpush3.bf16.msra.mxu1 %v3098_v11  ;;  %5546 = vmatprep.mubr.msk.bf16.mxu0 %vm113_vm0, %v6322_v2 }
0x10cc   :  { %5590 = vmatprep.subr.bf16.mxu1 %v6857_v21  ;;  %5567 = vmatpush3.bf16.msra.mxu0 %v6850_v20 }
0x10cd   :  { %5568 = vmatprep.subr.bf16.mxu0 %v6861_v23 }
0x10ce   :  { %5559 = vmatmul.mubr.msk.bf16.vlgmr.msra.gmra.mrb[144].mxu1 %vm113_vm0, %v6340_v63 }
0x10cf   :  { %5562 = vmatprep.mubr.msk.bf16.mxu1 %vm113_vm0, %v6343_v13  ;;  %5591 = vmatpush3.bf16.msra.mxu1 %v6857_v21 }
0x10d0   :  { %5592 = vmatprep.subr.bf16.mxu1 %v6869_v50  ;;  %5569 = vmatpush3.bf16.msra.mxu0 %v6861_v23 }
0x10d1   :  { %5570 = vmatprep.subr.bf16.mxu0 %v6873_v24 }
0x10d2   :  { %5547 = vmatmul.mubr.msk.bf16.gmra.mrb[148].mxu0 %vm113_vm0, %v6324_v14 }
0x10d3   :  { %5593 = vmatpush3.bf16.msra.mxu1 %v6869_v50 }
0x10d4   :  { %5594 = vmatprep.subr.bf16.mxu1 %v6879_v51  ;;  %5571 = vmatpush3.bf16.msra.mxu0 %v6873_v24 }
0x10d5   :  { %5572 = vmatprep.subr.bf16.mxu0 %v6883_v52 }
0x10d6   :  { %5563 = vmatmul.mubr.msk.bf16.gmra.mrb[148].mxu1 %vm113_vm0, %v6345_v15 }
0x10d7   :  { %5595 = vmatpush3.bf16.msra.mxu1 %v6879_v51 }
0x10d8   :  { %5596 = vmatprep.subr.bf16.mxu1 %v6889_v53  ;;  %5573 = vmatpush3.bf16.msra.mxu0 %v6883_v52 }
0x10d9   :  { %5574 = vmatprep.subr.bf16.mxu0 %v6893_v22 }
0x10db   :  { %5597 = vmatpush3.bf16.msra.mxu1 %v6889_v53 }
0x10dc   :  { %5598 = vmatprep.subr.bf16.mxu1 %v6897_v26  ;;  %5575 = vmatpush3.bf16.msra.mxu0 %v6893_v22 }
0x10dd   :  { %5576 = vmatprep.subr.bf16.mxu0 %v6901_v34 }
0x10df   :  { %5599 = vmatpush3.bf16.msra.mxu1 %v6897_v26 }
0x10e0   :  { %5600 = vmatprep.subr.bf16.mxu1 %v6905_v35  ;;  %5577 = vmatpush3.bf16.msra.mxu0 %v6901_v34 }
0x10e1   :  { %5578 = vmatprep.subr.bf16.mxu0 %v6909_v32 }
0x10e3   :  { %5601 = vmatpush3.bf16.msra.mxu1 %v6905_v35 }
0x10e4   :  { %5602 = vmatprep.subr.bf16.mxu1 %v6913_v60  ;;  %5579 = vmatpush3.bf16.msra.mxu0 %v6909_v32 }
0x10e5   :  { %5580 = vmatprep.subr.bf16.mxu0 %v6917_v36 }
0x10e7   :  { %5603 = vmatpush3.bf16.msra.mxu1 %v6913_v60 }
0x10e8   :  { %5604 = vmatprep.subr.bf16.mxu1 %v6921_v39  ;;  %5581 = vmatpush3.bf16.msra.mxu0 %v6917_v36 }
0x10eb   :  { %5605 = vmatpush3.bf16.msra.mxu1 %v6921_v39 }
0x119d   :  { %v5544_v25 = vpop.f32.mrb[144].mxu0 }
0x119e   :  { %v3064_v18 = vpop.f32.mrb[145].mxu0  ;;  %v3073_v19 = vadd.f32 %v6926_v30, %v5544_v25 }
0x119f   :  { %v5545_v59 = vpop.f32.mrb[146].mxu0  ;;  %v3065_v28 = vadd.f32 %v6996_v12, %v3064_v18 }
0x11a0   :  { %v3076_v56 = vadd.f32 %v6929_v33, %v5545_v59  ;;  %v3067_v57 = vpop.f32.mrb[147].mxu0 }
0x11a1   :  { %v5560_v62 = vpop.f32.mrb[144].mxu1  ;;  %v3068_v4 = vadd.f32 %v6999_v27, %v3067_v57 }
0x11a2   :  { %v3133_v6 = vpop.f32.mrb[145].mxu1  ;;  %v3165_v58 = vpack.c.bf16 %v3076_v56, %v3073_v19  ;;  %v3142_v5 = vadd.f32 %v6926_v30, %v5560_v62 }
0x11a3   :  { %v5561_v61 = vpop.f32.mrb[146].mxu1  ;;  %v3164_v0 = vpack.c.bf16 %v3068_v4, %v3065_v28  ;;  %v3134_v41 = vadd.f32 %v6996_v12, %v3133_v6 }
0x11a4   :  { %v3145_v40 = vadd.f32 %v6929_v33, %v5561_v61  ;;  %v3136_v43 = vpop.f32.mrb[147].mxu1 }
0x11a5   :  { %v3137_v45 = vadd.f32 %v6999_v27, %v3136_v43  ;;  %v5548_v42 = vpop.f32.mrb[148].mxu0  ;;  %5582 = vmatprep.mubr.bf16.mxu0 %v3164_v0 }
0x11a6   :  { %v3234_v44 = vpack.c.bf16 %v3145_v40, %v3142_v5  ;;  %v3080_v46 = vpop.f32.mrb[149].mxu0  ;;  %5583 = vmatmul.mubr.bf16.vlgmr.msra.gmra.mrb[152].mxu0 %v3165_v58  ;;  %v3089_v49 = vadd.f32 %v6838_v29, %v5548_v42 }
0x11a7   :  { %v3233_v47 = vpack.c.bf16 %v3137_v45, %v3134_v41  ;;  %v5549_v48 = vpop.f32.mrb[150].mxu0  ;;  %v3081_v8 = vadd.f32 %v7008_v1, %v3080_v46 }
0x11a8   :  { %v3092_v54 = vadd.f32 %v6841_v31, %v5549_v48  ;;  %v3083_v55 = vpop.f32.mrb[151].mxu0 }
0x11a9   :  { %v5564_v7 = vpop.f32.mrb[148].mxu1  ;;  %5606 = vmatprep.mubr.bf16.mxu1 %v3233_v47  ;;  %v3084_v10 = vadd.f32 %v7011_v9, %v3083_v55 }
0x11aa   :  { %v3149_v11 = vpop.f32.mrb[149].mxu1  ;;  %5607 = vmatmul.mubr.bf16.vlgmr.msra.gmra.mrb[152].mxu1 %v3234_v44  ;;  %v3167_v16 = vpack.c.bf16 %v3092_v54, %v3089_v49  ;;  %v3158_v18 = vadd.f32 %v6838_v29, %v5564_v7 }
0x11ab   :  { %v5565_v17 = vpop.f32.mrb[150].mxu1  ;;  %v3166_v25 = vpack.c.bf16 %v3084_v10, %v3081_v8  ;;  %v3150_v56 = vadd.f32 %v7008_v1, %v3149_v11 }
0x11ac   :  { %v3161_v59 = vadd.f32 %v6841_v31, %v5565_v17  ;;  %v3152_v19 = vpop.f32.mrb[151].mxu1 }
0x11ad   :  { %v3153_v57 = vadd.f32 %v7011_v9, %v3152_v19  ;;  %5586 = vmatprep.mubr.bf16.mxu0 %v3166_v25 }
0x11ae   :  { %v3236_v62 = vpack.c.bf16 %v3161_v59, %v3158_v18  ;;  %5587 = vmatmul.mubr.bf16.gmra.mrb[156].mxu0 %v3167_v16 }
0x11af   :  { %v3235_v28 = vpack.c.bf16 %v3153_v57, %v3150_v56  ;;  %5622 = vmatprep.mubr.msk.bf16.mxu0 %vm113_vm0, %v6316_v37 }
0x11b1   :  { %5610 = vmatprep.mubr.bf16.mxu1 %v3235_v28 }
0x11b2   :  { %5611 = vmatmul.mubr.bf16.gmra.mrb[156].mxu1 %v3236_v62 }
0x11b3   :  { %5638 = vmatprep.mubr.msk.bf16.mxu1 %vm113_vm0, %v6338_v3 }
0x1279   :  { %v5584_v4 = vpop.f32.mrb[152].mxu0 }
0x127a   :  { %v3202_v6 = vpop.f32.mrb[153].mxu0 }
0x127b   :  { %v5585_v58 = vpop.f32.mrb[154].mxu0 }
0x127c   :  { %v3303_v61 = vpack.c.bf16 %v5585_v58, %v5584_v4  ;;  %v3205_v0 = vpop.f32.mrb[155].mxu0 }
0x127d   :  { %v5608_v5 = vpop.f32.mrb[152].mxu1  ;;  %v3302_v40 = vpack.c.bf16 %v3205_v0, %v3202_v6 }
0x127e   :  { %v3271_v43 = vpop.f32.mrb[153].mxu1 }
0x127f   :  { %v5609_v41 = vpop.f32.mrb[154].mxu1  ;;  %5614 = vmatprep.subr.bf16.mxu0 %v3302_v40 }
0x1280   :  { %v3372_v45 = vpack.c.bf16 %v5609_v41, %v5608_v5  ;;  %v3274_v42 = vpop.f32.mrb[155].mxu1  ;;  %5615 = vmatpush3.bf16.msra.mxu0 %v3302_v40 }
0x1281   :  { %v3371_v44 = vpack.c.bf16 %v3274_v42, %v3271_v43  ;;  %v5588_v46 = vpop.f32.mrb[156].mxu0  ;;  %5616 = vmatprep.subr.bf16.mxu0 %v3303_v61 }
0x1282   :  { %v3218_v47 = vpop.f32.mrb[157].mxu0 }
0x1283   :  { %5630 = vmatprep.subr.bf16.mxu1 %v3371_v44  ;;  %v5589_v48 = vpop.f32.mrb[158].mxu0 }
0x1284   :  { %5631 = vmatpush3.bf16.msra.mxu1 %v3371_v44  ;;  %v3305_v49 = vpack.c.bf16 %v5589_v48, %v5588_v46  ;;  %v3221_v54 = vpop.f32.mrb[159].mxu0  ;;  %5617 = vmatpush3.bf16.msra.mxu0 %v3303_v61 }
0x1285   :  { %v5612_v55 = vpop.f32.mrb[156].mxu1  ;;  %5632 = vmatprep.subr.bf16.mxu1 %v3372_v45  ;;  %v3304_v7 = vpack.c.bf16 %v3221_v54, %v3218_v47 }
0x1286   :  { %v3287_v8 = vpop.f32.mrb[157].mxu1 }
0x1287   :  { %v5613_v10 = vpop.f32.mrb[158].mxu1  ;;  %5618 = vmatprep.subr.bf16.mxu0 %v3304_v7 }
0x1288   :  { %v3374_v11 = vpack.c.bf16 %v5613_v10, %v5612_v55  ;;  %v3290_v16 = vpop.f32.mrb[159].mxu1  ;;  %5633 = vmatpush3.bf16.msra.mxu1 %v3372_v45  ;;  %5619 = vmatpush3.bf16.msra.mxu0 %v3304_v7 }
0x1289   :  { %v3373_v17 = vpack.c.bf16 %v3290_v16, %v3287_v8  ;;  %5620 = vmatprep.subr.bf16.mxu0 %v3305_v49 }
0x128b   :  { %5634 = vmatprep.subr.bf16.mxu1 %v3373_v17 }
0x128c   :  { %5635 = vmatpush3.bf16.msra.mxu1 %v3373_v17  ;;  %5621 = vmatpush3.bf16.msra.mxu0 %v3305_v49 }
0x128d   :  { %5636 = vmatprep.subr.bf16.mxu1 %v3374_v11  ;;  %5646 = vmatprep.subr.bf16.mxu0 %v6850_v20 }
0x128f   :  { %5623 = vmatmul.mubr.msk.bf16.vlgmr.msra.gmra.mrb[160].mxu0 %vm113_vm0, %v6318_v38 }
0x1290   :  { %5637 = vmatpush3.bf16.msra.mxu1 %v3374_v11  ;;  %5626 = vmatprep.mubr.msk.bf16.mxu0 %vm113_vm0, %v6322_v2 }
0x1291   :  { %5670 = vmatprep.subr.bf16.mxu1 %v6857_v21  ;;  %5647 = vmatpush3.bf16.msra.mxu0 %v6850_v20 }
0x1292   :  { %5648 = vmatprep.subr.bf16.mxu0 %v6861_v23 }
0x1293   :  { %5639 = vmatmul.mubr.msk.bf16.vlgmr.msra.gmra.mrb[160].mxu1 %vm113_vm0, %v6340_v63 }
0x1294   :  { %5642 = vmatprep.mubr.msk.bf16.mxu1 %vm113_vm0, %v6343_v13  ;;  %5671 = vmatpush3.bf16.msra.mxu1 %v6857_v21 }
0x1295   :  { %5672 = vmatprep.subr.bf16.mxu1 %v6869_v50  ;;  %5649 = vmatpush3.bf16.msra.mxu0 %v6861_v23 }
0x1296   :  { %5650 = vmatprep.subr.bf16.mxu0 %v6873_v24 }
0x1297   :  { %5627 = vmatmul.mubr.msk.bf16.gmra.mrb[164].mxu0 %vm113_vm0, %v6324_v14 }
0x1298   :  { %5673 = vmatpush3.bf16.msra.mxu1 %v6869_v50 }
0x1299   :  { %5674 = vmatprep.subr.bf16.mxu1 %v6879_v51  ;;  %5651 = vmatpush3.bf16.msra.mxu0 %v6873_v24 }
0x129a   :  { %5652 = vmatprep.subr.bf16.mxu0 %v6883_v52 }
0x129b   :  { %5643 = vmatmul.mubr.msk.bf16.gmra.mrb[164].mxu1 %vm113_vm0, %v6345_v15 }
0x129c   :  { %5675 = vmatpush3.bf16.msra.mxu1 %v6879_v51 }
0x129d   :  { %5676 = vmatprep.subr.bf16.mxu1 %v6889_v53  ;;  %5653 = vmatpush3.bf16.msra.mxu0 %v6883_v52 }
0x129e   :  { %5654 = vmatprep.subr.bf16.mxu0 %v6893_v22 }
0x12a0   :  { %5677 = vmatpush3.bf16.msra.mxu1 %v6889_v53 }
0x12a1   :  { %5678 = vmatprep.subr.bf16.mxu1 %v6897_v26  ;;  %5655 = vmatpush3.bf16.msra.mxu0 %v6893_v22 }
0x12a2   :  { %5656 = vmatprep.subr.bf16.mxu0 %v6901_v34 }
0x12a4   :  { %5679 = vmatpush3.bf16.msra.mxu1 %v6897_v26 }
0x12a5   :  { %5680 = vmatprep.subr.bf16.mxu1 %v6905_v35  ;;  %5657 = vmatpush3.bf16.msra.mxu0 %v6901_v34 }
0x12a6   :  { %5658 = vmatprep.subr.bf16.mxu0 %v6909_v32 }
0x12a8   :  { %5681 = vmatpush3.bf16.msra.mxu1 %v6905_v35 }
0x12a9   :  { %5682 = vmatprep.subr.bf16.mxu1 %v6913_v60  ;;  %5659 = vmatpush3.bf16.msra.mxu0 %v6909_v32 }
0x12aa   :  { %5660 = vmatprep.subr.bf16.mxu0 %v6917_v36 }
0x12ac   :  { %5683 = vmatpush3.bf16.msra.mxu1 %v6913_v60 }
0x12ad   :  { %5684 = vmatprep.subr.bf16.mxu1 %v6921_v39  ;;  %5661 = vmatpush3.bf16.msra.mxu0 %v6917_v36 }
0x12b0   :  { %5685 = vmatpush3.bf16.msra.mxu1 %v6921_v39 }
0x1362   :  { %v5624_v25 = vpop.f32.mrb[160].mxu0 }
0x1363   :  { %v3340_v18 = vpop.f32.mrb[161].mxu0  ;;  %v3349_v19 = vadd.f32 %v6926_v30, %v5624_v25 }
0x1364   :  { %v5625_v59 = vpop.f32.mrb[162].mxu0  ;;  %v3341_v28 = vadd.f32 %v6996_v12, %v3340_v18 }
0x1365   :  { %v3352_v56 = vadd.f32 %v6929_v33, %v5625_v59  ;;  %v3343_v57 = vpop.f32.mrb[163].mxu0 }
0x1366   :  { %v5640_v62 = vpop.f32.mrb[160].mxu1  ;;  %v3344_v4 = vadd.f32 %v6999_v27, %v3343_v57 }
0x1367   :  { %v3409_v6 = vpop.f32.mrb[161].mxu1  ;;  %v3441_v58 = vpack.c.bf16 %v3352_v56, %v3349_v19  ;;  %v3418_v5 = vadd.f32 %v6926_v30, %v5640_v62 }
0x1368   :  { %v5641_v61 = vpop.f32.mrb[162].mxu1  ;;  %v3440_v0 = vpack.c.bf16 %v3344_v4, %v3341_v28  ;;  %v3410_v41 = vadd.f32 %v6996_v12, %v3409_v6 }
0x1369   :  { %v3421_v40 = vadd.f32 %v6929_v33, %v5641_v61  ;;  %v3412_v43 = vpop.f32.mrb[163].mxu1 }
0x136a   :  { %v3413_v45 = vadd.f32 %v6999_v27, %v3412_v43  ;;  %v5628_v42 = vpop.f32.mrb[164].mxu0  ;;  %5662 = vmatprep.mubr.bf16.mxu0 %v3440_v0 }
0x136b   :  { %v3510_v44 = vpack.c.bf16 %v3421_v40, %v3418_v5  ;;  %v3356_v46 = vpop.f32.mrb[165].mxu0  ;;  %5663 = vmatmul.mubr.bf16.vlgmr.msra.gmra.mrb[168].mxu0 %v3441_v58  ;;  %v3365_v49 = vadd.f32 %v6838_v29, %v5628_v42 }
0x136c   :  { %v3509_v47 = vpack.c.bf16 %v3413_v45, %v3410_v41  ;;  %v5629_v48 = vpop.f32.mrb[166].mxu0  ;;  %v3357_v8 = vadd.f32 %v7008_v1, %v3356_v46 }
0x136d   :  { %v3368_v54 = vadd.f32 %v6841_v31, %v5629_v48  ;;  %v3359_v55 = vpop.f32.mrb[167].mxu0 }
0x136e   :  { %v5644_v7 = vpop.f32.mrb[164].mxu1  ;;  %5686 = vmatprep.mubr.bf16.mxu1 %v3509_v47  ;;  %v3360_v10 = vadd.f32 %v7011_v9, %v3359_v55 }
0x136f   :  { %v3425_v11 = vpop.f32.mrb[165].mxu1  ;;  %5687 = vmatmul.mubr.bf16.vlgmr.msra.gmra.mrb[168].mxu1 %v3510_v44  ;;  %v3443_v16 = vpack.c.bf16 %v3368_v54, %v3365_v49  ;;  %v3434_v18 = vadd.f32 %v6838_v29, %v5644_v7 }
0x1370   :  { %v5645_v17 = vpop.f32.mrb[166].mxu1  ;;  %v3442_v25 = vpack.c.bf16 %v3360_v10, %v3357_v8  ;;  %v3426_v56 = vadd.f32 %v7008_v1, %v3425_v11 }
0x1371   :  { %v3437_v59 = vadd.f32 %v6841_v31, %v5645_v17  ;;  %v3428_v19 = vpop.f32.mrb[167].mxu1 }
0x1372   :  { %v3429_v57 = vadd.f32 %v7011_v9, %v3428_v19  ;;  %5666 = vmatprep.mubr.bf16.mxu0 %v3442_v25 }
0x1373   :  { %v3512_v62 = vpack.c.bf16 %v3437_v59, %v3434_v18  ;;  %5667 = vmatmul.mubr.bf16.gmra.mrb[172].mxu0 %v3443_v16 }
0x1374   :  { %v3511_v28 = vpack.c.bf16 %v3429_v57, %v3426_v56  ;;  %5702 = vmatprep.mubr.msk.bf16.mxu0 %vm113_vm0, %v6316_v37 }
0x1376   :  { %5690 = vmatprep.mubr.bf16.mxu1 %v3511_v28 }
0x1377   :  { %5691 = vmatmul.mubr.bf16.gmra.mrb[172].mxu1 %v3512_v62 }
0x1378   :  { %5718 = vmatprep.mubr.msk.bf16.mxu1 %vm113_vm0, %v6338_v3 }
0x143e   :  { %v5664_v4 = vpop.f32.mrb[168].mxu0 }
0x143f   :  { %v3478_v6 = vpop.f32.mrb[169].mxu0 }
0x1440   :  { %v5665_v58 = vpop.f32.mrb[170].mxu0 }
0x1441   :  { %v3579_v61 = vpack.c.bf16 %v5665_v58, %v5664_v4  ;;  %v3481_v0 = vpop.f32.mrb[171].mxu0 }
0x1442   :  { %v5688_v5 = vpop.f32.mrb[168].mxu1  ;;  %v3578_v40 = vpack.c.bf16 %v3481_v0, %v3478_v6 }
0x1443   :  { %v3547_v43 = vpop.f32.mrb[169].mxu1 }
0x1444   :  { %v5689_v41 = vpop.f32.mrb[170].mxu1  ;;  %5694 = vmatprep.subr.bf16.mxu0 %v3578_v40 }
0x1445   :  { %v3648_v45 = vpack.c.bf16 %v5689_v41, %v5688_v5  ;;  %v3550_v42 = vpop.f32.mrb[171].mxu1  ;;  %5695 = vmatpush3.bf16.msra.mxu0 %v3578_v40 }
0x1446   :  { %v3647_v44 = vpack.c.bf16 %v3550_v42, %v3547_v43  ;;  %v5668_v46 = vpop.f32.mrb[172].mxu0  ;;  %5696 = vmatprep.subr.bf16.mxu0 %v3579_v61 }
0x1447   :  { %v3494_v47 = vpop.f32.mrb[173].mxu0 }
0x1448   :  { %5710 = vmatprep.subr.bf16.mxu1 %v3647_v44  ;;  %v5669_v48 = vpop.f32.mrb[174].mxu0 }
0x1449   :  { %5711 = vmatpush3.bf16.msra.mxu1 %v3647_v44  ;;  %v3581_v49 = vpack.c.bf16 %v5669_v48, %v5668_v46  ;;  %v3497_v54 = vpop.f32.mrb[175].mxu0  ;;  %5697 = vmatpush3.bf16.msra.mxu0 %v3579_v61  ;;  %v7145_v44 = vld [vmem:[#allocation2 + $0x38] sm:$0xff] }
0x144a   :  { %v5692_v55 = vpop.f32.mrb[172].mxu1  ;;  %5712 = vmatprep.subr.bf16.mxu1 %v3648_v45  ;;  %v3580_v7 = vpack.c.bf16 %v3497_v54, %v3494_v47 }
0x144b   :  { %v3563_v8 = vpop.f32.mrb[173].mxu1 }
0x144c   :  { %v5693_v10 = vpop.f32.mrb[174].mxu1  ;;  %5698 = vmatprep.subr.bf16.mxu0 %v3580_v7 }
0x144d   :  { %v3650_v11 = vpack.c.bf16 %v5693_v10, %v5692_v55  ;;  %v3566_v16 = vpop.f32.mrb[175].mxu1  ;;  %5713 = vmatpush3.bf16.msra.mxu1 %v3648_v45  ;;  %5699 = vmatpush3.bf16.msra.mxu0 %v3580_v7  ;;  %v7142_v45 = vld [vmem:[#allocation2 + $0x30] sm:$0xff] }
0x144e   :  { %v3649_v17 = vpack.c.bf16 %v3566_v16, %v3563_v8  ;;  %5700 = vmatprep.subr.bf16.mxu0 %v3581_v49 }
0x1450   :  { %5714 = vmatprep.subr.bf16.mxu1 %v3649_v17 }
0x1451   :  { %5715 = vmatpush3.bf16.msra.mxu1 %v3649_v17  ;;  %5701 = vmatpush3.bf16.msra.mxu0 %v3581_v49 }
0x1452   :  { %5716 = vmatprep.subr.bf16.mxu1 %v3650_v11  ;;  %5726 = vmatprep.subr.bf16.mxu0 %v6850_v20 }
0x1454   :  { %5703 = vmatmul.mubr.msk.bf16.vlgmr.msra.gmra.mrb[176].mxu0 %vm113_vm0, %v6318_v38 }
0x1455   :  { %5717 = vmatpush3.bf16.msra.mxu1 %v3650_v11  ;;  %5706 = vmatprep.mubr.msk.bf16.mxu0 %vm113_vm0, %v6322_v2 }
0x1456   :  { %5750 = vmatprep.subr.bf16.mxu1 %v6857_v21  ;;  %5727 = vmatpush3.bf16.msra.mxu0 %v6850_v20 }
0x1457   :  { %5728 = vmatprep.subr.bf16.mxu0 %v6861_v23 }
0x1458   :  { %5719 = vmatmul.mubr.msk.bf16.vlgmr.msra.gmra.mrb[176].mxu1 %vm113_vm0, %v6340_v63 }
0x1459   :  { %5722 = vmatprep.mubr.msk.bf16.mxu1 %vm113_vm0, %v6343_v13  ;;  %5751 = vmatpush3.bf16.msra.mxu1 %v6857_v21 }
0x145a   :  { %5752 = vmatprep.subr.bf16.mxu1 %v6869_v50  ;;  %5729 = vmatpush3.bf16.msra.mxu0 %v6861_v23 }
0x145b   :  { %5730 = vmatprep.subr.bf16.mxu0 %v6873_v24 }
0x145c   :  { %5707 = vmatmul.mubr.msk.bf16.gmra.mrb[180].mxu0 %vm113_vm0, %v6324_v14 }
0x145d   :  { %5753 = vmatpush3.bf16.msra.mxu1 %v6869_v50 }
0x145e   :  { %5754 = vmatprep.subr.bf16.mxu1 %v6879_v51  ;;  %5731 = vmatpush3.bf16.msra.mxu0 %v6873_v24 }
0x145f   :  { %5732 = vmatprep.subr.bf16.mxu0 %v6883_v52 }
0x1460   :  { %5723 = vmatmul.mubr.msk.bf16.gmra.mrb[180].mxu1 %vm113_vm0, %v6345_v15 }
0x1461   :  { %5755 = vmatpush3.bf16.msra.mxu1 %v6879_v51 }
0x1462   :  { %5756 = vmatprep.subr.bf16.mxu1 %v6889_v53  ;;  %5733 = vmatpush3.bf16.msra.mxu0 %v6883_v52 }
0x1463   :  { %5734 = vmatprep.subr.bf16.mxu0 %v6893_v22 }
0x1465   :  { %5757 = vmatpush3.bf16.msra.mxu1 %v6889_v53 }
0x1466   :  { %5758 = vmatprep.subr.bf16.mxu1 %v6897_v26  ;;  %5735 = vmatpush3.bf16.msra.mxu0 %v6893_v22 }
0x1467   :  { %5736 = vmatprep.subr.bf16.mxu0 %v6901_v34 }
0x1469   :  { %5759 = vmatpush3.bf16.msra.mxu1 %v6897_v26 }
0x146a   :  { %5760 = vmatprep.subr.bf16.mxu1 %v6905_v35  ;;  %5737 = vmatpush3.bf16.msra.mxu0 %v6901_v34 }
0x146b   :  { %5738 = vmatprep.subr.bf16.mxu0 %v6909_v32 }
0x146d   :  { %5761 = vmatpush3.bf16.msra.mxu1 %v6905_v35 }
0x146e   :  { %5762 = vmatprep.subr.bf16.mxu1 %v6913_v60  ;;  %5739 = vmatpush3.bf16.msra.mxu0 %v6909_v32 }
0x146f   :  { %5740 = vmatprep.subr.bf16.mxu0 %v6917_v36 }
0x1471   :  { %5763 = vmatpush3.bf16.msra.mxu1 %v6913_v60 }
0x1472   :  { %5764 = vmatprep.subr.bf16.mxu1 %v6921_v39  ;;  %5741 = vmatpush3.bf16.msra.mxu0 %v6917_v36 }
0x1475   :  { %5765 = vmatpush3.bf16.msra.mxu1 %v6921_v39 }
0x1527   :  { %v5704_v20 = vpop.f32.mrb[176].mxu0 }
0x1528   :  { %v3616_v21 = vpop.f32.mrb[177].mxu0  ;;  %v3625_v50 = vadd.f32 %v6926_v30, %v5704_v20 }
0x1529   :  { %v5705_v23 = vpop.f32.mrb[178].mxu0  ;;  %v3617_v53 = vadd.f32 %v6996_v12, %v3616_v21 }
0x152a   :  { %v3628_v24 = vadd.f32 %v6929_v33, %v5705_v23  ;;  %v3619_v51 = vpop.f32.mrb[179].mxu0 }
0x152b   :  { %v5720_v52 = vpop.f32.mrb[176].mxu1  ;;  %v3620_v22 = vadd.f32 %v6999_v27, %v3619_v51 }
0x152c   :  { %v3685_v26 = vpop.f32.mrb[177].mxu1  ;;  %v3717_v34 = vpack.c.bf16 %v3628_v24, %v3625_v50  ;;  %v3694_v60 = vadd.f32 %v6926_v30, %v5720_v52 }
0x152d   :  { %v5721_v35 = vpop.f32.mrb[178].mxu1  ;;  %v3716_v32 = vpack.c.bf16 %v3620_v22, %v3617_v53  ;;  %v3686_v25 = vadd.f32 %v6996_v12, %v3685_v26 }
0x152e   :  { %v3697_v36 = vadd.f32 %v6929_v33, %v5721_v35  ;;  %v3688_v39 = vpop.f32.mrb[179].mxu1 }
0x152f   :  { %v3689_v18 = vadd.f32 %v6999_v27, %v3688_v39  ;;  %v5708_v59 = vpop.f32.mrb[180].mxu0  ;;  %5742 = vmatprep.mubr.bf16.mxu0 %v3716_v32 }
0x1530   :  { %v3786_v19 = vpack.c.bf16 %v3697_v36, %v3694_v60  ;;  %v3632_v56 = vpop.f32.mrb[181].mxu0  ;;  %5743 = vmatmul.mubr.bf16.vlgmr.msra.gmra.mrb[184].mxu0 %v3717_v34  ;;  %v3641_v28 = vadd.f32 %v6838_v29, %v5708_v59  ;;  %v6044_v36 = vmov 0  }
0x1531   :  { %v3785_v57 = vpack.c.bf16 %v3689_v18, %v3686_v25  ;;  %v5709_v62 = vpop.f32.mrb[182].mxu0  ;;  %v3633_v61 = vadd.f32 %v7008_v1, %v3632_v56  ;;  %5852 = vset.pattern.permute.xlu1 %v6044_v36  ;;  %5853 = vset.pattern.permute.xlu0 %v6044_v36 }
0x1532   :  { %v3644_v4 = vadd.f32 %v6841_v31, %v5709_v62  ;;  %v3635_v6 = vpop.f32.mrb[183].mxu0 }
0x1533   :  { %v5724_v58 = vpop.f32.mrb[180].mxu1  ;;  %5766 = vmatprep.mubr.bf16.mxu1 %v3785_v57  ;;  %v3636_v0 = vadd.f32 %v7011_v9, %v3635_v6 }
0x1534   :  { %v3701_v5 = vpop.f32.mrb[181].mxu1  ;;  %5767 = vmatmul.mubr.bf16.vlgmr.msra.gmra.mrb[184].mxu1 %v3786_v19  ;;  %v3719_v40 = vpack.c.bf16 %v3644_v4, %v3641_v28  ;;  %v3710_v42 = vadd.f32 %v7142_v45, %v5724_v58 }
0x1535   :  { %v5725_v43 = vpop.f32.mrb[182].mxu1  ;;  %v3718_v41 = vpack.c.bf16 %v3636_v0, %v3633_v61  ;;  %v3702_v46 = vadd.f32 %v7008_v1, %v3701_v5 }
0x1536   :  { %v3713_v29 = vadd.f32 %v7145_v44, %v5725_v43  ;;  %v3704_v31 = vpop.f32.mrb[183].mxu1 }
0x1537   :  { %v3705_v47 = vadd.f32 %v7011_v9, %v3704_v31  ;;  %5746 = vmatprep.mubr.bf16.mxu0 %v3718_v41 }
0x1538   :  { %v3788_v48 = vpack.c.bf16 %v3713_v29, %v3710_v42  ;;  %5747 = vmatmul.mubr.bf16.gmra.mrb[188].mxu0 %v3719_v40  ;;  %v5942_v29 = vld [vmem:[#allocation2 + $0x10] sm:$0xff] }
0x1539   :  { %v3787_v49 = vpack.c.bf16 %v3705_v47, %v3702_v46  ;;  %5782 = vmatprep.mubr.msk.bf16.mxu0 %vm113_vm0, %v6316_v37 }
0x153b   :  { %5770 = vmatprep.mubr.bf16.mxu1 %v3787_v49 }
0x153c   :  { %5771 = vmatmul.mubr.bf16.gmra.mrb[188].mxu1 %v3788_v48 }
0x153d   :  { %5798 = vmatprep.mubr.msk.bf16.mxu1 %vm113_vm0, %v6338_v3 }
0x1603   :  { %v5744_v54 = vpop.f32.mrb[184].mxu0 }
0x1604   :  { %v3754_v55 = vpop.f32.mrb[185].mxu0 }
0x1605   :  { %v5745_v7 = vpop.f32.mrb[186].mxu0 }
0x1606   :  { %v3855_v8 = vpack.c.bf16 %v5745_v7, %v5744_v54  ;;  %v3757_v10 = vpop.f32.mrb[187].mxu0 }
0x1607   :  { %v5768_v11 = vpop.f32.mrb[184].mxu1  ;;  %v3854_v16 = vpack.c.bf16 %v3757_v10, %v3754_v55 }
0x1608   :  { %v3823_v17 = vpop.f32.mrb[185].mxu1 }
0x1609   :  { %v5769_v20 = vpop.f32.mrb[186].mxu1  ;;  %5774 = vmatprep.subr.bf16.mxu0 %v3854_v16 }
0x160a   :  { %v3924_v21 = vpack.c.bf16 %v5769_v20, %v5768_v11  ;;  %v3826_v23 = vpop.f32.mrb[187].mxu1  ;;  %5775 = vmatpush3.bf16.msra.mxu0 %v3854_v16  ;;  %v71_v20 = vld [vmem:[%s7282_s3 + $0x8] sm:$0xff] }
0x160b   :  { %v3923_v50 = vpack.c.bf16 %v3826_v23, %v3823_v17  ;;  %v5748_v37 = vpop.f32.mrb[188].mxu0  ;;  %5776 = vmatprep.subr.bf16.mxu0 %v3855_v8  ;;  %v70_v17 = vld [vmem:[%s7282_s3] sm:$0xff]  ;;  %s6045_s3 = smov [#allocation8]  }
0x160c   :  { %v3770_v24 = vpop.f32.mrb[189].mxu0  ;;  %s4136_s23 = sshll.u32 %s6045_s3, 4  ;;  %s4137_s23 = int_to_ptr.vmem [resolvable:$true] %s4136_s23 }
0x160d   :  { %5790 = vmatprep.subr.bf16.mxu1 %v3923_v50  ;;  %v5749_v51 = vpop.f32.mrb[190].mxu0  ;;  %s6009_s25 = scalar_lea.vmem %s4137_s23, 1024  ;;  %p6014_p11 = scmp.lt.s32.totalorder %s4137_s23, %s4137_s23 }
0x160e   :  { %5791 = vmatpush3.bf16.msra.mxu1 %v3923_v50  ;;  %v3857_v3 = vpack.c.bf16 %v5749_v51, %v5748_v37  ;;  %v3773_v52 = vpop.f32.mrb[191].mxu0  ;;  %5777 = vmatpush3.bf16.msra.mxu0 %v3855_v8  ;;  %p6010_p10 = scmp.ne.s32.totalorder %s4137_s23, %s6009_s25  ;;  %p6015_p12 = scmp.lt.s32.totalorder %s6009_s25, %s6009_s25 }
0x160f   :  { %v5772_v53 = vpop.f32.mrb[188].mxu1  ;;  %5792 = vmatprep.subr.bf16.mxu1 %v3924_v21  ;;  %v3856_v22 = vpack.c.bf16 %v3773_v52, %v3770_v24 }
0x1610   :  { %v3839_v26 = vpop.f32.mrb[189].mxu1  ;;  %p6016_p13 = por %p6015_p12, %p6014_p11 }
0x1611   :  { %v5773_v34 = vpop.f32.mrb[190].mxu1  ;;  %5778 = vmatprep.subr.bf16.mxu0 %v3856_v22 }
0x1612   :  { %v3926_v35 = vpack.c.bf16 %v5773_v34, %v5772_v53  ;;  %v3842_v32 = vpop.f32.mrb[191].mxu1  ;;  %5793 = vmatpush3.bf16.msra.mxu1 %v3924_v21  ;;  %5779 = vmatpush3.bf16.msra.mxu0 %v3856_v22  ;;  %v72_v21 = vpack.c.bf16 %v71_v20, %v70_v17  ;;  %p6017_p0 = pnand %p6016_p13, %p6010_p10 }
0x1613   :  { %v3925_v60 = vpack.c.bf16 %v3842_v32, %v3839_v26  ;;  %5780 = vmatprep.subr.bf16.mxu0 %v3857_v3 }
0x1615   :  { %5794 = vmatprep.subr.bf16.mxu1 %v3925_v60 }
0x1616   :  { %5795 = vmatpush3.bf16.msra.mxu1 %v3925_v60  ;;  %5781 = vmatpush3.bf16.msra.mxu0 %v3857_v3 }
0x1617   :  { %5796 = vmatprep.subr.bf16.mxu1 %v3926_v35 }
0x1619   :  { %5783 = vmatmul.mubr.msk.bf16.vlgmr.msra.gmra.mrb[192].mxu0 %vm113_vm0, %v6318_v38  ;;  %v66_v38 = vld [vmem:[%s7283_s4] sm:$0xff] }
0x161a   :  { %5797 = vmatpush3.bf16.msra.mxu1 %v3926_v35  ;;  %5786 = vmatprep.mubr.msk.bf16.mxu0 %vm113_vm0, %v6322_v2  ;;  %v67_v2 = vld [vmem:[%s7283_s4 + $0x8] sm:$0xff] }
0x161b   :  { %4002 = vperm.xlu1 %5852, %v66_v38   ;;  %4007 = vperm.xlu0 %5853, %v67_v2  }
0x161d   :  { %5799 = vmatmul.mubr.msk.bf16.vlgmr.msra.gmra.mrb[192].mxu1 %vm113_vm0, %v6340_v63  ;;  %v69_v63 = vld [vmem:[%s7284_s5 + $0x8] sm:$0xff] }
0x161e   :  { %5802 = vmatprep.mubr.msk.bf16.mxu1 %vm113_vm0, %v6343_v13 }
0x1621   :  { %5787 = vmatmul.mubr.msk.bf16.gmra.mrb[196].mxu0 %vm113_vm0, %v6324_v14  ;;  %v68_v14 = vld [vmem:[%s7284_s5] sm:$0xff] }
0x1622   :  { %4045 = vmatprep.mubr.bf16.mxu0 %v6044_v36  ;;  %4062 = vperm.xlu1 %5852, %v68_v14  }
0x1625   :  { %5803 = vmatmul.mubr.msk.bf16.gmra.mrb[196].mxu1 %vm113_vm0, %v6345_v15 }
0x1626   :  { %4067 = vperm.xlu1 %5852, %v69_v63  }
0x169a   :  { %v4003_v23 = vpop.permute.xlu1 %4002  ;;  %v4008_v50 = vpop.permute.xlu0 %4007 }
0x16a1   :  { %v4063_v26 = vpop.permute.xlu1 %4062 }
0x16a5   :  { %v4068_v60 = vpop.permute.xlu1 %4067 }
0x16ec   :  { %v5784_v13 = vpop.f32.mrb[192].mxu0 }
0x16ed   :  { %v3892_v15 = vpop.f32.mrb[193].mxu0  ;;  %v7205_v31 = vadd.f32 %v5942_v29, %v5784_v13 }
0x16ee   :  { %v5785_v39 = vpop.f32.mrb[194].mxu0  ;;  %v7182_v57 = vadd.f32 %v6996_v12, %v3892_v15 }
0x16ef   :  { %v3895_v25 = vpop.f32.mrb[195].mxu0 }
0x16f0   :  { %v5800_v18 = vpop.f32.mrb[192].mxu1  ;;  %v7179_v19 = vadd.f32 %v6999_v27, %v3895_v25 }
0x16f1   :  { %v3961_v59 = vpop.f32.mrb[193].mxu1  ;;  %v7196_v5 = vadd.f32 %v6926_v30, %v5800_v18 }
0x16f2   :  { %v5801_v56 = vpop.f32.mrb[194].mxu1  ;;  %v7185_v28 = vadd.f32 %v6996_v12, %v3961_v59  ;;  %v3992_v61 = vpack.c.bf16 %v7179_v19, %v7182_v57  ;;  %v7201_v12 = vadd.f32 %v6929_v33, %v5785_v39 }
0x16f3   :  { %v3964_v62 = vpop.f32.mrb[195].mxu1  ;;  %v7188_v4 = vadd.f32 %v6929_v33, %v5801_v56 }
0x16f4   :  { %v7191_v6 = vadd.f32 %v6999_v27, %v3964_v62  ;;  %v5788_v58 = vpop.f32.mrb[196].mxu0  ;;  %v3993_v33 = vpack.c.bf16 %v7201_v12, %v7205_v31 }
0x16f5   :  { %v3908_v0 = vpop.f32.mrb[197].mxu0  ;;  %v3997_v27 = vpack.c.bf16 %v7188_v4, %v7196_v5 }
0x16f6   :  { %v3996_v40 = vpack.c.bf16 %v7191_v6, %v7185_v28  ;;  %v5789_v43 = vpop.f32.mrb[198].mxu0  ;;  %v7213_v48 = vadd.f32 %v7008_v1, %v3908_v0 }
0x16f7   :  { %v3911_v41 = vpop.f32.mrb[199].mxu0  ;;  %v7232_v16 = vadd.f32 %v7145_v44, %v5789_v43 }
0x16f8   :  { %v5804_v42 = vpop.f32.mrb[196].mxu1  ;;  %4013 = vmatprep.subr.bf16.mxu0 %v3996_v40  ;;  %v7208_v30 = vadd.f32 %v7011_v9, %v3911_v41 }
0x16f9   :  { %v3977_v46 = vpop.f32.mrb[197].mxu1  ;;  %4014 = vmatpush1.bf16.msra.mxu0 %v3992_v61  ;;  %v7227_v10 = vadd.f32 %v7142_v45, %v5804_v42 }
0x16fa   :  { %v5805_v47 = vpop.f32.mrb[198].mxu1  ;;  %4015 = vmatprep.subr.bf16.mxu0 %v3997_v27  ;;  %v7216_v54 = vadd.f32 %v7008_v1, %v3977_v46  ;;  %v3994_v8 = vpack.c.bf16 %v7208_v30, %v7213_v48 }
0x16fb   :  { %v3980_v49 = vpop.f32.mrb[199].mxu1  ;;  %v7219_v55 = vadd.f32 %v7145_v44, %v5805_v47 }
0x16fc   :  { %v7222_v7 = vadd.f32 %v7011_v9, %v3980_v49  ;;  %v7237_v9 = vadd.f32 %v7142_v45, %v5788_v58 }
0x16fd   :  { %4016 = vmatpush1.bf16.msra.mxu0 %v3993_v33  ;;  %v3999_v1 = vpack.c.bf16 %v7219_v55, %v7227_v10 }
0x16fe   :  { %v3998_v11 = vpack.c.bf16 %v7222_v7, %v7216_v54  ;;  %v3995_v44 = vpack.c.bf16 %v7232_v16, %v7237_v9 }
0x1700   :  { %4017 = vmatprep.subr.bf16.mxu0 %v3998_v11 }
0x1701   :  { %4018 = vmatpush1.bf16.msra.mxu0 %v3994_v8 }
0x1702   :  { %4019 = vmatprep.subr.bf16.mxu0 %v3999_v1 }
0x1705   :  { %4020 = vmatpush1.bf16.msra.mxu0 %v3995_v44 }
0x1708   :  { %4277 = vmatmul.mubr.msk.bf16.vlgmr.msra.gmra.mrb[200].mxu0 %vm113_vm0, %v72_v21 }
0x17db   :  { %v4047_v45 = vpop.f32.mrb[200].mxu0 }
0x17dc   :  { %v4048_v37 = vadd.f32 %v4047_v45, %v4003_v23  ;;  %v4049_v24 = vpop.f32.mrb[201].mxu0 }
0x17dd   :  { %v4050_v51 = vadd.f32 %v4049_v24, %v4003_v23  ;;  %v4051_v3 = vpop.f32.mrb[202].mxu0 }
0x17de   :  { %5878 = vtanh.f32 %v4048_v37  ;;  %v4052_v52 = vadd.f32 %v4051_v3, %v4008_v50  ;;  %v4053_v53 = vpop.f32.mrb[203].mxu0 }
0x17df   :  { %5880 = vtanh.f32 %v4050_v51  ;;  %v4054_v22 = vadd.f32 %v4053_v53, %v4008_v50 }
0x17e0   :  { %5882 = vtanh.f32 %v4052_v52 }
0x17e1   :  { %5884 = vtanh.f32 %v4054_v22 }
0x17e8   :  { %v5879_v34 = vpop.eup %5878 }
0x17e9   :  { %v5881_v35 = vpop.eup %5880  ;;  %v4070_v38 = vmul.f32 %v5879_v34, %v4063_v26 }
0x17ea   :  { %v5883_v32 = vpop.eup %5882  ;;  %v4071_v14 = vmul.f32 %v5881_v35, %v4063_v26 }
0x17eb   :  { %v5885_v36 = vpop.eup %5884  ;;  %v4072_v2 = vmul.f32 %v5883_v32, %v4068_v60 }
0x17ec   :  { %v4073_v63 = vmul.f32 %v5885_v36, %v4068_v60 }
0x17ed   :  { %v4074_v13 = vadd.f32 %v4072_v2, %v4070_v38 }
0x17ee   :  { %v4081_v15 = vadd.f32 %v4073_v63, %v4071_v14 }
0x17ef   :  { %v4075_v39 = vrot.slane %v4074_v13, 4 }
0x17f0   :  { %v4082_v25 = vrot.slane %v4081_v15, 4 }
0x17f1   :  { %v4076_v18 = vadd.f32 %v4075_v39, %v4074_v13 }
0x17f2   :  { %v4083_v59 = vadd.f32 %v4082_v25, %v4081_v15 }
0x17f3   :  { %v4077_v56 = vrot.slane %v4076_v18, 2 }
0x17f4   :  { %v4084_v62 = vrot.slane %v4083_v59, 2 }
0x17f5   :  { %v4078_v58 = vadd.f32 %v4077_v56, %v4076_v18 }
0x17f6   :  { %v4085_v61 = vadd.f32 %v4084_v62, %v4083_v59 }
0x17f7   :  { %v4079_v0 = vrot.slane %v4078_v58, 1 }
0x17f8   :  { %v4086_v40 = vrot.slane %v4085_v61, 1 }
0x17f9   :  { %v4080_v43 = vadd.f32 %v4079_v0, %v4078_v58 }
0x17fa   :  { %v4087_v41 = vadd.f32 %v4086_v40, %v4085_v61 }
0x17fc   :  { %v4088_v27 = vmax.f32 %v4080_v43, %v4087_v41 }
0x17fe   :  { %v4089_v42 = vsub.f32 %v4080_v43, %v4088_v27  ;;  %v4092_v29 = vsub.f32 %v4087_v41, %v4088_v27 }
0x1800   :  { %v4090_v46 = vmul.f32 1.442695, %v4089_v42  ;;  %v4093_v47 = vmul.f32 1.442695, %v4092_v29 }
0x1802   :  { %5886 = vpow2.f32 %v4090_v46 }
0x1803   :  { %5888 = vpow2.f32 %v4093_v47 }
0x180c   :  { %v5887_v33 = vpop.eup %5886 }
0x180d   :  { %v5889_v49 = vpop.eup %5888 }
0x180e   :  { %v4095_v8 = vadd.f32 %v5889_v49, %v5887_v33 }
0x1810   :  { %5890 = vrcp.f32 %v4095_v8 }
0x181a   :  { %v5891_v11 = vpop.eup %5890 }
0x181b   :  { %v4097_v1 = vmul.f32 %v5891_v11, %v5887_v33  ;;  %v4106_v17 = vmul.f32 %v5891_v11, %v5889_v49 }
0x181d   :  { %v4098_v20 = vmul.f32 %v4097_v1, %v7182_v57  ;;  %v4099_v44 = vmul.f32 %v4097_v1, %v7179_v19  ;;  %v4100_v21 = vmul.f32 %v4097_v1, %v7205_v31  ;;  %v4101_v23 = vmul.f32 %v4097_v1, %v7201_v12 }
0x181e   :  { %v4102_v45 = vmul.f32 %v4097_v1, %v7213_v48  ;;  %v4103_v50 = vmul.f32 %v4097_v1, %v7208_v30  ;;  %v4104_v37 = vmul.f32 %v4097_v1, %v7237_v9  ;;  %v4105_v24 = vmul.f32 %v4097_v1, %v7232_v16 }
0x181f   :  { %v4107_v51 = vmul.f32 %v4106_v17, %v7185_v28  ;;  %v4108_v3 = vmul.f32 %v4106_v17, %v7191_v6  ;;  %v4109_v57 = vmul.f32 %v4106_v17, %v7196_v5  ;;  %v4110_v19 = vmul.f32 %v4106_v17, %v7188_v4 }
0x1820   :  { %v4111_v12 = vmul.f32 %v4106_v17, %v7216_v54  ;;  %v4112_v31 = vmul.f32 %v4106_v17, %v7222_v7  ;;  %v4113_v30 = vmul.f32 %v4106_v17, %v7227_v10  ;;  %v4114_v48 = vmul.f32 %v4106_v17, %v7219_v55 }
0x1821   :  { %v4115_v9 = vadd.f32 %v4107_v51, %v4098_v20  ;;  %v4116_v16 = vadd.f32 %v4108_v3, %v4099_v44  ;;  %v4117_v52 = vadd.f32 %v4109_v57, %v4100_v21  ;;  %v4118_v28 = vadd.f32 %v4110_v19, %v4101_v23 }
0x1822   :  { %v4119_v53 = vadd.f32 %v4111_v12, %v4102_v45  ;;  %v4120_v6 = vadd.f32 %v4112_v31, %v4103_v50  ;;  %v4121_v22 = vadd.f32 %v4113_v30, %v4104_v37  ;;  %v4122_v5 = vadd.f32 %v4114_v48, %v4105_v24 }
0x1823   :  { %4123 = vst [vmem:[#allocation8] sm:$0xff] %v4115_v9  ;;  %4124 = vst [vmem:[#allocation8 + $0x8] sm:$0xff] %v4116_v16 }
0x1824   :  { %4125 = vst [vmem:[#allocation8 + $0x10] sm:$0xff] %v4117_v52  ;;  %4126 = vst [vmem:[#allocation8 + $0x18] sm:$0xff] %v4118_v28 }
0x1825   :  { %4127 = vst [vmem:[#allocation8 + $0x20] sm:$0xff] %v4119_v53  ;;  %4128 = vst [vmem:[#allocation8 + $0x28] sm:$0xff] %v4120_v6 }
0x1826   :  { %4129 = vst [vmem:[#allocation8 + $0x30] sm:$0xff] %v4121_v22  ;;  %4130 = vst [vmem:[#allocation8 + $0x38] sm:$0xff] %v4122_v5 }
0x1827   :  { %6020 = shalt.err (!%p6017_p0)
}
0x1828   :  { %s6021_s28 = scalar_lea.hbm %s7285_s6, 1024 }
0x1829   :  { %p6022_p1 = scmp.ne.s32.totalorder %s7285_s6, %s6021_s28  ;;  %p6025_p2 = scmp.lt.u32.totalorder %s6021_s28, %s7285_s6 }
0x182b   :  { %p6027_p3 = pnand %p6025_p2, %p6022_p1 }
0x182d   :  { %6030 = shalt.err (!%p6027_p3)
}
0x182e   :  { %4142 = dma.vmem_to_hbm [thread:$0]  %s4137_s23, 1024, %s7285_s6, [#allocation4], %s6039_s9, %s6039_s9, %s6040_s10  }
0x182f   :  { %6035 = dma.done.wait [#allocation4], 1024  }
0x1830   :  { %6036 = vsyncadd [#allocation4], 4294966272 }
0x1831   :  { %4146 = vsyncpa [#allocation3], 1 }
0x1832   :  { %4147 = vsyncpa [#allocation6], 1 }
0x1833   :  { %4148 = vsyncpa [#allocation4], 1 }

</bundles_post_ra>
